<compile_context>
chip_gen: v7x
topology: tpu7x:2x2x1
jax: 0.10.0
libtpu: 0.0.40
codegen_flags: <defaults>
</compile_context>

<pallas_src>
import functools

import jax
import jax.numpy as jnp
from jax.experimental import pallas as pl
from jax.experimental.pallas import tpu as pltpu


def _round_up(x, m):
    return (x + m - 1) // m * m


def _pick_time_chunk(T, Bp, I, Hp, itemsize, budget_bytes=24 << 20, cap=64):
    """Largest time chunk whose per-chunk VMEM footprint fits the budget."""
    # Stationary, direction-resident operands (counted once) + h scratches.
    fixed = 2 * (I * 3 * Hp + Hp * 3 * Hp + 4 * Hp + Bp * Hp) * itemsize
    fixed += 2 * Bp * Hp * 4
    # Per unit of time chunk: double-buffered x blocks (x2 directions),
    # double-buffered output blocks (x2 directions), in-kernel f32 gx temps.
    per_tc = 2 * (2 * Bp * I * itemsize + 2 * Bp * Hp * itemsize
                  + Bp * 3 * Hp * 4)
    avail = budget_bytes - fixed
    tc = max(1, min(cap, avail // per_tc))
    if T <= tc:
        return T
    # Prefer a divisor of T near tc so no padded tail chunk is needed.
    for cand in range(tc, max(tc // 2, 1) - 1, -1):
        if T % cand == 0:
            return cand
    return tc


def _bigru_chunk_kernel(xf_ref, xb_ref, wih_ref, whh_ref, gxb_ref, bhn_ref,
                        h0_ref, of_ref, ob_ref, hf_s, hb_s,
                        *, hidden, chunk, seq_len, total_len):
    """One time chunk, both directions interleaved.

    xf_ref  : (TC, Bp, I)   x chunk for the forward direction (time block c)
    xb_ref  : (TC, Bp, I)   x chunk for the backward direction (block NC-1-c)
    wih_ref : (2, I, 3Hp)   input->gates weights (stationary)
    whh_ref : (2, Hp, 3Hp)  hidden->gates weights (stationary)
    gxb_ref : (2, 1, 3Hp)   b_ih with the r/z slices of b_hh folded in (f32)
    bhn_ref : (2, 1, Hp)    b_hn (must stay inside r*(...)) (f32)
    h0_ref  : (2, Bp, Hp)   initial hidden states
    of_ref  : (TC, Bp, Hp)  forward outputs for this time block
    ob_ref  : (TC, Bp, Hp)  backward outputs for this time block
    hf_s/hb_s : (Bp, Hp) f32 carried hidden states across chunks
    """
    c = pl.program_id(0)
    H = hidden
    H3 = 3 * hidden
    Bp = hf_s.shape[0]

    @pl.when(c == 0)
    def _():
        hf_s[...] = h0_ref[0].astype(jnp.float32)
        hb_s[...] = h0_ref[1].astype(jnp.float32)

    w_ih_f, w_ih_b = wih_ref[0], wih_ref[1]
    w_hh_f, w_hh_b = whh_ref[0], whh_ref[1]
    gxb_f = gxb_ref[0].astype(jnp.float32)                    # (1, 3Hp)
    gxb_b = gxb_ref[1].astype(jnp.float32)
    # Hoist the b_hn broadcasts out of the unrolled loop.
    bhn_f = jnp.broadcast_to(bhn_ref[0].astype(jnp.float32), (Bp, H))
    bhn_b = jnp.broadcast_to(bhn_ref[1].astype(jnp.float32), (Bp, H))

    # Hoisted input->gates matmul: one big MXU matmul per direction per chunk
    # (this replaces the old HBM-resident f32 gx tensor).
    xf = xf_ref[...].reshape(chunk * Bp, -1)
    xb = xb_ref[...].reshape(chunk * Bp, -1)
    gxf = (jnp.dot(xf.astype(w_ih_f.dtype), w_ih_f,
                   preferred_element_type=jnp.float32) + gxb_f
           ).reshape(chunk, Bp, H3)
    gxb = (jnp.dot(xb.astype(w_ih_b.dtype), w_ih_b,
                   preferred_element_type=jnp.float32) + gxb_b
           ).reshape(chunk, Bp, H3)

    needs_mask = total_len != seq_len  # static Python bool

    def gru_cell(gx, h, w_hh, b_hn):
        gh = jnp.dot(h.astype(w_hh.dtype), w_hh,
                     preferred_element_type=jnp.float32)       # (Bp, 3Hp)
        r = jax.nn.sigmoid(gx[:, :H] + gh[:, :H])
        z = jax.nn.sigmoid(gx[:, H:2 * H] + gh[:, H:2 * H])
        n = jnp.tanh(gx[:, 2 * H:] + r * (gh[:, 2 * H:] + b_hn))
        return (1.0 - z) * n + z * h

    def step(j, h_f, h_b):
        jb = chunk - 1 - j                      # backward walks chunk in reverse
        h_f_new = gru_cell(gxf[j], h_f, w_hh_f, bhn_f)
        h_b_new = gru_cell(gxb[jb], h_b, w_hh_b, bhn_b)
        if needs_mask:
            # Zero-padded tail time steps must not advance the backward state
            # (they are processed *before* the real sequence in reverse order).
            t_b = (pl.num_programs(0) - 1 - c) * chunk + jb
            h_b_new = jnp.where(t_b < seq_len, h_b_new, h_b)
        of_ref[j] = h_f_new.astype(of_ref.dtype)
        ob_ref[jb] = h_b_new.astype(ob_ref.dtype)
        return h_f_new, h_b_new

    h_f = hf_s[...]
    h_b = hb_s[...]
    if chunk <= 16:
        # Fully static unroll: Python-constant local time indices, no dynamic
        # address computation per step.
        for j in range(chunk):
            h_f, h_b = step(j, h_f, h_b)
    else:
        def body(j, carry):
            return step(j, *carry)
        h_f, h_b = jax.lax.fori_loop(0, chunk, body, (h_f, h_b), unroll=8)

    hf_s[...] = h_f
    hb_s[...] = h_b


def bigru_forward(x, params, h0=None):
    """Bidirectional single-layer GRU. Mirrors torch.nn.GRU(I, H, bidirectional=True)."""
    T, B, I = x.shape
    H = params["w_ih"].shape[-1] // 3
    dtype = x.dtype

    if h0 is None:
        h0 = jnp.zeros((2, B, H), dtype)

    # ---- pad to TPU-friendly shapes (zero padding is GRU-invariant) --------
    Bp = _round_up(B, 8)
    Hp = _round_up(H, 128)
    pH = Hp - H
    itemsize = jnp.dtype(params["w_hh"].dtype).itemsize
    TC = _pick_time_chunk(T, Bp, I, Hp, itemsize)
    Tp = _round_up(T, TC)
    NC = Tp // TC

    def pad_gate_last(a):
        # (..., 3H) -> (..., 3Hp), padding each gate segment separately.
        a = a.reshape(a.shape[:-1] + (3, H))
        a = jnp.pad(a, [(0, 0)] * (a.ndim - 1) + [(0, pH)])
        return a.reshape(a.shape[:-2] + (3 * Hp,))

    w_ih_p = pad_gate_last(params["w_ih"])                          # (2, I, 3Hp)
    w_hh_p = pad_gate_last(params["w_hh"])                          # (2, H, 3Hp)
    w_hh_p = jnp.pad(w_hh_p, ((0, 0), (0, pH), (0, 0)))             # (2, Hp, 3Hp)
    b_ih_p = pad_gate_last(params["b_ih"].astype(jnp.float32))      # (2, 3Hp)
    b_hh_p = pad_gate_last(params["b_hh"].astype(jnp.float32))      # (2, 3Hp)

    # b_ih and the r/z slices of b_hh fold into the hoisted input-gates bias;
    # only b_hn must stay inside the recurrence (it sits under r * (...)).
    gx_bias = jnp.concatenate(
        [b_ih_p[:, :2 * Hp] + b_hh_p[:, :2 * Hp], b_ih_p[:, 2 * Hp:]],
        axis=-1).reshape(2, 1, 3 * Hp)                              # (2, 1, 3Hp)
    b_hn = b_hh_p[:, 2 * Hp:].reshape(2, 1, Hp)                     # (2, 1, Hp)

    x_p = jnp.pad(x, ((0, Tp - T), (0, Bp - B), (0, 0)))            # (Tp, Bp, I)
    h0_p = jnp.pad(h0, ((0, 0), (0, Bp - B), (0, pH)))              # (2, Bp, Hp)

    kernel = functools.partial(_bigru_chunk_kernel, hidden=Hp, chunk=TC,
                               seq_len=T, total_len=Tp)

    out_f, out_b = pl.pallas_call(
        kernel,
        out_shape=(jax.ShapeDtypeStruct((Tp, Bp, Hp), dtype),
                   jax.ShapeDtypeStruct((Tp, Bp, Hp), dtype)),
        grid_spec=pltpu.PrefetchScalarGridSpec(
            num_scalar_prefetch=0,
            grid=(NC,),
            in_specs=[
                # x chunk for the forward direction (time blocks in order).
                pl.BlockSpec((TC, Bp, I), lambda c: (c, 0, 0)),
                # Same array, backward direction's time blocks (reversed).
                pl.BlockSpec((TC, Bp, I), lambda c: (NC - 1 - c, 0, 0)),
                # Stationary operands (constant block index).
                pl.BlockSpec((2, I, 3 * Hp), lambda c: (0, 0, 0)),
                pl.BlockSpec((2, Hp, 3 * Hp), lambda c: (0, 0, 0)),
                pl.BlockSpec((2, 1, 3 * Hp), lambda c: (0, 0, 0)),
                pl.BlockSpec((2, 1, Hp), lambda c: (0, 0, 0)),
                pl.BlockSpec((2, Bp, Hp), lambda c: (0, 0, 0)),
            ],
            out_specs=[
                pl.BlockSpec((TC, Bp, Hp), lambda c: (c, 0, 0)),
                pl.BlockSpec((TC, Bp, Hp), lambda c: (NC - 1 - c, 0, 0)),
            ],
            scratch_shapes=[pltpu.VMEM((Bp, Hp), jnp.float32),
                            pltpu.VMEM((Bp, Hp), jnp.float32)],
        ),
        compiler_params=pltpu.CompilerParams(
            # Single (time) grid axis: the recurrence is sequential.
            dimension_semantics=("arbitrary",),
            # Raise v5e's 16 MiB scoped default; safely below v7x's 64 MiB.
            vmem_limit_bytes=32 * 1024 * 1024),
    )(x_p, x_p, w_ih_p, w_hh_p, gx_bias, b_hn, h0_p)

    output = jnp.concatenate([out_f[:T, :B, :H], out_b[:T, :B, :H]], axis=-1)
    h_n = jnp.stack([out_f[T - 1, :B, :H], out_b[0, :B, :H]], axis=0)
    return output, h_n


def init_bigru_params(key, num_inputs, num_hiddens, dtype=jnp.float32):
    """Deterministic init matching PyTorch GRU shapes (weights stored transposed)."""
    k = 1.0 / jnp.sqrt(jnp.float32(num_hiddens))
    keys = jax.random.split(key, 4)
    w_ih = jax.random.uniform(keys[0], (2, num_inputs, 3 * num_hiddens),
                              jnp.float32, -k, k).astype(dtype)
    w_hh = jax.random.uniform(keys[1], (2, num_hiddens, 3 * num_hiddens),
                              jnp.float32, -k, k).astype(dtype)
    b_ih = jax.random.uniform(keys[2], (2, 3 * num_hiddens),
                              jnp.float32, -k, k).astype(dtype)
    b_hh = jax.random.uniform(keys[3], (2, 3 * num_hiddens),
                              jnp.float32, -k, k).astype(dtype)
    return {"w_ih": w_ih, "w_hh": w_hh, "b_ih": b_ih, "b_hh": b_hh}


# ---------------- pure-JAX reference (for correctness check) ----------------
def _gru_ref_dir(x, w_ih, w_hh, b_ih, b_hh, h0):
    H = h0.shape[-1]

    def step(h, x_t):
        gx = x_t @ w_ih + b_ih
        gh = h @ w_hh + b_hh
        r = jax.nn.sigmoid(gx[:, :H] + gh[:, :H])
        z = jax.nn.sigmoid(gx[:, H:2 * H] + gh[:, H:2 * H])
        n = jnp.tanh(gx[:, 2 * H:] + r * gh[:, 2 * H:])
        h_new = (1.0 - z) * n + z * h
        return h_new, h_new

    h_T, ys = jax.lax.scan(step, h0, x)
    return ys, h_T


def bigru_ref(x, params, h0):
    w_ih, w_hh = params["w_ih"], params["w_hh"]
    b_ih, b_hh = params["b_ih"], params["b_hh"]
    yf, hf = _gru_ref_dir(x, w_ih[0], w_hh[0], b_ih[0], b_hh[0], h0[0])
    yb, hb = _gru_ref_dir(x[::-1], w_ih[1], w_hh[1], b_ih[1], b_hh[1], h0[1])
    yb = yb[::-1]
    return jnp.concatenate([yf, yb], axis=-1), jnp.stack([hf, hb], axis=0)


if __name__ == "__main__":
    T, B, I, H = 8, 4, 16, 32  # seq_len, batch, num_inputs, num_hiddens

    key = jax.random.PRNGKey(0)
    k_param, k_x, k_h = jax.random.split(key, 3)

    params = init_bigru_params(k_param, I, H)
    x = jax.random.normal(k_x, (T, B, I), jnp.float32)
    h0 = jax.random.normal(k_h, (2, B, H), jnp.float32)

    output, h_n = jax.jit(bigru_forward)(x, params, h0)
    jax.block_until_ready((output, h_n))

    out_ref, hn_ref = bigru_ref(x, params, h0)
    assert output.shape == (T, B, 2 * H)
    assert h_n.shape == (2, B, H)
    assert jnp.allclose(output, out_ref, atol=1e-4, rtol=1e-4)
    assert jnp.allclose(h_n, hn_ref, atol=1e-4, rtol=1e-4)

    print("KERNEL_OK")
</pallas_src>

<mosaic_0001>
module attributes {stable_mosaic.version = 11 : i64} {
  func.func @_bigru_chunk_kernel(%arg0: i32, %arg1: memref<8x8x16xf32, #tpu.memory_space<vmem>>, %arg2: memref<8x8x16xf32, #tpu.memory_space<vmem>>, %arg3: memref<2x16x384xf32, #tpu.memory_space<vmem>>, %arg4: memref<2x128x384xf32, #tpu.memory_space<vmem>>, %arg5: memref<2x1x384xf32, #tpu.memory_space<vmem>>, %arg6: memref<2x1x128xf32, #tpu.memory_space<vmem>>, %arg7: memref<2x8x128xf32, #tpu.memory_space<vmem>>, %arg8: memref<8x8x128xf32, #tpu.memory_space<vmem>>, %arg9: memref<8x8x128xf32, #tpu.memory_space<vmem>>, %arg10: memref<8x128xf32, #tpu.memory_space<vmem>>, %arg11: memref<8x128xf32, #tpu.memory_space<vmem>>) attributes {dimension_semantics = [#tpu.dimension_semantics<arbitrary>], iteration_bounds = array<i64: 1>, scalar_prefetch = 0 : i64, scratch_operands = 2 : i64, tpu.core_type = #tpu.core_type<tc>, window_params = [{transform_indices = @transform_0, window_bounds = array<i64: 8, 8, 16>}, {transform_indices = @transform_1, window_bounds = array<i64: 8, 8, 16>}, {pipeline_mode = #tpu.pipeline_mode<synchronous>, transform_indices = @transform_2, window_bounds = array<i64: 2, 16, 384>}, {pipeline_mode = #tpu.pipeline_mode<synchronous>, transform_indices = @transform_3, window_bounds = array<i64: 2, 128, 384>}, {pipeline_mode = #tpu.pipeline_mode<synchronous>, transform_indices = @transform_4, window_bounds = array<i64: 2, 1, 384>}, {pipeline_mode = #tpu.pipeline_mode<synchronous>, transform_indices = @transform_5, window_bounds = array<i64: 2, 1, 128>}, {pipeline_mode = #tpu.pipeline_mode<synchronous>, transform_indices = @transform_6, window_bounds = array<i64: 2, 8, 128>}, {transform_indices = @transform_7, window_bounds = array<i64: 8, 8, 128>}, {transform_indices = @transform_8, window_bounds = array<i64: 8, 8, 128>}]} {
    %c0_i32 = arith.constant 0 : i32
    %0 = arith.cmpi eq, %arg0, %c0_i32 : i32
    %1 = arith.extui %0 : i1 to i32
    %c0_i32_0 = arith.constant 0 : i32
    %2 = arith.cmpi ne, %1, %c0_i32_0 : i32
    scf.if %2 {
      %c0_144 = arith.constant 0 : index
      %c0_145 = arith.constant 0 : index
      %c0_146 = arith.constant 0 : index
      %567 = vector.load %arg7[%c0_144, %c0_145, %c0_146] : memref<2x8x128xf32, #tpu.memory_space<vmem>>, vector<1x8x128xf32>
      %568 = vector.shape_cast %567 : vector<1x8x128xf32> to vector<8x128xf32>
      %c0_147 = arith.constant 0 : index
      %c0_148 = arith.constant 0 : index
      %569 = vector.load %arg10[%c0_147, %c0_148] : memref<8x128xf32, #tpu.memory_space<vmem>>, vector<8x128xf32>
      tpu.vector_store %arg10[%c0_147, %c0_148], %568 {strides = array<i32>} : memref<8x128xf32, #tpu.memory_space<vmem>>, vector<8x128xf32>,
      %c1_149 = arith.constant 1 : index
      %c0_150 = arith.constant 0 : index
      %c0_151 = arith.constant 0 : index
      %570 = vector.load %arg7[%c1_149, %c0_150, %c0_151] : memref<2x8x128xf32, #tpu.memory_space<vmem>>, vector<1x8x128xf32>
      %571 = vector.shape_cast %570 : vector<1x8x128xf32> to vector<8x128xf32>
      %c0_152 = arith.constant 0 : index
      %c0_153 = arith.constant 0 : index
      %572 = vector.load %arg11[%c0_152, %c0_153] : memref<8x128xf32, #tpu.memory_space<vmem>>, vector<8x128xf32>
      tpu.vector_store %arg11[%c0_152, %c0_153], %571 {strides = array<i32>} : memref<8x128xf32, #tpu.memory_space<vmem>>, vector<8x128xf32>,
    } else {
    }
    %c0 = arith.constant 0 : index
    %c0_1 = arith.constant 0 : index
    %c0_2 = arith.constant 0 : index
    %3 = vector.load %arg3[%c0, %c0_1, %c0_2] : memref<2x16x384xf32, #tpu.memory_space<vmem>>, vector<1x16x384xf32>
    %4 = vector.shape_cast %3 : vector<1x16x384xf32> to vector<16x384xf32>
    %c1 = arith.constant 1 : index
    %c0_3 = arith.constant 0 : index
    %c0_4 = arith.constant 0 : index
    %5 = vector.load %arg3[%c1, %c0_3, %c0_4] : memref<2x16x384xf32, #tpu.memory_space<vmem>>, vector<1x16x384xf32>
    %6 = vector.shape_cast %5 : vector<1x16x384xf32> to vector<16x384xf32>
    %c0_5 = arith.constant 0 : index
    %c0_6 = arith.constant 0 : index
    %c0_7 = arith.constant 0 : index
    %7 = vector.load %arg4[%c0_5, %c0_6, %c0_7] : memref<2x128x384xf32, #tpu.memory_space<vmem>>, vector<1x128x384xf32>
    %8 = vector.shape_cast %7 : vector<1x128x384xf32> to vector<128x384xf32>
    %c1_8 = arith.constant 1 : index
    %c0_9 = arith.constant 0 : index
    %c0_10 = arith.constant 0 : index
    %9 = vector.load %arg4[%c1_8, %c0_9, %c0_10] : memref<2x128x384xf32, #tpu.memory_space<vmem>>, vector<1x128x384xf32>
    %10 = vector.shape_cast %9 : vector<1x128x384xf32> to vector<128x384xf32>
    %c0_11 = arith.constant 0 : index
    %c0_12 = arith.constant 0 : index
    %c0_13 = arith.constant 0 : index
    %11 = vector.load %arg5[%c0_11, %c0_12, %c0_13] : memref<2x1x384xf32, #tpu.memory_space<vmem>>, vector<1x1x384xf32>
    %12 = vector.shape_cast %11 : vector<1x1x384xf32> to vector<1x384xf32>
    %c1_14 = arith.constant 1 : index
    %c0_15 = arith.constant 0 : index
    %c0_16 = arith.constant 0 : index
    %13 = vector.load %arg5[%c1_14, %c0_15, %c0_16] : memref<2x1x384xf32, #tpu.memory_space<vmem>>, vector<1x1x384xf32>
    %14 = vector.shape_cast %13 : vector<1x1x384xf32> to vector<1x384xf32>
    %c0_17 = arith.constant 0 : index
    %c0_18 = arith.constant 0 : index
    %c0_19 = arith.constant 0 : index
    %15 = vector.load %arg6[%c0_17, %c0_18, %c0_19] : memref<2x1x128xf32, #tpu.memory_space<vmem>>, vector<1x1x128xf32>
    %16 = vector.shape_cast %15 : vector<1x1x128xf32> to vector<1x128xf32>
    %17 = vector.shape_cast %16 : vector<1x128xf32> to vector<1x128xf32>
    %18 = vector.broadcast %17 : vector<1x128xf32> to vector<8x128xf32>
    %c1_20 = arith.constant 1 : index
    %c0_21 = arith.constant 0 : index
    %c0_22 = arith.constant 0 : index
    %19 = vector.load %arg6[%c1_20, %c0_21, %c0_22] : memref<2x1x128xf32, #tpu.memory_space<vmem>>, vector<1x1x128xf32>
    %20 = vector.shape_cast %19 : vector<1x1x128xf32> to vector<1x128xf32>
    %21 = vector.shape_cast %20 : vector<1x128xf32> to vector<1x128xf32>
    %22 = vector.broadcast %21 : vector<1x128xf32> to vector<8x128xf32>
    %c0_23 = arith.constant 0 : index
    %c0_24 = arith.constant 0 : index
    %c0_25 = arith.constant 0 : index
    %23 = vector.load %arg1[%c0_23, %c0_24, %c0_25] : memref<8x8x16xf32, #tpu.memory_space<vmem>>, vector<8x8x16xf32>
    %24 = vector.shape_cast %23 : vector<8x8x16xf32> to vector<64x16xf32>
    %c0_26 = arith.constant 0 : index
    %c0_27 = arith.constant 0 : index
    %c0_28 = arith.constant 0 : index
    %25 = vector.load %arg2[%c0_26, %c0_27, %c0_28] : memref<8x8x16xf32, #tpu.memory_space<vmem>>, vector<8x8x16xf32>
    %26 = vector.shape_cast %25 : vector<8x8x16xf32> to vector<64x16xf32>
    %cst = arith.constant dense<0.000000e+00> : vector<64x384xf32>
    %27 = tpu.matmul %24, %4, %cst {dimension_numbers = #tpu.dot_dimension_numbers<[1], [0], [0], [1], [0, 0, 1, 1], [], []>} : vector<64x16xf32>, vector<16x384xf32>, vector<64x384xf32> -> vector<64x384xf32>
    %28 = vector.broadcast %12 : vector<1x384xf32> to vector<64x384xf32>
    %29 = arith.addf %27, %28 : vector<64x384xf32>
    %30 = vector.shape_cast %29 : vector<64x384xf32> to vector<8x8x384xf32>
    %cst_29 = arith.constant dense<0.000000e+00> : vector<64x384xf32>
    %31 = tpu.matmul %26, %6, %cst_29 {dimension_numbers = #tpu.dot_dimension_numbers<[1], [0], [0], [1], [0, 0, 1, 1], [], []>} : vector<64x16xf32>, vector<16x384xf32>, vector<64x384xf32> -> vector<64x384xf32>
    %32 = vector.broadcast %14 : vector<1x384xf32> to vector<64x384xf32>
    %33 = arith.addf %31, %32 : vector<64x384xf32>
    %34 = vector.shape_cast %33 : vector<64x384xf32> to vector<8x8x384xf32>
    %c0_30 = arith.constant 0 : index
    %c0_31 = arith.constant 0 : index
    %35 = vector.load %arg10[%c0_30, %c0_31] : memref<8x128xf32, #tpu.memory_space<vmem>>, vector<8x128xf32>
    %c0_32 = arith.constant 0 : index
    %c0_33 = arith.constant 0 : index
    %36 = vector.load %arg11[%c0_32, %c0_33] : memref<8x128xf32, #tpu.memory_space<vmem>>, vector<8x128xf32>
    %37 = vector.extract_strided_slice %30 {offsets = [0, 0, 0], sizes = [1, 8, 384], strides = [1, 1, 1]} : vector<8x8x384xf32> to vector<1x8x384xf32>
    %38 = vector.shape_cast %37 : vector<1x8x384xf32> to vector<8x384xf32>
    %cst_34 = arith.constant dense<0.000000e+00> : vector<8x384xf32>
    %39 = tpu.matmul %35, %8, %cst_34 {dimension_numbers = #tpu.dot_dimension_numbers<[1], [0], [0], [1], [0, 0, 1, 1], [], []>} : vector<8x128xf32>, vector<128x384xf32>, vector<8x384xf32> -> vector<8x384xf32>
    %40 = vector.extract_strided_slice %38 {offsets = [0, 0], sizes = [8, 128], strides = [1, 1]} : vector<8x384xf32> to vector<8x128xf32>
    %41 = vector.extract_strided_slice %39 {offsets = [0, 0], sizes = [8, 128], strides = [1, 1]} : vector<8x384xf32> to vector<8x128xf32>
    %42 = arith.addf %40, %41 : vector<8x128xf32>
    %43 = arith.negf %42 : vector<8x128xf32>
    %44 = math.exp %43 : vector<8x128xf32>
    %cst_35 = arith.constant 1.000000e+00 : f32
    %45 = vector.broadcast %cst_35 : f32 to vector<8x128xf32>
    %46 = arith.addf %45, %44 : vector<8x128xf32>
    %47 = arith.divf %45, %46 : vector<8x128xf32>
    %48 = vector.extract_strided_slice %38 {offsets = [0, 128], sizes = [8, 128], strides = [1, 1]} : vector<8x384xf32> to vector<8x128xf32>
    %49 = vector.extract_strided_slice %39 {offsets = [0, 128], sizes = [8, 128], strides = [1, 1]} : vector<8x384xf32> to vector<8x128xf32>
    %50 = arith.addf %48, %49 : vector<8x128xf32>
    %51 = arith.negf %50 : vector<8x128xf32>
    %52 = math.exp %51 : vector<8x128xf32>
    %cst_36 = arith.constant 1.000000e+00 : f32
    %53 = vector.broadcast %cst_36 : f32 to vector<8x128xf32>
    %54 = arith.addf %53, %52 : vector<8x128xf32>
    %55 = arith.divf %53, %54 : vector<8x128xf32>
    %56 = vector.extract_strided_slice %38 {offsets = [0, 256], sizes = [8, 128], strides = [1, 1]} : vector<8x384xf32> to vector<8x128xf32>
    %57 = vector.extract_strided_slice %39 {offsets = [0, 256], sizes = [8, 128], strides = [1, 1]} : vector<8x384xf32> to vector<8x128xf32>
    %58 = arith.addf %57, %18 : vector<8x128xf32>
    %59 = arith.mulf %47, %58 : vector<8x128xf32>
    %60 = arith.addf %56, %59 : vector<8x128xf32>
    %61 = math.tanh %60 : vector<8x128xf32>
    %cst_37 = arith.constant 1.000000e+00 : f32
    %62 = vector.broadcast %cst_37 : f32 to vector<8x128xf32>
    %63 = arith.subf %62, %55 : vector<8x128xf32>
    %64 = arith.mulf %63, %61 : vector<8x128xf32>
    %65 = arith.mulf %55, %35 : vector<8x128xf32>
    %66 = arith.addf %64, %65 : vector<8x128xf32>
    %67 = vector.extract_strided_slice %34 {offsets = [7, 0, 0], sizes = [1, 8, 384], strides = [1, 1, 1]} : vector<8x8x384xf32> to vector<1x8x384xf32>
    %68 = vector.shape_cast %67 : vector<1x8x384xf32> to vector<8x384xf32>
    %cst_38 = arith.constant dense<0.000000e+00> : vector<8x384xf32>
    %69 = tpu.matmul %36, %10, %cst_38 {dimension_numbers = #tpu.dot_dimension_numbers<[1], [0], [0], [1], [0, 0, 1, 1], [], []>} : vector<8x128xf32>, vector<128x384xf32>, vector<8x384xf32> -> vector<8x384xf32>
    %70 = vector.extract_strided_slice %68 {offsets = [0, 0], sizes = [8, 128], strides = [1, 1]} : vector<8x384xf32> to vector<8x128xf32>
    %71 = vector.extract_strided_slice %69 {offsets = [0, 0], sizes = [8, 128], strides = [1, 1]} : vector<8x384xf32> to vector<8x128xf32>
    %72 = arith.addf %70, %71 : vector<8x128xf32>
    %73 = arith.negf %72 : vector<8x128xf32>
    %74 = math.exp %73 : vector<8x128xf32>
    %cst_39 = arith.constant 1.000000e+00 : f32
    %75 = vector.broadcast %cst_39 : f32 to vector<8x128xf32>
    %76 = arith.addf %75, %74 : vector<8x128xf32>
    %77 = arith.divf %75, %76 : vector<8x128xf32>
    %78 = vector.extract_strided_slice %68 {offsets = [0, 128], sizes = [8, 128], strides = [1, 1]} : vector<8x384xf32> to vector<8x128xf32>
    %79 = vector.extract_strided_slice %69 {offsets = [0, 128], sizes = [8, 128], strides = [1, 1]} : vector<8x384xf32> to vector<8x128xf32>
    %80 = arith.addf %78, %79 : vector<8x128xf32>
    %81 = arith.negf %80 : vector<8x128xf32>
    %82 = math.exp %81 : vector<8x128xf32>
    %cst_40 = arith.constant 1.000000e+00 : f32
    %83 = vector.broadcast %cst_40 : f32 to vector<8x128xf32>
    %84 = arith.addf %83, %82 : vector<8x128xf32>
    %85 = arith.divf %83, %84 : vector<8x128xf32>
    %86 = vector.extract_strided_slice %68 {offsets = [0, 256], sizes = [8, 128], strides = [1, 1]} : vector<8x384xf32> to vector<8x128xf32>
    %87 = vector.extract_strided_slice %69 {offsets = [0, 256], sizes = [8, 128], strides = [1, 1]} : vector<8x384xf32> to vector<8x128xf32>
    %88 = arith.addf %87, %22 : vector<8x128xf32>
    %89 = arith.mulf %77, %88 : vector<8x128xf32>
    %90 = arith.addf %86, %89 : vector<8x128xf32>
    %91 = math.tanh %90 : vector<8x128xf32>
    %cst_41 = arith.constant 1.000000e+00 : f32
    %92 = vector.broadcast %cst_41 : f32 to vector<8x128xf32>
    %93 = arith.subf %92, %85 : vector<8x128xf32>
    %94 = arith.mulf %93, %91 : vector<8x128xf32>
    %95 = arith.mulf %85, %36 : vector<8x128xf32>
    %96 = arith.addf %94, %95 : vector<8x128xf32>
    %c0_42 = arith.constant 0 : index
    %c0_43 = arith.constant 0 : index
    %c0_44 = arith.constant 0 : index
    %97 = vector.load %arg8[%c0_42, %c0_43, %c0_44] : memref<8x8x128xf32, #tpu.memory_space<vmem>>, vector<1x8x128xf32>
    %98 = vector.shape_cast %97 : vector<1x8x128xf32> to vector<8x128xf32>
    %99 = vector.shape_cast %66 : vector<8x128xf32> to vector<1x8x128xf32>
    tpu.vector_store %arg8[%c0_42, %c0_43, %c0_44], %99 {strides = array<i32>} : memref<8x8x128xf32, #tpu.memory_space<vmem>>, vector<1x8x128xf32>,
    %c7 = arith.constant 7 : index
    %c0_45 = arith.constant 0 : index
    %c0_46 = arith.constant 0 : index
    %100 = vector.load %arg9[%c7, %c0_45, %c0_46] : memref<8x8x128xf32, #tpu.memory_space<vmem>>, vector<1x8x128xf32>
    %101 = vector.shape_cast %100 : vector<1x8x128xf32> to vector<8x128xf32>
    %102 = vector.shape_cast %96 : vector<8x128xf32> to vector<1x8x128xf32>
    tpu.vector_store %arg9[%c7, %c0_45, %c0_46], %102 {strides = array<i32>} : memref<8x8x128xf32, #tpu.memory_space<vmem>>, vector<1x8x128xf32>,
    %103 = vector.extract_strided_slice %30 {offsets = [1, 0, 0], sizes = [1, 8, 384], strides = [1, 1, 1]} : vector<8x8x384xf32> to vector<1x8x384xf32>
    %104 = vector.shape_cast %103 : vector<1x8x384xf32> to vector<8x384xf32>
    %cst_47 = arith.constant dense<0.000000e+00> : vector<8x384xf32>
    %105 = tpu.matmul %66, %8, %cst_47 {dimension_numbers = #tpu.dot_dimension_numbers<[1], [0], [0], [1], [0, 0, 1, 1], [], []>} : vector<8x128xf32>, vector<128x384xf32>, vector<8x384xf32> -> vector<8x384xf32>
    %106 = vector.extract_strided_slice %104 {offsets = [0, 0], sizes = [8, 128], strides = [1, 1]} : vector<8x384xf32> to vector<8x128xf32>
    %107 = vector.extract_strided_slice %105 {offsets = [0, 0], sizes = [8, 128], strides = [1, 1]} : vector<8x384xf32> to vector<8x128xf32>
    %108 = arith.addf %106, %107 : vector<8x128xf32>
    %109 = arith.negf %108 : vector<8x128xf32>
    %110 = math.exp %109 : vector<8x128xf32>
    %cst_48 = arith.constant 1.000000e+00 : f32
    %111 = vector.broadcast %cst_48 : f32 to vector<8x128xf32>
    %112 = arith.addf %111, %110 : vector<8x128xf32>
    %113 = arith.divf %111, %112 : vector<8x128xf32>
    %114 = vector.extract_strided_slice %104 {offsets = [0, 128], sizes = [8, 128], strides = [1, 1]} : vector<8x384xf32> to vector<8x128xf32>
    %115 = vector.extract_strided_slice %105 {offsets = [0, 128], sizes = [8, 128], strides = [1, 1]} : vector<8x384xf32> to vector<8x128xf32>
    %116 = arith.addf %114, %115 : vector<8x128xf32>
    %117 = arith.negf %116 : vector<8x128xf32>
    %118 = math.exp %117 : vector<8x128xf32>
    %cst_49 = arith.constant 1.000000e+00 : f32
    %119 = vector.broadcast %cst_49 : f32 to vector<8x128xf32>
    %120 = arith.addf %119, %118 : vector<8x128xf32>
    %121 = arith.divf %119, %120 : vector<8x128xf32>
    %122 = vector.extract_strided_slice %104 {offsets = [0, 256], sizes = [8, 128], strides = [1, 1]} : vector<8x384xf32> to vector<8x128xf32>
    %123 = vector.extract_strided_slice %105 {offsets = [0, 256], sizes = [8, 128], strides = [1, 1]} : vector<8x384xf32> to vector<8x128xf32>
    %124 = arith.addf %123, %18 : vector<8x128xf32>
    %125 = arith.mulf %113, %124 : vector<8x128xf32>
    %126 = arith.addf %122, %125 : vector<8x128xf32>
    %127 = math.tanh %126 : vector<8x128xf32>
    %cst_50 = arith.constant 1.000000e+00 : f32
    %128 = vector.broadcast %cst_50 : f32 to vector<8x128xf32>
    %129 = arith.subf %128, %121 : vector<8x128xf32>
    %130 = arith.mulf %129, %127 : vector<8x128xf32>
    %131 = arith.mulf %121, %66 : vector<8x128xf32>
    %132 = arith.addf %130, %131 : vector<8x128xf32>
    %133 = vector.extract_strided_slice %34 {offsets = [6, 0, 0], sizes = [1, 8, 384], strides = [1, 1, 1]} : vector<8x8x384xf32> to vector<1x8x384xf32>
    %134 = vector.shape_cast %133 : vector<1x8x384xf32> to vector<8x384xf32>
    %cst_51 = arith.constant dense<0.000000e+00> : vector<8x384xf32>
    %135 = tpu.matmul %96, %10, %cst_51 {dimension_numbers = #tpu.dot_dimension_numbers<[1], [0], [0], [1], [0, 0, 1, 1], [], []>} : vector<8x128xf32>, vector<128x384xf32>, vector<8x384xf32> -> vector<8x384xf32>
    %136 = vector.extract_strided_slice %134 {offsets = [0, 0], sizes = [8, 128], strides = [1, 1]} : vector<8x384xf32> to vector<8x128xf32>
    %137 = vector.extract_strided_slice %135 {offsets = [0, 0], sizes = [8, 128], strides = [1, 1]} : vector<8x384xf32> to vector<8x128xf32>
    %138 = arith.addf %136, %137 : vector<8x128xf32>
    %139 = arith.negf %138 : vector<8x128xf32>
    %140 = math.exp %139 : vector<8x128xf32>
    %cst_52 = arith.constant 1.000000e+00 : f32
    %141 = vector.broadcast %cst_52 : f32 to vector<8x128xf32>
    %142 = arith.addf %141, %140 : vector<8x128xf32>
    %143 = arith.divf %141, %142 : vector<8x128xf32>
    %144 = vector.extract_strided_slice %134 {offsets = [0, 128], sizes = [8, 128], strides = [1, 1]} : vector<8x384xf32> to vector<8x128xf32>
    %145 = vector.extract_strided_slice %135 {offsets = [0, 128], sizes = [8, 128], strides = [1, 1]} : vector<8x384xf32> to vector<8x128xf32>
    %146 = arith.addf %144, %145 : vector<8x128xf32>
    %147 = arith.negf %146 : vector<8x128xf32>
    %148 = math.exp %147 : vector<8x128xf32>
    %cst_53 = arith.constant 1.000000e+00 : f32
    %149 = vector.broadcast %cst_53 : f32 to vector<8x128xf32>
    %150 = arith.addf %149, %148 : vector<8x128xf32>
    %151 = arith.divf %149, %150 : vector<8x128xf32>
    %152 = vector.extract_strided_slice %134 {offsets = [0, 256], sizes = [8, 128], strides = [1, 1]} : vector<8x384xf32> to vector<8x128xf32>
    %153 = vector.extract_strided_slice %135 {offsets = [0, 256], sizes = [8, 128], strides = [1, 1]} : vector<8x384xf32> to vector<8x128xf32>
    %154 = arith.addf %153, %22 : vector<8x128xf32>
    %155 = arith.mulf %143, %154 : vector<8x128xf32>
    %156 = arith.addf %152, %155 : vector<8x128xf32>
    %157 = math.tanh %156 : vector<8x128xf32>
    %cst_54 = arith.constant 1.000000e+00 : f32
    %158 = vector.broadcast %cst_54 : f32 to vector<8x128xf32>
    %159 = arith.subf %158, %151 : vector<8x128xf32>
    %160 = arith.mulf %159, %157 : vector<8x128xf32>
    %161 = arith.mulf %151, %96 : vector<8x128xf32>
    %162 = arith.addf %160, %161 : vector<8x128xf32>
    %c1_55 = arith.constant 1 : index
    %c0_56 = arith.constant 0 : index
    %c0_57 = arith.constant 0 : index
    %163 = vector.load %arg8[%c1_55, %c0_56, %c0_57] : memref<8x8x128xf32, #tpu.memory_space<vmem>>, vector<1x8x128xf32>
    %164 = vector.shape_cast %163 : vector<1x8x128xf32> to vector<8x128xf32>
    %165 = vector.shape_cast %132 : vector<8x128xf32> to vector<1x8x128xf32>
    tpu.vector_store %arg8[%c1_55, %c0_56, %c0_57], %165 {strides = array<i32>} : memref<8x8x128xf32, #tpu.memory_space<vmem>>, vector<1x8x128xf32>,
    %c6 = arith.constant 6 : index
    %c0_58 = arith.constant 0 : index
    %c0_59 = arith.constant 0 : index
    %166 = vector.load %arg9[%c6, %c0_58, %c0_59] : memref<8x8x128xf32, #tpu.memory_space<vmem>>, vector<1x8x128xf32>
    %167 = vector.shape_cast %166 : vector<1x8x128xf32> to vector<8x128xf32>
    %168 = vector.shape_cast %162 : vector<8x128xf32> to vector<1x8x128xf32>
    tpu.vector_store %arg9[%c6, %c0_58, %c0_59], %168 {strides = array<i32>} : memref<8x8x128xf32, #tpu.memory_space<vmem>>, vector<1x8x128xf32>,
    %169 = vector.extract_strided_slice %30 {offsets = [2, 0, 0], sizes = [1, 8, 384], strides = [1, 1, 1]} : vector<8x8x384xf32> to vector<1x8x384xf32>
    %170 = vector.shape_cast %169 : vector<1x8x384xf32> to vector<8x384xf32>
    %cst_60 = arith.constant dense<0.000000e+00> : vector<8x384xf32>
    %171 = tpu.matmul %132, %8, %cst_60 {dimension_numbers = #tpu.dot_dimension_numbers<[1], [0], [0], [1], [0, 0, 1, 1], [], []>} : vector<8x128xf32>, vector<128x384xf32>, vector<8x384xf32> -> vector<8x384xf32>
    %172 = vector.extract_strided_slice %170 {offsets = [0, 0], sizes = [8, 128], strides = [1, 1]} : vector<8x384xf32> to vector<8x128xf32>
    %173 = vector.extract_strided_slice %171 {offsets = [0, 0], sizes = [8, 128], strides = [1, 1]} : vector<8x384xf32> to vector<8x128xf32>
    %174 = arith.addf %172, %173 : vector<8x128xf32>
    %175 = arith.negf %174 : vector<8x128xf32>
    %176 = math.exp %175 : vector<8x128xf32>
    %cst_61 = arith.constant 1.000000e+00 : f32
    %177 = vector.broadcast %cst_61 : f32 to vector<8x128xf32>
    %178 = arith.addf %177, %176 : vector<8x128xf32>
    %179 = arith.divf %177, %178 : vector<8x128xf32>
    %180 = vector.extract_strided_slice %170 {offsets = [0, 128], sizes = [8, 128], strides = [1, 1]} : vector<8x384xf32> to vector<8x128xf32>
    %181 = vector.extract_strided_slice %171 {offsets = [0, 128], sizes = [8, 128], strides = [1, 1]} : vector<8x384xf32> to vector<8x128xf32>
    %182 = arith.addf %180, %181 : vector<8x128xf32>
    %183 = arith.negf %182 : vector<8x128xf32>
    %184 = math.exp %183 : vector<8x128xf32>
    %cst_62 = arith.constant 1.000000e+00 : f32
    %185 = vector.broadcast %cst_62 : f32 to vector<8x128xf32>
    %186 = arith.addf %185, %184 : vector<8x128xf32>
    %187 = arith.divf %185, %186 : vector<8x128xf32>
    %188 = vector.extract_strided_slice %170 {offsets = [0, 256], sizes = [8, 128], strides = [1, 1]} : vector<8x384xf32> to vector<8x128xf32>
    %189 = vector.extract_strided_slice %171 {offsets = [0, 256], sizes = [8, 128], strides = [1, 1]} : vector<8x384xf32> to vector<8x128xf32>
    %190 = arith.addf %189, %18 : vector<8x128xf32>
    %191 = arith.mulf %179, %190 : vector<8x128xf32>
    %192 = arith.addf %188, %191 : vector<8x128xf32>
    %193 = math.tanh %192 : vector<8x128xf32>
    %cst_63 = arith.constant 1.000000e+00 : f32
    %194 = vector.broadcast %cst_63 : f32 to vector<8x128xf32>
    %195 = arith.subf %194, %187 : vector<8x128xf32>
    %196 = arith.mulf %195, %193 : vector<8x128xf32>
    %197 = arith.mulf %187, %132 : vector<8x128xf32>
    %198 = arith.addf %196, %197 : vector<8x128xf32>
    %199 = vector.extract_strided_slice %34 {offsets = [5, 0, 0], sizes = [1, 8, 384], strides = [1, 1, 1]} : vector<8x8x384xf32> to vector<1x8x384xf32>
    %200 = vector.shape_cast %199 : vector<1x8x384xf32> to vector<8x384xf32>
    %cst_64 = arith.constant dense<0.000000e+00> : vector<8x384xf32>
    %201 = tpu.matmul %162, %10, %cst_64 {dimension_numbers = #tpu.dot_dimension_numbers<[1], [0], [0], [1], [0, 0, 1, 1], [], []>} : vector<8x128xf32>, vector<128x384xf32>, vector<8x384xf32> -> vector<8x384xf32>
    %202 = vector.extract_strided_slice %200 {offsets = [0, 0], sizes = [8, 128], strides = [1, 1]} : vector<8x384xf32> to vector<8x128xf32>
    %203 = vector.extract_strided_slice %201 {offsets = [0, 0], sizes = [8, 128], strides = [1, 1]} : vector<8x384xf32> to vector<8x128xf32>
    %204 = arith.addf %202, %203 : vector<8x128xf32>
    %205 = arith.negf %204 : vector<8x128xf32>
    %206 = math.exp %205 : vector<8x128xf32>
    %cst_65 = arith.constant 1.000000e+00 : f32
    %207 = vector.broadcast %cst_65 : f32 to vector<8x128xf32>
    %208 = arith.addf %207, %206 : vector<8x128xf32>
    %209 = arith.divf %207, %208 : vector<8x128xf32>
    %210 = vector.extract_strided_slice %200 {offsets = [0, 128], sizes = [8, 128], strides = [1, 1]} : vector<8x384xf32> to vector<8x128xf32>
    %211 = vector.extract_strided_slice %201 {offsets = [0, 128], sizes = [8, 128], strides = [1, 1]} : vector<8x384xf32> to vector<8x128xf32>
    %212 = arith.addf %210, %211 : vector<8x128xf32>
    %213 = arith.negf %212 : vector<8x128xf32>
    %214 = math.exp %213 : vector<8x128xf32>
    %cst_66 = arith.constant 1.000000e+00 : f32
    %215 = vector.broadcast %cst_66 : f32 to vector<8x128xf32>
    %216 = arith.addf %215, %214 : vector<8x128xf32>
    %217 = arith.divf %215, %216 : vector<8x128xf32>
    %218 = vector.extract_strided_slice %200 {offsets = [0, 256], sizes = [8, 128], strides = [1, 1]} : vector<8x384xf32> to vector<8x128xf32>
    %219 = vector.extract_strided_slice %201 {offsets = [0, 256], sizes = [8, 128], strides = [1, 1]} : vector<8x384xf32> to vector<8x128xf32>
    %220 = arith.addf %219, %22 : vector<8x128xf32>
    %221 = arith.mulf %209, %220 : vector<8x128xf32>
    %222 = arith.addf %218, %221 : vector<8x128xf32>
    %223 = math.tanh %222 : vector<8x128xf32>
    %cst_67 = arith.constant 1.000000e+00 : f32
    %224 = vector.broadcast %cst_67 : f32 to vector<8x128xf32>
    %225 = arith.subf %224, %217 : vector<8x128xf32>
    %226 = arith.mulf %225, %223 : vector<8x128xf32>
    %227 = arith.mulf %217, %162 : vector<8x128xf32>
    %228 = arith.addf %226, %227 : vector<8x128xf32>
    %c2 = arith.constant 2 : index
    %c0_68 = arith.constant 0 : index
    %c0_69 = arith.constant 0 : index
    %229 = vector.load %arg8[%c2, %c0_68, %c0_69] : memref<8x8x128xf32, #tpu.memory_space<vmem>>, vector<1x8x128xf32>
    %230 = vector.shape_cast %229 : vector<1x8x128xf32> to vector<8x128xf32>
    %231 = vector.shape_cast %198 : vector<8x128xf32> to vector<1x8x128xf32>
    tpu.vector_store %arg8[%c2, %c0_68, %c0_69], %231 {strides = array<i32>} : memref<8x8x128xf32, #tpu.memory_space<vmem>>, vector<1x8x128xf32>,
    %c5 = arith.constant 5 : index
    %c0_70 = arith.constant 0 : index
    %c0_71 = arith.constant 0 : index
    %232 = vector.load %arg9[%c5, %c0_70, %c0_71] : memref<8x8x128xf32, #tpu.memory_space<vmem>>, vector<1x8x128xf32>
    %233 = vector.shape_cast %232 : vector<1x8x128xf32> to vector<8x128xf32>
    %234 = vector.shape_cast %228 : vector<8x128xf32> to vector<1x8x128xf32>
    tpu.vector_store %arg9[%c5, %c0_70, %c0_71], %234 {strides = array<i32>} : memref<8x8x128xf32, #tpu.memory_space<vmem>>, vector<1x8x128xf32>,
    %235 = vector.extract_strided_slice %30 {offsets = [3, 0, 0], sizes = [1, 8, 384], strides = [1, 1, 1]} : vector<8x8x384xf32> to vector<1x8x384xf32>
    %236 = vector.shape_cast %235 : vector<1x8x384xf32> to vector<8x384xf32>
    %cst_72 = arith.constant dense<0.000000e+00> : vector<8x384xf32>
    %237 = tpu.matmul %198, %8, %cst_72 {dimension_numbers = #tpu.dot_dimension_numbers<[1], [0], [0], [1], [0, 0, 1, 1], [], []>} : vector<8x128xf32>, vector<128x384xf32>, vector<8x384xf32> -> vector<8x384xf32>
    %238 = vector.extract_strided_slice %236 {offsets = [0, 0], sizes = [8, 128], strides = [1, 1]} : vector<8x384xf32> to vector<8x128xf32>
    %239 = vector.extract_strided_slice %237 {offsets = [0, 0], sizes = [8, 128], strides = [1, 1]} : vector<8x384xf32> to vector<8x128xf32>
    %240 = arith.addf %238, %239 : vector<8x128xf32>
    %241 = arith.negf %240 : vector<8x128xf32>
    %242 = math.exp %241 : vector<8x128xf32>
    %cst_73 = arith.constant 1.000000e+00 : f32
    %243 = vector.broadcast %cst_73 : f32 to vector<8x128xf32>
    %244 = arith.addf %243, %242 : vector<8x128xf32>
    %245 = arith.divf %243, %244 : vector<8x128xf32>
    %246 = vector.extract_strided_slice %236 {offsets = [0, 128], sizes = [8, 128], strides = [1, 1]} : vector<8x384xf32> to vector<8x128xf32>
    %247 = vector.extract_strided_slice %237 {offsets = [0, 128], sizes = [8, 128], strides = [1, 1]} : vector<8x384xf32> to vector<8x128xf32>
    %248 = arith.addf %246, %247 : vector<8x128xf32>
    %249 = arith.negf %248 : vector<8x128xf32>
    %250 = math.exp %249 : vector<8x128xf32>
    %cst_74 = arith.constant 1.000000e+00 : f32
    %251 = vector.broadcast %cst_74 : f32 to vector<8x128xf32>
    %252 = arith.addf %251, %250 : vector<8x128xf32>
    %253 = arith.divf %251, %252 : vector<8x128xf32>
    %254 = vector.extract_strided_slice %236 {offsets = [0, 256], sizes = [8, 128], strides = [1, 1]} : vector<8x384xf32> to vector<8x128xf32>
    %255 = vector.extract_strided_slice %237 {offsets = [0, 256], sizes = [8, 128], strides = [1, 1]} : vector<8x384xf32> to vector<8x128xf32>
    %256 = arith.addf %255, %18 : vector<8x128xf32>
    %257 = arith.mulf %245, %256 : vector<8x128xf32>
    %258 = arith.addf %254, %257 : vector<8x128xf32>
    %259 = math.tanh %258 : vector<8x128xf32>
    %cst_75 = arith.constant 1.000000e+00 : f32
    %260 = vector.broadcast %cst_75 : f32 to vector<8x128xf32>
    %261 = arith.subf %260, %253 : vector<8x128xf32>
    %262 = arith.mulf %261, %259 : vector<8x128xf32>
    %263 = arith.mulf %253, %198 : vector<8x128xf32>
    %264 = arith.addf %262, %263 : vector<8x128xf32>
    %265 = vector.extract_strided_slice %34 {offsets = [4, 0, 0], sizes = [1, 8, 384], strides = [1, 1, 1]} : vector<8x8x384xf32> to vector<1x8x384xf32>
    %266 = vector.shape_cast %265 : vector<1x8x384xf32> to vector<8x384xf32>
    %cst_76 = arith.constant dense<0.000000e+00> : vector<8x384xf32>
    %267 = tpu.matmul %228, %10, %cst_76 {dimension_numbers = #tpu.dot_dimension_numbers<[1], [0], [0], [1], [0, 0, 1, 1], [], []>} : vector<8x128xf32>, vector<128x384xf32>, vector<8x384xf32> -> vector<8x384xf32>
    %268 = vector.extract_strided_slice %266 {offsets = [0, 0], sizes = [8, 128], strides = [1, 1]} : vector<8x384xf32> to vector<8x128xf32>
    %269 = vector.extract_strided_slice %267 {offsets = [0, 0], sizes = [8, 128], strides = [1, 1]} : vector<8x384xf32> to vector<8x128xf32>
    %270 = arith.addf %268, %269 : vector<8x128xf32>
    %271 = arith.negf %270 : vector<8x128xf32>
    %272 = math.exp %271 : vector<8x128xf32>
    %cst_77 = arith.constant 1.000000e+00 : f32
    %273 = vector.broadcast %cst_77 : f32 to vector<8x128xf32>
    %274 = arith.addf %273, %272 : vector<8x128xf32>
    %275 = arith.divf %273, %274 : vector<8x128xf32>
    %276 = vector.extract_strided_slice %266 {offsets = [0, 128], sizes = [8, 128], strides = [1, 1]} : vector<8x384xf32> to vector<8x128xf32>
    %277 = vector.extract_strided_slice %267 {offsets = [0, 128], sizes = [8, 128], strides = [1, 1]} : vector<8x384xf32> to vector<8x128xf32>
    %278 = arith.addf %276, %277 : vector<8x128xf32>
    %279 = arith.negf %278 : vector<8x128xf32>
    %280 = math.exp %279 : vector<8x128xf32>
    %cst_78 = arith.constant 1.000000e+00 : f32
    %281 = vector.broadcast %cst_78 : f32 to vector<8x128xf32>
    %282 = arith.addf %281, %280 : vector<8x128xf32>
    %283 = arith.divf %281, %282 : vector<8x128xf32>
    %284 = vector.extract_strided_slice %266 {offsets = [0, 256], sizes = [8, 128], strides = [1, 1]} : vector<8x384xf32> to vector<8x128xf32>
    %285 = vector.extract_strided_slice %267 {offsets = [0, 256], sizes = [8, 128], strides = [1, 1]} : vector<8x384xf32> to vector<8x128xf32>
    %286 = arith.addf %285, %22 : vector<8x128xf32>
    %287 = arith.mulf %275, %286 : vector<8x128xf32>
    %288 = arith.addf %284, %287 : vector<8x128xf32>
    %289 = math.tanh %288 : vector<8x128xf32>
    %cst_79 = arith.constant 1.000000e+00 : f32
    %290 = vector.broadcast %cst_79 : f32 to vector<8x128xf32>
    %291 = arith.subf %290, %283 : vector<8x128xf32>
    %292 = arith.mulf %291, %289 : vector<8x128xf32>
    %293 = arith.mulf %283, %228 : vector<8x128xf32>
    %294 = arith.addf %292, %293 : vector<8x128xf32>
    %c3 = arith.constant 3 : index
    %c0_80 = arith.constant 0 : index
    %c0_81 = arith.constant 0 : index
    %295 = vector.load %arg8[%c3, %c0_80, %c0_81] : memref<8x8x128xf32, #tpu.memory_space<vmem>>, vector<1x8x128xf32>
    %296 = vector.shape_cast %295 : vector<1x8x128xf32> to vector<8x128xf32>
    %297 = vector.shape_cast %264 : vector<8x128xf32> to vector<1x8x128xf32>
    tpu.vector_store %arg8[%c3, %c0_80, %c0_81], %297 {strides = array<i32>} : memref<8x8x128xf32, #tpu.memory_space<vmem>>, vector<1x8x128xf32>,
    %c4 = arith.constant 4 : index
    %c0_82 = arith.constant 0 : index
    %c0_83 = arith.constant 0 : index
    %298 = vector.load %arg9[%c4, %c0_82, %c0_83] : memref<8x8x128xf32, #tpu.memory_space<vmem>>, vector<1x8x128xf32>
    %299 = vector.shape_cast %298 : vector<1x8x128xf32> to vector<8x128xf32>
    %300 = vector.shape_cast %294 : vector<8x128xf32> to vector<1x8x128xf32>
    tpu.vector_store %arg9[%c4, %c0_82, %c0_83], %300 {strides = array<i32>} : memref<8x8x128xf32, #tpu.memory_space<vmem>>, vector<1x8x128xf32>,
    %301 = vector.extract_strided_slice %30 {offsets = [4, 0, 0], sizes = [1, 8, 384], strides = [1, 1, 1]} : vector<8x8x384xf32> to vector<1x8x384xf32>
    %302 = vector.shape_cast %301 : vector<1x8x384xf32> to vector<8x384xf32>
    %cst_84 = arith.constant dense<0.000000e+00> : vector<8x384xf32>
    %303 = tpu.matmul %264, %8, %cst_84 {dimension_numbers = #tpu.dot_dimension_numbers<[1], [0], [0], [1], [0, 0, 1, 1], [], []>} : vector<8x128xf32>, vector<128x384xf32>, vector<8x384xf32> -> vector<8x384xf32>
    %304 = vector.extract_strided_slice %302 {offsets = [0, 0], sizes = [8, 128], strides = [1, 1]} : vector<8x384xf32> to vector<8x128xf32>
    %305 = vector.extract_strided_slice %303 {offsets = [0, 0], sizes = [8, 128], strides = [1, 1]} : vector<8x384xf32> to vector<8x128xf32>
    %306 = arith.addf %304, %305 : vector<8x128xf32>
    %307 = arith.negf %306 : vector<8x128xf32>
    %308 = math.exp %307 : vector<8x128xf32>
    %cst_85 = arith.constant 1.000000e+00 : f32
    %309 = vector.broadcast %cst_85 : f32 to vector<8x128xf32>
    %310 = arith.addf %309, %308 : vector<8x128xf32>
    %311 = arith.divf %309, %310 : vector<8x128xf32>
    %312 = vector.extract_strided_slice %302 {offsets = [0, 128], sizes = [8, 128], strides = [1, 1]} : vector<8x384xf32> to vector<8x128xf32>
    %313 = vector.extract_strided_slice %303 {offsets = [0, 128], sizes = [8, 128], strides = [1, 1]} : vector<8x384xf32> to vector<8x128xf32>
    %314 = arith.addf %312, %313 : vector<8x128xf32>
    %315 = arith.negf %314 : vector<8x128xf32>
    %316 = math.exp %315 : vector<8x128xf32>
    %cst_86 = arith.constant 1.000000e+00 : f32
    %317 = vector.broadcast %cst_86 : f32 to vector<8x128xf32>
    %318 = arith.addf %317, %316 : vector<8x128xf32>
    %319 = arith.divf %317, %318 : vector<8x128xf32>
    %320 = vector.extract_strided_slice %302 {offsets = [0, 256], sizes = [8, 128], strides = [1, 1]} : vector<8x384xf32> to vector<8x128xf32>
    %321 = vector.extract_strided_slice %303 {offsets = [0, 256], sizes = [8, 128], strides = [1, 1]} : vector<8x384xf32> to vector<8x128xf32>
    %322 = arith.addf %321, %18 : vector<8x128xf32>
    %323 = arith.mulf %311, %322 : vector<8x128xf32>
    %324 = arith.addf %320, %323 : vector<8x128xf32>
    %325 = math.tanh %324 : vector<8x128xf32>
    %cst_87 = arith.constant 1.000000e+00 : f32
    %326 = vector.broadcast %cst_87 : f32 to vector<8x128xf32>
    %327 = arith.subf %326, %319 : vector<8x128xf32>
    %328 = arith.mulf %327, %325 : vector<8x128xf32>
    %329 = arith.mulf %319, %264 : vector<8x128xf32>
    %330 = arith.addf %328, %329 : vector<8x128xf32>
    %331 = vector.extract_strided_slice %34 {offsets = [3, 0, 0], sizes = [1, 8, 384], strides = [1, 1, 1]} : vector<8x8x384xf32> to vector<1x8x384xf32>
    %332 = vector.shape_cast %331 : vector<1x8x384xf32> to vector<8x384xf32>
    %cst_88 = arith.constant dense<0.000000e+00> : vector<8x384xf32>
    %333 = tpu.matmul %294, %10, %cst_88 {dimension_numbers = #tpu.dot_dimension_numbers<[1], [0], [0], [1], [0, 0, 1, 1], [], []>} : vector<8x128xf32>, vector<128x384xf32>, vector<8x384xf32> -> vector<8x384xf32>
    %334 = vector.extract_strided_slice %332 {offsets = [0, 0], sizes = [8, 128], strides = [1, 1]} : vector<8x384xf32> to vector<8x128xf32>
    %335 = vector.extract_strided_slice %333 {offsets = [0, 0], sizes = [8, 128], strides = [1, 1]} : vector<8x384xf32> to vector<8x128xf32>
    %336 = arith.addf %334, %335 : vector<8x128xf32>
    %337 = arith.negf %336 : vector<8x128xf32>
    %338 = math.exp %337 : vector<8x128xf32>
    %cst_89 = arith.constant 1.000000e+00 : f32
    %339 = vector.broadcast %cst_89 : f32 to vector<8x128xf32>
    %340 = arith.addf %339, %338 : vector<8x128xf32>
    %341 = arith.divf %339, %340 : vector<8x128xf32>
    %342 = vector.extract_strided_slice %332 {offsets = [0, 128], sizes = [8, 128], strides = [1, 1]} : vector<8x384xf32> to vector<8x128xf32>
    %343 = vector.extract_strided_slice %333 {offsets = [0, 128], sizes = [8, 128], strides = [1, 1]} : vector<8x384xf32> to vector<8x128xf32>
    %344 = arith.addf %342, %343 : vector<8x128xf32>
    %345 = arith.negf %344 : vector<8x128xf32>
    %346 = math.exp %345 : vector<8x128xf32>
    %cst_90 = arith.constant 1.000000e+00 : f32
    %347 = vector.broadcast %cst_90 : f32 to vector<8x128xf32>
    %348 = arith.addf %347, %346 : vector<8x128xf32>
    %349 = arith.divf %347, %348 : vector<8x128xf32>
    %350 = vector.extract_strided_slice %332 {offsets = [0, 256], sizes = [8, 128], strides = [1, 1]} : vector<8x384xf32> to vector<8x128xf32>
    %351 = vector.extract_strided_slice %333 {offsets = [0, 256], sizes = [8, 128], strides = [1, 1]} : vector<8x384xf32> to vector<8x128xf32>
    %352 = arith.addf %351, %22 : vector<8x128xf32>
    %353 = arith.mulf %341, %352 : vector<8x128xf32>
    %354 = arith.addf %350, %353 : vector<8x128xf32>
    %355 = math.tanh %354 : vector<8x128xf32>
    %cst_91 = arith.constant 1.000000e+00 : f32
    %356 = vector.broadcast %cst_91 : f32 to vector<8x128xf32>
    %357 = arith.subf %356, %349 : vector<8x128xf32>
    %358 = arith.mulf %357, %355 : vector<8x128xf32>
    %359 = arith.mulf %349, %294 : vector<8x128xf32>
    %360 = arith.addf %358, %359 : vector<8x128xf32>
    %c4_92 = arith.constant 4 : index
    %c0_93 = arith.constant 0 : index
    %c0_94 = arith.constant 0 : index
    %361 = vector.load %arg8[%c4_92, %c0_93, %c0_94] : memref<8x8x128xf32, #tpu.memory_space<vmem>>, vector<1x8x128xf32>
    %362 = vector.shape_cast %361 : vector<1x8x128xf32> to vector<8x128xf32>
    %363 = vector.shape_cast %330 : vector<8x128xf32> to vector<1x8x128xf32>
    tpu.vector_store %arg8[%c4_92, %c0_93, %c0_94], %363 {strides = array<i32>} : memref<8x8x128xf32, #tpu.memory_space<vmem>>, vector<1x8x128xf32>,
    %c3_95 = arith.constant 3 : index
    %c0_96 = arith.constant 0 : index
    %c0_97 = arith.constant 0 : index
    %364 = vector.load %arg9[%c3_95, %c0_96, %c0_97] : memref<8x8x128xf32, #tpu.memory_space<vmem>>, vector<1x8x128xf32>
    %365 = vector.shape_cast %364 : vector<1x8x128xf32> to vector<8x128xf32>
    %366 = vector.shape_cast %360 : vector<8x128xf32> to vector<1x8x128xf32>
    tpu.vector_store %arg9[%c3_95, %c0_96, %c0_97], %366 {strides = array<i32>} : memref<8x8x128xf32, #tpu.memory_space<vmem>>, vector<1x8x128xf32>,
    %367 = vector.extract_strided_slice %30 {offsets = [5, 0, 0], sizes = [1, 8, 384], strides = [1, 1, 1]} : vector<8x8x384xf32> to vector<1x8x384xf32>
    %368 = vector.shape_cast %367 : vector<1x8x384xf32> to vector<8x384xf32>
    %cst_98 = arith.constant dense<0.000000e+00> : vector<8x384xf32>
    %369 = tpu.matmul %330, %8, %cst_98 {dimension_numbers = #tpu.dot_dimension_numbers<[1], [0], [0], [1], [0, 0, 1, 1], [], []>} : vector<8x128xf32>, vector<128x384xf32>, vector<8x384xf32> -> vector<8x384xf32>
    %370 = vector.extract_strided_slice %368 {offsets = [0, 0], sizes = [8, 128], strides = [1, 1]} : vector<8x384xf32> to vector<8x128xf32>
    %371 = vector.extract_strided_slice %369 {offsets = [0, 0], sizes = [8, 128], strides = [1, 1]} : vector<8x384xf32> to vector<8x128xf32>
    %372 = arith.addf %370, %371 : vector<8x128xf32>
    %373 = arith.negf %372 : vector<8x128xf32>
    %374 = math.exp %373 : vector<8x128xf32>
    %cst_99 = arith.constant 1.000000e+00 : f32
    %375 = vector.broadcast %cst_99 : f32 to vector<8x128xf32>
    %376 = arith.addf %375, %374 : vector<8x128xf32>
    %377 = arith.divf %375, %376 : vector<8x128xf32>
    %378 = vector.extract_strided_slice %368 {offsets = [0, 128], sizes = [8, 128], strides = [1, 1]} : vector<8x384xf32> to vector<8x128xf32>
    %379 = vector.extract_strided_slice %369 {offsets = [0, 128], sizes = [8, 128], strides = [1, 1]} : vector<8x384xf32> to vector<8x128xf32>
    %380 = arith.addf %378, %379 : vector<8x128xf32>
    %381 = arith.negf %380 : vector<8x128xf32>
    %382 = math.exp %381 : vector<8x128xf32>
    %cst_100 = arith.constant 1.000000e+00 : f32
    %383 = vector.broadcast %cst_100 : f32 to vector<8x128xf32>
    %384 = arith.addf %383, %382 : vector<8x128xf32>
    %385 = arith.divf %383, %384 : vector<8x128xf32>
    %386 = vector.extract_strided_slice %368 {offsets = [0, 256], sizes = [8, 128], strides = [1, 1]} : vector<8x384xf32> to vector<8x128xf32>
    %387 = vector.extract_strided_slice %369 {offsets = [0, 256], sizes = [8, 128], strides = [1, 1]} : vector<8x384xf32> to vector<8x128xf32>
    %388 = arith.addf %387, %18 : vector<8x128xf32>
    %389 = arith.mulf %377, %388 : vector<8x128xf32>
    %390 = arith.addf %386, %389 : vector<8x128xf32>
    %391 = math.tanh %390 : vector<8x128xf32>
    %cst_101 = arith.constant 1.000000e+00 : f32
    %392 = vector.broadcast %cst_101 : f32 to vector<8x128xf32>
    %393 = arith.subf %392, %385 : vector<8x128xf32>
    %394 = arith.mulf %393, %391 : vector<8x128xf32>
    %395 = arith.mulf %385, %330 : vector<8x128xf32>
    %396 = arith.addf %394, %395 : vector<8x128xf32>
    %397 = vector.extract_strided_slice %34 {offsets = [2, 0, 0], sizes = [1, 8, 384], strides = [1, 1, 1]} : vector<8x8x384xf32> to vector<1x8x384xf32>
    %398 = vector.shape_cast %397 : vector<1x8x384xf32> to vector<8x384xf32>
    %cst_102 = arith.constant dense<0.000000e+00> : vector<8x384xf32>
    %399 = tpu.matmul %360, %10, %cst_102 {dimension_numbers = #tpu.dot_dimension_numbers<[1], [0], [0], [1], [0, 0, 1, 1], [], []>} : vector<8x128xf32>, vector<128x384xf32>, vector<8x384xf32> -> vector<8x384xf32>
    %400 = vector.extract_strided_slice %398 {offsets = [0, 0], sizes = [8, 128], strides = [1, 1]} : vector<8x384xf32> to vector<8x128xf32>
    %401 = vector.extract_strided_slice %399 {offsets = [0, 0], sizes = [8, 128], strides = [1, 1]} : vector<8x384xf32> to vector<8x128xf32>
    %402 = arith.addf %400, %401 : vector<8x128xf32>
    %403 = arith.negf %402 : vector<8x128xf32>
    %404 = math.exp %403 : vector<8x128xf32>
    %cst_103 = arith.constant 1.000000e+00 : f32
    %405 = vector.broadcast %cst_103 : f32 to vector<8x128xf32>
    %406 = arith.addf %405, %404 : vector<8x128xf32>
    %407 = arith.divf %405, %406 : vector<8x128xf32>
    %408 = vector.extract_strided_slice %398 {offsets = [0, 128], sizes = [8, 128], strides = [1, 1]} : vector<8x384xf32> to vector<8x128xf32>
    %409 = vector.extract_strided_slice %399 {offsets = [0, 128], sizes = [8, 128], strides = [1, 1]} : vector<8x384xf32> to vector<8x128xf32>
    %410 = arith.addf %408, %409 : vector<8x128xf32>
    %411 = arith.negf %410 : vector<8x128xf32>
    %412 = math.exp %411 : vector<8x128xf32>
    %cst_104 = arith.constant 1.000000e+00 : f32
    %413 = vector.broadcast %cst_104 : f32 to vector<8x128xf32>
    %414 = arith.addf %413, %412 : vector<8x128xf32>
    %415 = arith.divf %413, %414 : vector<8x128xf32>
    %416 = vector.extract_strided_slice %398 {offsets = [0, 256], sizes = [8, 128], strides = [1, 1]} : vector<8x384xf32> to vector<8x128xf32>
    %417 = vector.extract_strided_slice %399 {offsets = [0, 256], sizes = [8, 128], strides = [1, 1]} : vector<8x384xf32> to vector<8x128xf32>
    %418 = arith.addf %417, %22 : vector<8x128xf32>
    %419 = arith.mulf %407, %418 : vector<8x128xf32>
    %420 = arith.addf %416, %419 : vector<8x128xf32>
    %421 = math.tanh %420 : vector<8x128xf32>
    %cst_105 = arith.constant 1.000000e+00 : f32
    %422 = vector.broadcast %cst_105 : f32 to vector<8x128xf32>
    %423 = arith.subf %422, %415 : vector<8x128xf32>
    %424 = arith.mulf %423, %421 : vector<8x128xf32>
    %425 = arith.mulf %415, %360 : vector<8x128xf32>
    %426 = arith.addf %424, %425 : vector<8x128xf32>
    %c5_106 = arith.constant 5 : index
    %c0_107 = arith.constant 0 : index
    %c0_108 = arith.constant 0 : index
    %427 = vector.load %arg8[%c5_106, %c0_107, %c0_108] : memref<8x8x128xf32, #tpu.memory_space<vmem>>, vector<1x8x128xf32>
    %428 = vector.shape_cast %427 : vector<1x8x128xf32> to vector<8x128xf32>
    %429 = vector.shape_cast %396 : vector<8x128xf32> to vector<1x8x128xf32>
    tpu.vector_store %arg8[%c5_106, %c0_107, %c0_108], %429 {strides = array<i32>} : memref<8x8x128xf32, #tpu.memory_space<vmem>>, vector<1x8x128xf32>,
    %c2_109 = arith.constant 2 : index
    %c0_110 = arith.constant 0 : index
    %c0_111 = arith.constant 0 : index
    %430 = vector.load %arg9[%c2_109, %c0_110, %c0_111] : memref<8x8x128xf32, #tpu.memory_space<vmem>>, vector<1x8x128xf32>
    %431 = vector.shape_cast %430 : vector<1x8x128xf32> to vector<8x128xf32>
    %432 = vector.shape_cast %426 : vector<8x128xf32> to vector<1x8x128xf32>
    tpu.vector_store %arg9[%c2_109, %c0_110, %c0_111], %432 {strides = array<i32>} : memref<8x8x128xf32, #tpu.memory_space<vmem>>, vector<1x8x128xf32>,
    %433 = vector.extract_strided_slice %30 {offsets = [6, 0, 0], sizes = [1, 8, 384], strides = [1, 1, 1]} : vector<8x8x384xf32> to vector<1x8x384xf32>
    %434 = vector.shape_cast %433 : vector<1x8x384xf32> to vector<8x384xf32>
    %cst_112 = arith.constant dense<0.000000e+00> : vector<8x384xf32>
    %435 = tpu.matmul %396, %8, %cst_112 {dimension_numbers = #tpu.dot_dimension_numbers<[1], [0], [0], [1], [0, 0, 1, 1], [], []>} : vector<8x128xf32>, vector<128x384xf32>, vector<8x384xf32> -> vector<8x384xf32>
    %436 = vector.extract_strided_slice %434 {offsets = [0, 0], sizes = [8, 128], strides = [1, 1]} : vector<8x384xf32> to vector<8x128xf32>
    %437 = vector.extract_strided_slice %435 {offsets = [0, 0], sizes = [8, 128], strides = [1, 1]} : vector<8x384xf32> to vector<8x128xf32>
    %438 = arith.addf %436, %437 : vector<8x128xf32>
    %439 = arith.negf %438 : vector<8x128xf32>
    %440 = math.exp %439 : vector<8x128xf32>
    %cst_113 = arith.constant 1.000000e+00 : f32
    %441 = vector.broadcast %cst_113 : f32 to vector<8x128xf32>
    %442 = arith.addf %441, %440 : vector<8x128xf32>
    %443 = arith.divf %441, %442 : vector<8x128xf32>
    %444 = vector.extract_strided_slice %434 {offsets = [0, 128], sizes = [8, 128], strides = [1, 1]} : vector<8x384xf32> to vector<8x128xf32>
    %445 = vector.extract_strided_slice %435 {offsets = [0, 128], sizes = [8, 128], strides = [1, 1]} : vector<8x384xf32> to vector<8x128xf32>
    %446 = arith.addf %444, %445 : vector<8x128xf32>
    %447 = arith.negf %446 : vector<8x128xf32>
    %448 = math.exp %447 : vector<8x128xf32>
    %cst_114 = arith.constant 1.000000e+00 : f32
    %449 = vector.broadcast %cst_114 : f32 to vector<8x128xf32>
    %450 = arith.addf %449, %448 : vector<8x128xf32>
    %451 = arith.divf %449, %450 : vector<8x128xf32>
    %452 = vector.extract_strided_slice %434 {offsets = [0, 256], sizes = [8, 128], strides = [1, 1]} : vector<8x384xf32> to vector<8x128xf32>
    %453 = vector.extract_strided_slice %435 {offsets = [0, 256], sizes = [8, 128], strides = [1, 1]} : vector<8x384xf32> to vector<8x128xf32>
    %454 = arith.addf %453, %18 : vector<8x128xf32>
    %455 = arith.mulf %443, %454 : vector<8x128xf32>
    %456 = arith.addf %452, %455 : vector<8x128xf32>
    %457 = math.tanh %456 : vector<8x128xf32>
    %cst_115 = arith.constant 1.000000e+00 : f32
    %458 = vector.broadcast %cst_115 : f32 to vector<8x128xf32>
    %459 = arith.subf %458, %451 : vector<8x128xf32>
    %460 = arith.mulf %459, %457 : vector<8x128xf32>
    %461 = arith.mulf %451, %396 : vector<8x128xf32>
    %462 = arith.addf %460, %461 : vector<8x128xf32>
    %463 = vector.extract_strided_slice %34 {offsets = [1, 0, 0], sizes = [1, 8, 384], strides = [1, 1, 1]} : vector<8x8x384xf32> to vector<1x8x384xf32>
    %464 = vector.shape_cast %463 : vector<1x8x384xf32> to vector<8x384xf32>
    %cst_116 = arith.constant dense<0.000000e+00> : vector<8x384xf32>
    %465 = tpu.matmul %426, %10, %cst_116 {dimension_numbers = #tpu.dot_dimension_numbers<[1], [0], [0], [1], [0, 0, 1, 1], [], []>} : vector<8x128xf32>, vector<128x384xf32>, vector<8x384xf32> -> vector<8x384xf32>
    %466 = vector.extract_strided_slice %464 {offsets = [0, 0], sizes = [8, 128], strides = [1, 1]} : vector<8x384xf32> to vector<8x128xf32>
    %467 = vector.extract_strided_slice %465 {offsets = [0, 0], sizes = [8, 128], strides = [1, 1]} : vector<8x384xf32> to vector<8x128xf32>
    %468 = arith.addf %466, %467 : vector<8x128xf32>
    %469 = arith.negf %468 : vector<8x128xf32>
    %470 = math.exp %469 : vector<8x128xf32>
    %cst_117 = arith.constant 1.000000e+00 : f32
    %471 = vector.broadcast %cst_117 : f32 to vector<8x128xf32>
    %472 = arith.addf %471, %470 : vector<8x128xf32>
    %473 = arith.divf %471, %472 : vector<8x128xf32>
    %474 = vector.extract_strided_slice %464 {offsets = [0, 128], sizes = [8, 128], strides = [1, 1]} : vector<8x384xf32> to vector<8x128xf32>
    %475 = vector.extract_strided_slice %465 {offsets = [0, 128], sizes = [8, 128], strides = [1, 1]} : vector<8x384xf32> to vector<8x128xf32>
    %476 = arith.addf %474, %475 : vector<8x128xf32>
    %477 = arith.negf %476 : vector<8x128xf32>
    %478 = math.exp %477 : vector<8x128xf32>
    %cst_118 = arith.constant 1.000000e+00 : f32
    %479 = vector.broadcast %cst_118 : f32 to vector<8x128xf32>
    %480 = arith.addf %479, %478 : vector<8x128xf32>
    %481 = arith.divf %479, %480 : vector<8x128xf32>
    %482 = vector.extract_strided_slice %464 {offsets = [0, 256], sizes = [8, 128], strides = [1, 1]} : vector<8x384xf32> to vector<8x128xf32>
    %483 = vector.extract_strided_slice %465 {offsets = [0, 256], sizes = [8, 128], strides = [1, 1]} : vector<8x384xf32> to vector<8x128xf32>
    %484 = arith.addf %483, %22 : vector<8x128xf32>
    %485 = arith.mulf %473, %484 : vector<8x128xf32>
    %486 = arith.addf %482, %485 : vector<8x128xf32>
    %487 = math.tanh %486 : vector<8x128xf32>
    %cst_119 = arith.constant 1.000000e+00 : f32
    %488 = vector.broadcast %cst_119 : f32 to vector<8x128xf32>
    %489 = arith.subf %488, %481 : vector<8x128xf32>
    %490 = arith.mulf %489, %487 : vector<8x128xf32>
    %491 = arith.mulf %481, %426 : vector<8x128xf32>
    %492 = arith.addf %490, %491 : vector<8x128xf32>
    %c6_120 = arith.constant 6 : index
    %c0_121 = arith.constant 0 : index
    %c0_122 = arith.constant 0 : index
    %493 = vector.load %arg8[%c6_120, %c0_121, %c0_122] : memref<8x8x128xf32, #tpu.memory_space<vmem>>, vector<1x8x128xf32>
    %494 = vector.shape_cast %493 : vector<1x8x128xf32> to vector<8x128xf32>
    %495 = vector.shape_cast %462 : vector<8x128xf32> to vector<1x8x128xf32>
    tpu.vector_store %arg8[%c6_120, %c0_121, %c0_122], %495 {strides = array<i32>} : memref<8x8x128xf32, #tpu.memory_space<vmem>>, vector<1x8x128xf32>,
    %c1_123 = arith.constant 1 : index
    %c0_124 = arith.constant 0 : index
    %c0_125 = arith.constant 0 : index
    %496 = vector.load %arg9[%c1_123, %c0_124, %c0_125] : memref<8x8x128xf32, #tpu.memory_space<vmem>>, vector<1x8x128xf32>
    %497 = vector.shape_cast %496 : vector<1x8x128xf32> to vector<8x128xf32>
    %498 = vector.shape_cast %492 : vector<8x128xf32> to vector<1x8x128xf32>
    tpu.vector_store %arg9[%c1_123, %c0_124, %c0_125], %498 {strides = array<i32>} : memref<8x8x128xf32, #tpu.memory_space<vmem>>, vector<1x8x128xf32>,
    %499 = vector.extract_strided_slice %30 {offsets = [7, 0, 0], sizes = [1, 8, 384], strides = [1, 1, 1]} : vector<8x8x384xf32> to vector<1x8x384xf32>
    %500 = vector.shape_cast %499 : vector<1x8x384xf32> to vector<8x384xf32>
    %cst_126 = arith.constant dense<0.000000e+00> : vector<8x384xf32>
    %501 = tpu.matmul %462, %8, %cst_126 {dimension_numbers = #tpu.dot_dimension_numbers<[1], [0], [0], [1], [0, 0, 1, 1], [], []>} : vector<8x128xf32>, vector<128x384xf32>, vector<8x384xf32> -> vector<8x384xf32>
    %502 = vector.extract_strided_slice %500 {offsets = [0, 0], sizes = [8, 128], strides = [1, 1]} : vector<8x384xf32> to vector<8x128xf32>
    %503 = vector.extract_strided_slice %501 {offsets = [0, 0], sizes = [8, 128], strides = [1, 1]} : vector<8x384xf32> to vector<8x128xf32>
    %504 = arith.addf %502, %503 : vector<8x128xf32>
    %505 = arith.negf %504 : vector<8x128xf32>
    %506 = math.exp %505 : vector<8x128xf32>
    %cst_127 = arith.constant 1.000000e+00 : f32
    %507 = vector.broadcast %cst_127 : f32 to vector<8x128xf32>
    %508 = arith.addf %507, %506 : vector<8x128xf32>
    %509 = arith.divf %507, %508 : vector<8x128xf32>
    %510 = vector.extract_strided_slice %500 {offsets = [0, 128], sizes = [8, 128], strides = [1, 1]} : vector<8x384xf32> to vector<8x128xf32>
    %511 = vector.extract_strided_slice %501 {offsets = [0, 128], sizes = [8, 128], strides = [1, 1]} : vector<8x384xf32> to vector<8x128xf32>
    %512 = arith.addf %510, %511 : vector<8x128xf32>
    %513 = arith.negf %512 : vector<8x128xf32>
    %514 = math.exp %513 : vector<8x128xf32>
    %cst_128 = arith.constant 1.000000e+00 : f32
    %515 = vector.broadcast %cst_128 : f32 to vector<8x128xf32>
    %516 = arith.addf %515, %514 : vector<8x128xf32>
    %517 = arith.divf %515, %516 : vector<8x128xf32>
    %518 = vector.extract_strided_slice %500 {offsets = [0, 256], sizes = [8, 128], strides = [1, 1]} : vector<8x384xf32> to vector<8x128xf32>
    %519 = vector.extract_strided_slice %501 {offsets = [0, 256], sizes = [8, 128], strides = [1, 1]} : vector<8x384xf32> to vector<8x128xf32>
    %520 = arith.addf %519, %18 : vector<8x128xf32>
    %521 = arith.mulf %509, %520 : vector<8x128xf32>
    %522 = arith.addf %518, %521 : vector<8x128xf32>
    %523 = math.tanh %522 : vector<8x128xf32>
    %cst_129 = arith.constant 1.000000e+00 : f32
    %524 = vector.broadcast %cst_129 : f32 to vector<8x128xf32>
    %525 = arith.subf %524, %517 : vector<8x128xf32>
    %526 = arith.mulf %525, %523 : vector<8x128xf32>
    %527 = arith.mulf %517, %462 : vector<8x128xf32>
    %528 = arith.addf %526, %527 : vector<8x128xf32>
    %529 = vector.extract_strided_slice %34 {offsets = [0, 0, 0], sizes = [1, 8, 384], strides = [1, 1, 1]} : vector<8x8x384xf32> to vector<1x8x384xf32>
    %530 = vector.shape_cast %529 : vector<1x8x384xf32> to vector<8x384xf32>
    %cst_130 = arith.constant dense<0.000000e+00> : vector<8x384xf32>
    %531 = tpu.matmul %492, %10, %cst_130 {dimension_numbers = #tpu.dot_dimension_numbers<[1], [0], [0], [1], [0, 0, 1, 1], [], []>} : vector<8x128xf32>, vector<128x384xf32>, vector<8x384xf32> -> vector<8x384xf32>
    %532 = vector.extract_strided_slice %530 {offsets = [0, 0], sizes = [8, 128], strides = [1, 1]} : vector<8x384xf32> to vector<8x128xf32>
    %533 = vector.extract_strided_slice %531 {offsets = [0, 0], sizes = [8, 128], strides = [1, 1]} : vector<8x384xf32> to vector<8x128xf32>
    %534 = arith.addf %532, %533 : vector<8x128xf32>
    %535 = arith.negf %534 : vector<8x128xf32>
    %536 = math.exp %535 : vector<8x128xf32>
    %cst_131 = arith.constant 1.000000e+00 : f32
    %537 = vector.broadcast %cst_131 : f32 to vector<8x128xf32>
    %538 = arith.addf %537, %536 : vector<8x128xf32>
    %539 = arith.divf %537, %538 : vector<8x128xf32>
    %540 = vector.extract_strided_slice %530 {offsets = [0, 128], sizes = [8, 128], strides = [1, 1]} : vector<8x384xf32> to vector<8x128xf32>
    %541 = vector.extract_strided_slice %531 {offsets = [0, 128], sizes = [8, 128], strides = [1, 1]} : vector<8x384xf32> to vector<8x128xf32>
    %542 = arith.addf %540, %541 : vector<8x128xf32>
    %543 = arith.negf %542 : vector<8x128xf32>
    %544 = math.exp %543 : vector<8x128xf32>
    %cst_132 = arith.constant 1.000000e+00 : f32
    %545 = vector.broadcast %cst_132 : f32 to vector<8x128xf32>
    %546 = arith.addf %545, %544 : vector<8x128xf32>
    %547 = arith.divf %545, %546 : vector<8x128xf32>
    %548 = vector.extract_strided_slice %530 {offsets = [0, 256], sizes = [8, 128], strides = [1, 1]} : vector<8x384xf32> to vector<8x128xf32>
    %549 = vector.extract_strided_slice %531 {offsets = [0, 256], sizes = [8, 128], strides = [1, 1]} : vector<8x384xf32> to vector<8x128xf32>
    %550 = arith.addf %549, %22 : vector<8x128xf32>
    %551 = arith.mulf %539, %550 : vector<8x128xf32>
    %552 = arith.addf %548, %551 : vector<8x128xf32>
    %553 = math.tanh %552 : vector<8x128xf32>
    %cst_133 = arith.constant 1.000000e+00 : f32
    %554 = vector.broadcast %cst_133 : f32 to vector<8x128xf32>
    %555 = arith.subf %554, %547 : vector<8x128xf32>
    %556 = arith.mulf %555, %553 : vector<8x128xf32>
    %557 = arith.mulf %547, %492 : vector<8x128xf32>
    %558 = arith.addf %556, %557 : vector<8x128xf32>
    %c7_134 = arith.constant 7 : index
    %c0_135 = arith.constant 0 : index
    %c0_136 = arith.constant 0 : index
    %559 = vector.load %arg8[%c7_134, %c0_135, %c0_136] : memref<8x8x128xf32, #tpu.memory_space<vmem>>, vector<1x8x128xf32>
    %560 = vector.shape_cast %559 : vector<1x8x128xf32> to vector<8x128xf32>
    %561 = vector.shape_cast %528 : vector<8x128xf32> to vector<1x8x128xf32>
    tpu.vector_store %arg8[%c7_134, %c0_135, %c0_136], %561 {strides = array<i32>} : memref<8x8x128xf32, #tpu.memory_space<vmem>>, vector<1x8x128xf32>,
    %c0_137 = arith.constant 0 : index
    %c0_138 = arith.constant 0 : index
    %c0_139 = arith.constant 0 : index
    %562 = vector.load %arg9[%c0_137, %c0_138, %c0_139] : memref<8x8x128xf32, #tpu.memory_space<vmem>>, vector<1x8x128xf32>
    %563 = vector.shape_cast %562 : vector<1x8x128xf32> to vector<8x128xf32>
    %564 = vector.shape_cast %558 : vector<8x128xf32> to vector<1x8x128xf32>
    tpu.vector_store %arg9[%c0_137, %c0_138, %c0_139], %564 {strides = array<i32>} : memref<8x8x128xf32, #tpu.memory_space<vmem>>, vector<1x8x128xf32>,
    %c0_140 = arith.constant 0 : index
    %c0_141 = arith.constant 0 : index
    %565 = vector.load %arg10[%c0_140, %c0_141] : memref<8x128xf32, #tpu.memory_space<vmem>>, vector<8x128xf32>
    tpu.vector_store %arg10[%c0_140, %c0_141], %528 {strides = array<i32>} : memref<8x128xf32, #tpu.memory_space<vmem>>, vector<8x128xf32>,
    %c0_142 = arith.constant 0 : index
    %c0_143 = arith.constant 0 : index
    %566 = vector.load %arg11[%c0_142, %c0_143] : memref<8x128xf32, #tpu.memory_space<vmem>>, vector<8x128xf32>
    tpu.vector_store %arg11[%c0_142, %c0_143], %558 {strides = array<i32>} : memref<8x128xf32, #tpu.memory_space<vmem>>, vector<8x128xf32>,
    return
  }
  func.func @transform_0(%arg0: i32) -> (i32, i32, i32) {
    %c0_i32 = arith.constant 0 : i32
    %c0_i32_0 = arith.constant 0 : i32
    %c0_i32_1 = arith.constant 0 : i32
    return %arg0, %c0_i32, %c0_i32_0 : i32, i32, i32
  }
  func.func @transform_1(%arg0: i32) -> (i32, i32, i32) {
    %c0_i32 = arith.constant 0 : i32
    %0 = arith.subi %c0_i32, %arg0 : i32
    %c0_i32_0 = arith.constant 0 : i32
    %c0_i32_1 = arith.constant 0 : i32
    %c0_i32_2 = arith.constant 0 : i32
    return %0, %c0_i32_0, %c0_i32_1 : i32, i32, i32
  }
  func.func @transform_2(%arg0: i32) -> (i32, i32, i32) {
    %c0_i32 = arith.constant 0 : i32
    %c0_i32_0 = arith.constant 0 : i32
    %c0_i32_1 = arith.constant 0 : i32
    %c0_i32_2 = arith.constant 0 : i32
    return %c0_i32, %c0_i32_0, %c0_i32_1 : i32, i32, i32
  }
  func.func @transform_3(%arg0: i32) -> (i32, i32, i32) {
    %c0_i32 = arith.constant 0 : i32
    %c0_i32_0 = arith.constant 0 : i32
    %c0_i32_1 = arith.constant 0 : i32
    %c0_i32_2 = arith.constant 0 : i32
    return %c0_i32, %c0_i32_0, %c0_i32_1 : i32, i32, i32
  }
  func.func @transform_4(%arg0: i32) -> (i32, i32, i32) {
    %c0_i32 = arith.constant 0 : i32
    %c0_i32_0 = arith.constant 0 : i32
    %c0_i32_1 = arith.constant 0 : i32
    %c0_i32_2 = arith.constant 0 : i32
    return %c0_i32, %c0_i32_0, %c0_i32_1 : i32, i32, i32
  }
  func.func @transform_5(%arg0: i32) -> (i32, i32, i32) {
    %c0_i32 = arith.constant 0 : i32
    %c0_i32_0 = arith.constant 0 : i32
    %c0_i32_1 = arith.constant 0 : i32
    %c0_i32_2 = arith.constant 0 : i32
    return %c0_i32, %c0_i32_0, %c0_i32_1 : i32, i32, i32
  }
  func.func @transform_6(%arg0: i32) -> (i32, i32, i32) {
    %c0_i32 = arith.constant 0 : i32
    %c0_i32_0 = arith.constant 0 : i32
    %c0_i32_1 = arith.constant 0 : i32
    %c0_i32_2 = arith.constant 0 : i32
    return %c0_i32, %c0_i32_0, %c0_i32_1 : i32, i32, i32
  }
  func.func @transform_7(%arg0: i32) -> (i32, i32, i32) {
    %c0_i32 = arith.constant 0 : i32
    %c0_i32_0 = arith.constant 0 : i32
    %c0_i32_1 = arith.constant 0 : i32
    return %arg0, %c0_i32, %c0_i32_0 : i32, i32, i32
  }
  func.func @transform_8(%arg0: i32) -> (i32, i32, i32) {
    %c0_i32 = arith.constant 0 : i32
    %0 = arith.subi %c0_i32, %arg0 : i32
    %c0_i32_0 = arith.constant 0 : i32
    %c0_i32_1 = arith.constant 0 : i32
    %c0_i32_2 = arith.constant 0 : i32
    return %0, %c0_i32_0, %c0_i32_1 : i32, i32, i32
  }
}

</mosaic_0001>

<bundles_post_ra>
// kernel: bigru_forward.1
= control target key start
LH: loop header
LB: loop body
LE: loop exit
PB: predicated region body
PF: predicated region fallthrough
CT: control target
= control target key end

     0   :  { %v7009_v3 = vmov 0.0   ;;  %vm233_vm0 = vcmask 130048   ;;  %v7011_v29 = vmov 0.0|0.0   ;;  %vm5578_vm1 = vmmov 0   ;;  %s7000_s2 = inlined_call_operand.vmem [shape: f32[2,16,384], index: 2, kind: input, shape index: {}]   ;;  %s7001_s0 = inlined_call_operand.vmem [shape: f32[8,8,16], index: 0, kind: input, shape index: {}, may-alias: {0,1}]   ;;  %s7002_s3 = inlined_call_operand.vmem [shape: f32[2,128,384], index: 3, kind: input, shape index: {}]   ;;  %s7003_s1 = inlined_call_operand.vmem [shape: f32[8,8,16], index: 1, kind: input, shape index: {}, may-alias: {0,1}]   ;;  %s7004_s6 = inlined_call_operand.vmem [shape: f32[2,8,128], index: 6, kind: input, shape index: {}]   ;;  %s7005_s4 = inlined_call_operand.vmem [shape: f32[2,1,384], index: 4, kind: input, shape index: {}]   ;;  %s7006_s5 = inlined_call_operand.vmem [shape: f32[2,1,128], index: 5, kind: input, shape index: {}]   ;;  %s7007_s7 = inlined_call_operand.vmem [shape: f32[8,8,128], index: 7, kind: output, shape index: {0}]   ;;  %s7008_s8 = inlined_call_operand.vmem [shape: f32[8,8,128], index: 8, kind: output, shape index: {1}]  }
   0x1   :  { %v74_v0 = vld [vmem:[%s7000_s2 + $0x8] sm:$0xff]  ;;  %v77_v1 = vld [vmem:[%s7000_s2 + $0x20] sm:$0xff]  ;;  %322 = vmatprep.mubr.f32.mxu0 %v7009_v3  ;;  %358 = vmatprep.mubr.f32.mxu1 %v7009_v3  ;;  %v76_v5 = vld [vmem:[%s7000_s2 + $0x18] sm:$0xff] }
   0x2   :  { %v73_v2 = vld [vmem:[%s7000_s2] sm:$0xff]  ;;  %v4433_v4 = vpack.c.bf16 %v77_v1, %v74_v0  ;;  %v75_v7 = vld [vmem:[%s7000_s2 + $0x10] sm:$0xff]  ;;  %v78_v8 = vld [vmem:[%s7000_s2 + $0x28] sm:$0xff] }
   0x3   :  { %v4435_v6 = vpack.c.bf16 %v76_v5, %v73_v2  ;;  %v3415_v9 = vld [vmem:[%s7000_s2 + $0x40] sm:$0xff]  ;;  %v4437_v11 = vpack.c.bf16 %v78_v8, %v75_v7  ;;  %v3418_v12 = vld [vmem:[%s7000_s2 + $0x58] sm:$0xff]  ;;  %v207_v13 = vld [vmem:[%s7001_s0 + $0x30] sm:$0xff] }
   0x4   :  { %4434 = vmatprep.subr.bf16.mxu0 %v4433_v4  ;;  %5345 = vmatprep.subr.bf16.mxu1 %v4433_v4  ;;  %v201_v10 = vld [vmem:[%s7001_s0] sm:$0xff]  ;;  %v4445_v14 = vpack.c.bf16 %v3418_v12, %v3415_v9  ;;  %v3414_v15 = vld [vmem:[%s7000_s2 + $0x38] sm:$0xff]  ;;  %v3417_v16 = vld [vmem:[%s7000_s2 + $0x50] sm:$0xff] }
   0x5   :  { %4436 = vmatpush1.bf16.msra.mxu0 %v4435_v6  ;;  %5346 = vmatpush1.bf16.msra.mxu1 %v4435_v6  ;;  %v4441_v17 = vpack.c.bf16 %v3417_v16, %v3414_v15  ;;  %v87_v18 = vld [vmem:[%s7002_s3 + $0x8] sm:$0xff]  ;;  %v90_v19 = vld [vmem:[%s7002_s3 + $0x20] sm:$0xff]  ;;  %v208_v21 = vld [vmem:[%s7001_s0 + $0x38] sm:$0xff] }
   0x6   :  { %4438 = vmatprep.subr.bf16.mxu1 %v4437_v11  ;;  %4446 = vmatprep.subr.bf16.mxu0 %v4445_v14  ;;  %v202_v20 = vld [vmem:[%s7001_s0 + $0x8] sm:$0xff]  ;;  %v5676_v22 = vpack.c.bf16 %v90_v19, %v87_v18  ;;  %v3413_v23 = vld [vmem:[%s7000_s2 + $0x30] sm:$0xff]  ;;  %v204_v27 = vld [vmem:[%s7001_s0 + $0x18] sm:$0xff] }
   0x7   :  { %v3416_v24 = vld [vmem:[%s7000_s2 + $0x48] sm:$0xff]  ;;  %v203_v25 = vld [vmem:[%s7001_s0 + $0x10] sm:$0xff]  ;;  %v205_v28 = vld [vmem:[%s7001_s0 + $0x20] sm:$0xff] }
   0x8   :  { %3471 = vmatmul.mubr.msk.f32.vlgmr.msra.gmra.mrb[0].mxu0 %vm233_vm0, %v201_v10  ;;  %3477 = vmatmul.mubr.msk.f32.vlgmr.msra.gmra.mrb[0].mxu1 %vm233_vm0, %v207_v13  ;;  %v4443_v26 = vpack.c.bf16 %v3416_v24, %v3413_v23  ;;  %v206_v30 = vld [vmem:[%s7001_s0 + $0x28] sm:$0xff]  ;;  %v209_v31 = vld [vmem:[%s7003_s1] sm:$0xff]  ;;  %v89_v33 = vld [vmem:[%s7002_s3 + $0x18] sm:$0xff] }
   0x9   :  { %4440 = vmatpush3.bf16.msra.mxu1 %v4437_v11  ;;  %4448 = vmatpush3.bf16.msra.mxu0 %v4445_v14  ;;  %v86_v32 = vld [vmem:[%s7002_s3] sm:$0xff]  ;;  %v88_v34 = vld [vmem:[%s7002_s3 + $0x10] sm:$0xff]  ;;  %v91_v35 = vld [vmem:[%s7002_s3 + $0x28] sm:$0xff] }
   0xa   :  { %328 = vmatprep.mubr.f32.mxu0 %v7009_v3  ;;  %364 = vmatprep.mubr.f32.mxu1 %v7009_v3  ;;  %v93_v36 = vld [vmem:[%s7002_s3 + $0x38] sm:$0xff]  ;;  %v96_v37 = vld [vmem:[%s7002_s3 + $0x50] sm:$0xff]  ;;  %v210_v38 = vld [vmem:[%s7003_s1 + $0x8] sm:$0xff]  ;;  %v5744_v39 = vpack.c.bf16 %v89_v33, %v86_v32  ;;  %v5746_v40 = vpack.c.bf16 %v91_v35, %v88_v34 }
   0xb   :  { %4442 = vmatprep.subr.bf16.mxu1 %v4441_v17  ;;  %4450 = vmatprep.subr.bf16.mxu0 %v5676_v22  ;;  %v92_v41 = vld [vmem:[%s7002_s3 + $0x30] sm:$0xff]  ;;  %v5751_v42 = vpack.c.bf16 %v96_v37, %v93_v36  ;;  %v95_v43 = vld [vmem:[%s7002_s3 + $0x48] sm:$0xff]  ;;  %v94_v44 = vld [vmem:[%s7002_s3 + $0x40] sm:$0xff] }
   0xc   :  { %3472 = vmatmul.mubr.msk.f32.gmra.mrb[2].mxu0 %vm233_vm0, %v202_v20  ;;  %3478 = vmatmul.mubr.msk.f32.gmra.mrb[2].mxu1 %vm233_vm0, %v208_v21  ;;  %v97_v45 = vld [vmem:[%s7002_s3 + $0x58] sm:$0xff]  ;;  %v99_v46 = vld [vmem:[%s7002_s3 + $0x68] sm:$0xff]  ;;  %v102_v47 = vld [vmem:[%s7002_s3 + $0x80] sm:$0xff]  ;;  %v5772_v48 = vpack.c.bf16 %v95_v43, %v92_v41 }
   0xd   :  { %334 = vmatprep.mubr.f32.mxu0 %v7009_v3  ;;  %3845 = vmatprep.mubr.msk.f32.mxu1 %vm233_vm0, %v201_v10  ;;  %v5774_v49 = vpack.c.bf16 %v97_v45, %v94_v44  ;;  %v211_v50 = vld [vmem:[%s7003_s1 + $0x10] sm:$0xff]  ;;  %v98_v51 = vld [vmem:[%s7002_s3 + $0x60] sm:$0xff]  ;;  %v5784_v52 = vpack.c.bf16 %v102_v47, %v99_v46  ;;  %v101_v53 = vld [vmem:[%s7002_s3 + $0x78] sm:$0xff] }
   0xe   :  { %v100_v54 = vld [vmem:[%s7002_s3 + $0x70] sm:$0xff]  ;;  %v103_v55 = vld [vmem:[%s7002_s3 + $0x88] sm:$0xff]  ;;  %v105_v56 = vld [vmem:[%s7002_s3 + $0x98] sm:$0xff]  ;;  %v5810_v59 = vpack.c.bf16 %v101_v53, %v98_v51 }
   0xf   :  { %v108_v57 = vld [vmem:[%s7002_s3 + $0xb0] sm:$0xff]  ;;  %v212_v58 = vld [vmem:[%s7003_s1 + $0x18] sm:$0xff]  ;;  %v5812_v60 = vpack.c.bf16 %v103_v55, %v100_v54  ;;  %v107_v62 = vld [vmem:[%s7002_s3 + $0xa8] sm:$0xff] }
  0x10   :  { %3473 = vmatmul.mubr.msk.f32.gmra.mrb[4].mxu0 %vm233_vm0, %v203_v25  ;;  %3846 = vmatmul.mubr.msk.f32.vlgmr.msra.gmra.mrb[4].mxu1 %vm233_vm0, %v202_v20  ;;  %v104_v61 = vld [vmem:[%s7002_s3 + $0x90] sm:$0xff]  ;;  %v5822_v63 = vpack.c.bf16 %v108_v57, %v105_v56  ;;  %v106_v0 = vld [vmem:[%s7002_s3 + $0xa0] sm:$0xff]  ;;  %v109_v1 = vld [vmem:[%s7002_s3 + $0xb8] sm:$0xff] }
  0x11   :  { %4444 = vmatpush1.bf16.msra.mxu1 %v4443_v26  ;;  %340 = vmatprep.mubr.f32.mxu0 %v7009_v3  ;;  %v213_v2 = vld [vmem:[%s7003_s1 + $0x20] sm:$0xff]  ;;  %v111_v4 = vld [vmem:[%s7002_s3 + $0xc8] sm:$0xff]  ;;  %v5848_v7 = vpack.c.bf16 %v107_v62, %v104_v61  ;;  %v5850_v8 = vpack.c.bf16 %v109_v1, %v106_v0  ;;  %v113_v10 = vld [vmem:[%s7002_s3 + $0xd8] sm:$0xff] }
  0x12   :  { %3848 = vmatprep.mubr.msk.f32.mxu1 %vm233_vm0, %v203_v25  ;;  %4481 = vmatprep.subr.bf16.mxu1 %v7011_v29  ;;  %v114_v5 = vld [vmem:[%s7002_s3 + $0xe0] sm:$0xff]  ;;  %v214_v6 = vld [vmem:[%s7003_s1 + $0x28] sm:$0xff]  ;;  %v5861_v11 = vld [vmem:[%s7003_s1 + $0x38] sm:$0xff] }
  0x13   :  { %v110_v9 = vld [vmem:[%s7002_s3 + $0xc0] sm:$0xff]  ;;  %v5865_v12 = vpack.c.bf16 %v114_v5, %v111_v4  ;;  %v115_v14 = vld [vmem:[%s7002_s3 + $0xe8] sm:$0xff]  ;;  %v215_v15 = vld [vmem:[%s7003_s1 + $0x30] sm:$0xff] }
  0x14   :  { %3474 = vmatmul.mubr.msk.f32.gmra.mrb[6].mxu0 %vm233_vm0, %v204_v27  ;;  %3849 = vmatmul.mubr.msk.f32.gmra.mrb[6].mxu1 %vm233_vm0, %v204_v27  ;;  %v117_v16 = vld [vmem:[%s7002_s3 + $0xf8] sm:$0xff]  ;;  %v120_v17 = vld [vmem:[%s7002_s3 + $0x110] sm:$0xff]  ;;  %v5889_v18 = vpack.c.bf16 %v113_v10, %v110_v9  ;;  %v119_v23 = vld [vmem:[%s7002_s3 + $0x108] sm:$0xff] }
  0x15   :  { %346 = vmatprep.mubr.f32.mxu0 %v7009_v3  ;;  %3851 = vmatprep.mubr.msk.f32.mxu1 %vm233_vm0, %v205_v28  ;;  %v116_v20 = vld [vmem:[%s7002_s3 + $0xf0] sm:$0xff]  ;;  %v118_v24 = vld [vmem:[%s7002_s3 + $0x100] sm:$0xff]  ;;  %v121_v25 = vld [vmem:[%s7002_s3 + $0x118] sm:$0xff] }
  0x16   :  { %v123_v26 = vld [vmem:[%s7002_s3 + $0x128] sm:$0xff]  ;;  %v126_v27 = vld [vmem:[%s7002_s3 + $0x140] sm:$0xff]  ;;  %v125_v33 = vld [vmem:[%s7002_s3 + $0x138] sm:$0xff] }
  0x17   :  { %v5929_v32 = vpack.c.bf16 %v126_v27, %v123_v26  ;;  %v124_v34 = vld [vmem:[%s7002_s3 + $0x130] sm:$0xff]  ;;  %v127_v35 = vld [vmem:[%s7002_s3 + $0x148] sm:$0xff]  ;;  %v129_v36 = vld [vmem:[%s7002_s3 + $0x158] sm:$0xff] }
  0x18   :  { %3475 = vmatmul.mubr.msk.f32.gmra.mrb[8].mxu0 %vm233_vm0, %v205_v28  ;;  %3852 = vmatmul.mubr.msk.f32.gmra.mrb[8].mxu1 %vm233_vm0, %v206_v30  ;;  %v5920_v28 = vpack.c.bf16 %v119_v23, %v116_v20  ;;  %v132_v37 = vld [vmem:[%s7002_s3 + $0x170] sm:$0xff]  ;;  %v5952_v41 = vpack.c.bf16 %v127_v35, %v124_v34  ;;  %v131_v45 = vld [vmem:[%s7002_s3 + $0x168] sm:$0xff]  ;;  %v130_v46 = vld [vmem:[%s7002_s3 + $0x160] sm:$0xff] }
  0x19   :  { %352 = vmatprep.mubr.f32.mxu0 %v7009_v3  ;;  %3854 = vmatprep.mubr.msk.f32.mxu1 %vm233_vm0, %v207_v13  ;;  %v112_v13 = vld [vmem:[%s7002_s3 + $0xd0] sm:$0xff]  ;;  %7043 = vst [vmem:[#allocation7_spill] sm:$0xff] %v5929_v32  ;;  %v5959_v44 = vpack.c.bf16 %v132_v37, %v129_v36  ;;  %v133_v47 = vld [vmem:[%s7002_s3 + $0x178] sm:$0xff]  ;;  %v3423_v51 = vld [vmem:[%s7002_s3 + $0x1a0] sm:$0xff] }
  0x1a   :  { %v5891_v19 = vpack.c.bf16 %v115_v14, %v112_v13  ;;  %7041 = vst [vmem:[#allocation5_spill] sm:$0xff] %v5920_v28  ;;  %7045 = vst [vmem:[#allocation9_spill] sm:$0xff] %v5952_v41  ;;  %v128_v43 = vld [vmem:[%s7002_s3 + $0x150] sm:$0xff]  ;;  %v5982_v54 = vpack.c.bf16 %v133_v47, %v130_v46  ;;  %v3419_v55 = vld [vmem:[%s7002_s3 + $0x180] sm:$0xff] }
  0x1b   :  { %7046 = vst [vmem:[#allocation10_spill] sm:$0xff] %v5959_v44  ;;  %v5980_v53 = vpack.c.bf16 %v131_v45, %v128_v43  ;;  %v3422_v57 = vld [vmem:[%s7002_s3 + $0x198] sm:$0xff]  ;;  %v3424_v61 = vld [vmem:[%s7002_s3 + $0x1a8] sm:$0xff]  ;;  %v3429_v0 = vld [vmem:[%s7002_s3 + $0x1d0] sm:$0xff] }
  0x1c   :  { %3476 = vmatmul.mubr.msk.f32.gmra.mrb[10].mxu0 %vm233_vm0, %v206_v30  ;;  %3855 = vmatmul.mubr.msk.f32.gmra.mrb[10].mxu1 %vm233_vm0, %v208_v21  ;;  %v5898_v21 = vpack.c.bf16 %v120_v17, %v117_v16  ;;  %v5922_v30 = vpack.c.bf16 %v121_v25, %v118_v24  ;;  %7048 = vst [vmem:[#allocation12_spill] sm:$0xff] %v5982_v54  ;;  %v3426_v62 = vld [vmem:[%s7002_s3 + $0x1b8] sm:$0xff]  ;;  %v6014_v1 = vld [vmem:[%s7004_s6] sm:$0xff]  ;;  %v3425_v4 = vld [vmem:[%s7002_s3 + $0x1b0] sm:$0xff] }
  0x1d   :  { %580 = vmatprep.mubr.f32.mxu1 %v7009_v3  ;;  %3861 = vmatprep.mubr.msk.f32.mxu0 %vm233_vm0, %v209_v31  ;;  %7047 = vst [vmem:[#allocation11_spill] sm:$0xff] %v5980_v53  ;;  %v3428_v9 = vld [vmem:[%s7002_s3 + $0x1c8] sm:$0xff]  ;;  %v3427_v10 = vld [vmem:[%s7002_s3 + $0x1c0] sm:$0xff]  ;;  %v3434_v23 = vld [vmem:[%s7002_s3 + $0x1f8] sm:$0xff] }
  0x1e   :  { %7040 = vst [vmem:[#allocation4_spill] sm:$0xff] %v5898_v21  ;;  %7042 = vst [vmem:[#allocation6_spill] sm:$0xff] %v5922_v30  ;;  %v3432_v13 = vld [vmem:[%s7002_s3 + $0x1e8] sm:$0xff]  ;;  %v3435_v14 = vld [vmem:[%s7002_s3 + $0x200] sm:$0xff] }
  0x1f   :  { %v3431_v16 = vld [vmem:[%s7002_s3 + $0x1e0] sm:$0xff]  ;;  %v6056_v20 = vpack.c.bf16 %v3435_v14, %v3432_v13  ;;  %v3433_v24 = vld [vmem:[%s7002_s3 + $0x1f0] sm:$0xff]  ;;  %v3436_v25 = vld [vmem:[%s7002_s3 + $0x208] sm:$0xff] }
  0x20   :  { %3487 = vmatmul.mubr.msk.f32.vlgmr.msra.gmra.mrb[12].mxu1 %vm233_vm0, %v209_v31  ;;  %3862 = vmatmul.mubr.msk.f32.vlgmr.msra.gmra.mrb[12].mxu0 %vm233_vm0, %v210_v38  ;;  %v122_v31 = vld [vmem:[%s7002_s3 + $0x120] sm:$0xff]  ;;  %v3438_v26 = vld [vmem:[%s7002_s3 + $0x218] sm:$0xff]  ;;  %v3441_v27 = vld [vmem:[%s7002_s3 + $0x230] sm:$0xff]  ;;  %v6084_v34 = vpack.c.bf16 %v3436_v25, %v3433_v24 }
  0x21   :  { %4452 = vmatpush1.bf16.msra.mxu0 %v5744_v39  ;;  %4483 = vmatpush3.bf16.msra.mxu1 %v5746_v40  ;;  %v6087_v35 = vpack.c.bf16 %v3441_v27, %v3438_v26  ;;  %v3440_v36 = vld [vmem:[%s7002_s3 + $0x228] sm:$0xff]  ;;  %v3439_v37 = vld [vmem:[%s7002_s3 + $0x220] sm:$0xff]  ;;  %v3442_v43 = vld [vmem:[%s7002_s3 + $0x238] sm:$0xff] }
  0x22   :  { %586 = vmatprep.mubr.f32.mxu1 %v7009_v3  ;;  %4454 = vmatprep.subr.bf16.mxu0 %v5751_v42  ;;  %v3444_v45 = vld [vmem:[%s7002_s3 + $0x248] sm:$0xff]  ;;  %v3447_v46 = vld [vmem:[%s7002_s3 + $0x260] sm:$0xff] }
  0x23   :  { %4484 = vmatprep.subr.bf16.mxu1 %v7011_v29  ;;  %3864 = vmatprep.mubr.msk.f32.mxu0 %vm233_vm0, %v211_v50  ;;  %v3452_v13 = vld [vmem:[%s7002_s3 + $0x288] sm:$0xff]  ;;  %v3451_v14 = vld [vmem:[%s7002_s3 + $0x280] sm:$0xff] }
  0x24   :  { %3488 = vmatmul.mubr.msk.f32.gmra.mrb[14].mxu1 %vm233_vm0, %v210_v38  ;;  %3865 = vmatmul.mubr.msk.f32.gmra.mrb[14].mxu0 %vm233_vm0, %v212_v58  ;;  %v5950_v38 = vpack.c.bf16 %v125_v33, %v122_v31  ;;  %v6078_v31 = vpack.c.bf16 %v3434_v23, %v3431_v16  ;;  %v3437_v33 = vld [vmem:[%s7002_s3 + $0x210] sm:$0xff]  ;;  %v3454_v16 = vld [vmem:[%s7002_s3 + $0x298] sm:$0xff]  ;;  %v3456_v23 = vld [vmem:[%s7002_s3 + $0x2a8] sm:$0xff] }
  0x25   :  { %4456 = vmatpush1.bf16.msra.mxu0 %v5772_v48  ;;  %4486 = vmatpush3.bf16.msra.mxu1 %v5774_v49  ;;  %v6106_v47 = vpack.c.bf16 %v3440_v36, %v3437_v33  ;;  %v3459_v24 = vld [vmem:[%s7002_s3 + $0x2c0] sm:$0xff]  ;;  %v6168_v27 = vpack.c.bf16 %v3454_v16, %v3451_v14  ;;  %v3458_v36 = vld [vmem:[%s7002_s3 + $0x2b8] sm:$0xff]  ;;  %v6223_v16 = vld [vmem:[%s7004_s6 + $0x8] sm:$0xff] }
  0x26   :  { %592 = vmatprep.mubr.f32.mxu1 %v7009_v3  ;;  %4458 = vmatprep.subr.bf16.mxu0 %v5784_v52  ;;  %7044 = vst [vmem:[#allocation8_spill] sm:$0xff] %v5950_v38  ;;  %v3455_v26 = vld [vmem:[%s7002_s3 + $0x2a0] sm:$0xff]  ;;  %v6171_v33 = vpack.c.bf16 %v3459_v24, %v3456_v23  ;;  %v218_v23 = vlaneseq }
  0x27   :  { %4487 = vmatprep.subr.bf16.mxu1 %v7011_v29  ;;  %3867 = vmatprep.mubr.msk.f32.mxu0 %vm233_vm0, %v213_v2 }
  0x28   :  { %3489 = vmatmul.mubr.msk.f32.gmra.mrb[16].mxu1 %vm233_vm0, %v211_v50  ;;  %3868 = vmatmul.mubr.msk.f32.gmra.mrb[16].mxu0 %vm233_vm0, %v214_v6  ;;  %v3420_v50 = vld [vmem:[%s7002_s3 + $0x188] sm:$0xff]  ;;  %v6265_v24 = vshrl.u32 %v218_v23, 7 }
  0x29   :  { %4460 = vmatpush1.bf16.msra.mxu0 %v5810_v59  ;;  %4489 = vmatpush3.bf16.msra.mxu1 %v5812_v60  ;;  %v5989_v56 = vpack.c.bf16 %v3423_v51, %v3420_v50  ;;  %v3443_v50 = vld [vmem:[%s7002_s3 + $0x240] sm:$0xff]  ;;  %v6112_v51 = vpack.c.bf16 %v3442_v43, %v3439_v37  ;;  %v3457_v37 = vld [vmem:[%s7002_s3 + $0x2b0] sm:$0xff]  ;;  %v3460_v43 = vld [vmem:[%s7002_s3 + $0x2c8] sm:$0xff] }
  0x2a   :  { %598 = vmatprep.mubr.f32.mxu1 %v7009_v3  ;;  %4462 = vmatprep.subr.bf16.mxu0 %v5822_v63 }
  0x2b   :  { %4490 = vmatprep.subr.bf16.mxu1 %v7011_v29  ;;  %3870 = vmatprep.mubr.msk.f32.mxu0 %vm233_vm0, %v215_v15  ;;  %7049 = vst [vmem:[#allocation13_spill] sm:$0xff] %v5989_v56 }
  0x2c   :  { %3490 = vmatmul.mubr.msk.f32.gmra.mrb[18].mxu1 %vm233_vm0, %v212_v58  ;;  %3871 = vmatmul.mubr.msk.f32.gmra.mrb[18].mxu0 %vm233_vm0, %v5861_v11  ;;  %v3421_v58 = vld [vmem:[%s7002_s3 + $0x190] sm:$0xff] }
  0x2d   :  { %4464 = vmatpush1.bf16.msra.mxu0 %v5848_v7  ;;  %4492 = vmatpush3.bf16.msra.mxu1 %v5850_v8  ;;  %v6021_v5 = vpack.c.bf16 %v3424_v61, %v3421_v58  ;;  %v3445_v58 = vld [vmem:[%s7002_s3 + $0x250] sm:$0xff]  ;;  %v3448_v61 = vld [vmem:[%s7002_s3 + $0x268] sm:$0xff] }
  0x2e   :  { %604 = vmatprep.mubr.f32.mxu1 %v7009_v3  ;;  %4466 = vmatprep.subr.bf16.mxu0 %v5865_v12 }
  0x2f   :  { %4493 = vmatprep.subr.bf16.mxu1 %v7011_v29  ;;  %800 = vmatprep.mubr.f32.mxu0 %v7009_v3 }
  0x30   :  { %3491 = vmatmul.mubr.msk.f32.gmra.mrb[20].mxu1 %vm233_vm0, %v213_v2  ;;  %v6016_v2 = vpack.c.bf16 %v3422_v57, %v3419_v55  ;;  %v6115_v55 = vpack.c.bf16 %v3447_v46, %v3444_v45  ;;  %v3446_v57 = vld [vmem:[%s7002_s3 + $0x258] sm:$0xff]  ;;  %v3465_v46 = vld [vmem:[%s7002_s3 + $0x2f0] sm:$0xff] }
  0x31   :  { %4468 = vmatpush1.bf16.msra.mxu0 %v5889_v18  ;;  %4495 = vmatpush3.bf16.msra.mxu1 %v5891_v19  ;;  %v3462_v45 = vld [vmem:[%s7002_s3 + $0x2d8] sm:$0xff] }
  0x32   :  { %610 = vmatprep.mubr.f32.mxu1 %v7009_v3  ;;  %4470 = vmatprep.subr.bf16.mxu0 %v5898_v21 }
  0x33   :  { %4496 = vmatprep.subr.bf16.mxu1 %v7011_v29 }
  0x34   :  { %3492 = vmatmul.mubr.msk.f32.gmra.mrb[22].mxu1 %vm233_vm0, %v214_v6  ;;  %v6026_v6 = vpack.c.bf16 %v3429_v0, %v3426_v62  ;;  %v3450_v62 = vld [vmem:[%s7002_s3 + $0x278] sm:$0xff]  ;;  %v3453_v0 = vld [vmem:[%s7002_s3 + $0x290] sm:$0xff] }
  0x35   :  { %4472 = vmatpush1.bf16.msra.mxu0 %v5920_v28  ;;  %4498 = vmatpush3.bf16.msra.mxu1 %v5922_v30 }
  0x36   :  { %616 = vmatprep.mubr.f32.mxu1 %v7009_v3  ;;  %4474 = vmatprep.subr.bf16.mxu0 %v5929_v32 }
  0x37   :  { %4499 = vmatprep.subr.bf16.mxu1 %v7011_v29 }
  0x38   :  { %3493 = vmatmul.mubr.msk.f32.gmra.mrb[24].mxu1 %vm233_vm0, %v215_v15  ;;  %v6047_v15 = vpack.c.bf16 %v3428_v9, %v3425_v4  ;;  %v6134_v4 = vpack.c.bf16 %v3446_v57, %v3443_v50  ;;  %v3449_v9 = vld [vmem:[%s7002_s3 + $0x270] sm:$0xff]  ;;  %v6190_v50 = vpack.c.bf16 %v3458_v36, %v3455_v26 }
  0x39   :  { %4476 = vmatpush1.bf16.msra.mxu0 %v5950_v38  ;;  %4501 = vmatpush3.bf16.msra.mxu1 %v5952_v41  ;;  %v6162_v25 = vpack.c.bf16 %v3452_v13, %v3449_v9  ;;  %v3461_v57 = vld [vmem:[%s7002_s3 + $0x2d0] sm:$0xff]  ;;  %v3466_v9 = vld [vmem:[%s7002_s3 + $0x2f8] sm:$0xff] }
  0x3a   :  { %622 = vmatprep.mubr.f32.mxu1 %v7009_v3  ;;  %4478 = vmatprep.subr.bf16.mxu0 %v5959_v44 }
  0x3b   :  { %4502 = vmatprep.subr.bf16.mxu1 %v7011_v29 }
  0x3c   :  { %3494 = vmatmul.mubr.msk.f32.gmra.mrb[26].mxu1 %vm233_vm0, %v5861_v11  ;;  %v3430_v11 = vld [vmem:[%s7002_s3 + $0x1d8] sm:$0xff] }
  0x3d   :  { %4480 = vmatpush1.bf16.msra.mxu0 %v5980_v53  ;;  %4504 = vmatpush3.bf16.msra.mxu1 %v5982_v54  ;;  %v6053_v17 = vpack.c.bf16 %v3430_v11, %v3427_v10  ;;  %v6140_v10 = vpack.c.bf16 %v3448_v61, %v3445_v58  ;;  %v6143_v11 = vpack.c.bf16 %v3453_v0, %v3450_v62  ;;  %v3464_v62 = vld [vmem:[%s7002_s3 + $0x2e8] sm:$0xff]  ;;  %v3463_v0 = vld [vmem:[%s7002_s3 + $0x2e0] sm:$0xff] }
  0x3e   :  { %3905 = vmatprep.mubr.msk.f32.mxu1 %vm5578_vm1, %v7009_v3  ;;  %4506 = vmatprep.subr.bf16.mxu1 %v5989_v56  ;;  %v6196_v58 = vpack.c.bf16 %v3460_v43, %v3457_v37  ;;  %v6199_v61 = vpack.c.bf16 %v3465_v46, %v3462_v45  ;;  %v6212_v13 = vpack.c.bf16 %v3464_v62, %v3461_v57  ;;  %v228_v37 = vsub.s32 2, %v6265_v24  ;;  %v183_v43 = vld [vmem:[%s7005_s4] sm:$0x7] }
  0x3f   :  { %4537 = vmatprep.subr.bf16.mxu0 %v7011_v29  ;;  %v6215_v14 = vpack.c.bf16 %v3466_v9, %v3463_v0 }
  0x40   :  { %801 = vmatmul.mubr.f32.vlgmr.msra.gmra.mrb[0].mxu0 %v6014_v1  ;;  %3906 = vmatmul.mubr.f32.vlgmr.msra.gmra.mrb[28].mxu1 %v6014_v1  ;;  %v229_v57 = vrot.slane %v183_v43, %v228_v37 }
  0x41   :  { %4508 = vmatpush1.bf16.msra.mxu1 %v6016_v2  ;;  %4539 = vmatpush3.bf16.msra.mxu0 %v6021_v5 }
  0x42   :  { %4510 = vmatprep.subr.bf16.mxu1 %v6026_v6  ;;  %4540 = vmatprep.subr.bf16.mxu0 %v7011_v29 }
  0x43   :  { %963 = vmatprep.mubr.f32.mxu1 %v7009_v3  ;;  %3940 = vmatprep.mubr.msk.f32.mxu0 %vm5578_vm1, %v7009_v3 }
  0x45   :  { %4512 = vmatpush1.bf16.msra.mxu1 %v6047_v15  ;;  %4542 = vmatpush3.bf16.msra.mxu0 %v6053_v17 }
  0x46   :  { %4514 = vmatprep.subr.bf16.mxu1 %v6056_v20  ;;  %4543 = vmatprep.subr.bf16.mxu0 %v7011_v29 }
  0x49   :  { %4516 = vmatpush1.bf16.msra.mxu1 %v6078_v31  ;;  %4545 = vmatpush3.bf16.msra.mxu0 %v6084_v34 }
  0x4a   :  { %4518 = vmatprep.subr.bf16.mxu1 %v6087_v35  ;;  %4546 = vmatprep.subr.bf16.mxu0 %v7011_v29 }
  0x4d   :  { %4520 = vmatpush1.bf16.msra.mxu1 %v6106_v47  ;;  %4548 = vmatpush3.bf16.msra.mxu0 %v6112_v51 }
  0x4e   :  { %4522 = vmatprep.subr.bf16.mxu1 %v6115_v55  ;;  %4549 = vmatprep.subr.bf16.mxu0 %v7011_v29 }
  0x51   :  { %4524 = vmatpush1.bf16.msra.mxu1 %v6134_v4  ;;  %4551 = vmatpush3.bf16.msra.mxu0 %v6140_v10 }
  0x52   :  { %4526 = vmatprep.subr.bf16.mxu1 %v6143_v11  ;;  %4552 = vmatprep.subr.bf16.mxu0 %v7011_v29 }
  0x55   :  { %4528 = vmatpush1.bf16.msra.mxu1 %v6162_v25  ;;  %4554 = vmatpush3.bf16.msra.mxu0 %v6168_v27 }
  0x56   :  { %4530 = vmatprep.subr.bf16.mxu1 %v6171_v33  ;;  %4555 = vmatprep.subr.bf16.mxu0 %v7011_v29 }
  0x59   :  { %4532 = vmatpush1.bf16.msra.mxu1 %v6190_v50  ;;  %4557 = vmatpush3.bf16.msra.mxu0 %v6196_v58 }
  0x5a   :  { %4534 = vmatprep.subr.bf16.mxu1 %v6199_v61  ;;  %4558 = vmatprep.subr.bf16.mxu0 %v7011_v29 }
  0x5d   :  { %4536 = vmatpush1.bf16.msra.mxu1 %v6212_v13  ;;  %4560 = vmatpush3.bf16.msra.mxu0 %v6215_v14 }
  0x5e   :  { %4562 = vmatprep.subr.bf16.mxu0 %v5676_v22  ;;  %4593 = vmatprep.subr.bf16.mxu1 %v7011_v29 }
  0x60   :  { %964 = vmatmul.mubr.f32.vlgmr.msra.gmra.mrb[26].mxu1 %v6223_v16  ;;  %3941 = vmatmul.mubr.f32.vlgmr.msra.gmra.mrb[20].mxu0 %v6223_v16 }
  0x61   :  { %4564 = vmatpush1.bf16.msra.mxu0 %v5744_v39  ;;  %4595 = vmatpush3.bf16.msra.mxu1 %v5746_v40 }
  0x62   :  { %4566 = vmatprep.subr.bf16.mxu0 %v5751_v42  ;;  %4596 = vmatprep.subr.bf16.mxu1 %v7011_v29 }
  0x63   :  { %1129 = vmatprep.mubr.f32.mxu0 %v7009_v3  ;;  %3975 = vmatprep.mubr.msk.f32.mxu1 %vm5578_vm1, %v7009_v3 }
  0x65   :  { %4568 = vmatpush1.bf16.msra.mxu0 %v5772_v48  ;;  %4598 = vmatpush3.bf16.msra.mxu1 %v5774_v49 }
  0x66   :  { %4570 = vmatprep.subr.bf16.mxu0 %v5784_v52  ;;  %4599 = vmatprep.subr.bf16.mxu1 %v7011_v29 }
  0x69   :  { %4572 = vmatpush1.bf16.msra.mxu0 %v5810_v59  ;;  %4601 = vmatpush3.bf16.msra.mxu1 %v5812_v60 }
  0x6a   :  { %4574 = vmatprep.subr.bf16.mxu0 %v5822_v63  ;;  %4602 = vmatprep.subr.bf16.mxu1 %v7011_v29 }
  0x6d   :  { %4576 = vmatpush1.bf16.msra.mxu0 %v5848_v7  ;;  %4604 = vmatpush3.bf16.msra.mxu1 %v5850_v8 }
  0x6e   :  { %4578 = vmatprep.subr.bf16.mxu0 %v5865_v12  ;;  %4605 = vmatprep.subr.bf16.mxu1 %v7011_v29 }
  0x71   :  { %4580 = vmatpush1.bf16.msra.mxu0 %v5889_v18  ;;  %4607 = vmatpush3.bf16.msra.mxu1 %v5891_v19 }
  0x72   :  { %4582 = vmatprep.subr.bf16.mxu0 %v5898_v21  ;;  %4608 = vmatprep.subr.bf16.mxu1 %v7011_v29 }
  0x75   :  { %4584 = vmatpush1.bf16.msra.mxu0 %v5920_v28  ;;  %4610 = vmatpush3.bf16.msra.mxu1 %v5922_v30  ;;  %v6332_v30 = vld [vmem:[%s7006_s5] ss:$0 sm:$0xff] }
  0x76   :  { %4586 = vmatprep.subr.bf16.mxu0 %v5929_v32  ;;  %4611 = vmatprep.subr.bf16.mxu1 %v7011_v29 }
  0x79   :  { %4588 = vmatpush1.bf16.msra.mxu0 %v5950_v38  ;;  %4613 = vmatpush3.bf16.msra.mxu1 %v5952_v41 }
  0x7a   :  { %4590 = vmatprep.subr.bf16.mxu0 %v5959_v44  ;;  %4614 = vmatprep.subr.bf16.mxu1 %v7011_v29 }
  0x7d   :  { %4592 = vmatpush1.bf16.msra.mxu0 %v5980_v53  ;;  %4616 = vmatpush3.bf16.msra.mxu1 %v5982_v54 }
  0x7e   :  { %4618 = vmatprep.subr.bf16.mxu1 %v5989_v56  ;;  %4649 = vmatprep.subr.bf16.mxu0 %v7011_v29 }
  0xdb   :  { %v6267_v26 = vpop.f32.mrb[0].mxu1 }
  0xdc   :  { %7050 = vst [vmem:[#allocation14_spill] sm:$0xff] %v6267_v26  ;;  %v6269_v36 = vpop.f32.mrb[1].mxu1 }
  0xdd   :  { %7051 = vst [vmem:[#allocation15_spill] sm:$0xff] %v6269_v36 }
  0xdf   :  { %v6275_v45 = vpop.f32.mrb[2].mxu1 }
  0xe0   :  { %7052 = vst [vmem:[#allocation16_spill] sm:$0xff] %v6275_v45  ;;  %v6277_v46 = vpop.f32.mrb[3].mxu1 }
  0xe1   :  { %7053 = vst [vmem:[#allocation17_spill] sm:$0xff] %v6277_v46  ;;  %v3467_v46 = vld [vmem:[%s7005_s4 + $0x3] sm:$0x7] }
  0xe2   :  { %v6294_v44 = vrot.slane %v3467_v46, %v228_v37 }
  0xe3   :  { %v3847_v62 = vpop.f32.mrb[4].mxu1 }
  0xe4   :  { %v6279_v0 = vadd.f32 %v3847_v62, %v229_v57  ;;  %v437_v9 = vpop.f32.mrb[5].mxu1 }
  0xe6   :  { %7054 = vst [vmem:[#allocation18_spill] sm:$0xff] %v6279_v0 }
  0xe7   :  { %v3850_v23 = vpop.f32.mrb[6].mxu1 }
  0xe8   :  { %v6281_v3 = vadd.f32 %v3850_v23, %v229_v57  ;;  %v447_v29 = vpop.f32.mrb[7].mxu1 }
  0xe9   :  { %v6283_v36 = vadd.f32 %v447_v29, %v229_v57 }
  0xea   :  { %7055 = vst [vmem:[#allocation19_spill] sm:$0xff] %v6281_v3 }
  0xeb   :  { %7056 = vst [vmem:[#allocation20_spill] sm:$0xff] %v6283_v36  ;;  %v3853_v26 = vpop.f32.mrb[8].mxu1 }
  0xec   :  { %v6285_v56 = vadd.f32 %v3853_v26, %v229_v57  ;;  %v457_v54 = vpop.f32.mrb[9].mxu1 }
  0xed   :  { %v6287_v53 = vadd.f32 %v457_v54, %v229_v57 }
  0xee   :  { %7057 = vst [vmem:[#allocation21_spill] sm:$0xff] %v6285_v56 }
  0xef   :  { %7058 = vst [vmem:[#allocation22_spill] sm:$0xff] %v6287_v53  ;;  %v3856_v45 = vpop.f32.mrb[10].mxu1 }
  0xf0   :  { %v6292_v62 = vadd.f32 %v3856_v45, %v229_v57  ;;  %v467_v0 = vpop.f32.mrb[11].mxu1 }
  0xf1   :  { %v6296_v23 = vadd.f32 %v467_v0, %v229_v57 }
  0xf2   :  { %7059 = vst [vmem:[#allocation23_spill] sm:$0xff] %v6292_v62 }
  0xf3   :  { %7060 = vst [vmem:[#allocation24_spill] sm:$0xff] %v6296_v23  ;;  %v3863_v29 = vpop.f32.mrb[12].mxu0  ;;  %v224_v23 = vsub.s32 1, %v6265_v24 }
  0xf4   :  { %v6299_v3 = vadd.f32 %v3863_v29, %v6294_v44  ;;  %v695_v26 = vpop.f32.mrb[13].mxu0 }
  0xf5   :  { %v6302_v54 = vadd.f32 %v695_v26, %v6294_v44 }
  0xf6   :  { %7061 = vst [vmem:[#allocation25_spill] sm:$0xff] %v6299_v3 }
  0xf7   :  { %7062 = vst [vmem:[#allocation26_spill] sm:$0xff] %v6302_v54  ;;  %v3866_v56 = vpop.f32.mrb[14].mxu0 }
  0xf8   :  { %v6305_v53 = vadd.f32 %v3866_v56, %v6294_v44  ;;  %v705_v36 = vpop.f32.mrb[15].mxu0  ;;  %v220_v56 = vsub.s32 0, %v6265_v24 }
  0xf9   :  { %v6308_v45 = vadd.f32 %v705_v36, %v6294_v44 }
  0xfa   :  { %7063 = vst [vmem:[#allocation27_spill] sm:$0xff] %v6305_v53  ;;  %v6323_v36 = vrot.slane %v183_v43, %v220_v56 }
  0xfb   :  { %7064 = vst [vmem:[#allocation28_spill] sm:$0xff] %v6308_v45  ;;  %v3869_v37 = vpop.f32.mrb[16].mxu0 }
  0xfc   :  { %v6311_v0 = vadd.f32 %v3869_v37, %v6294_v44  ;;  %v715_v62 = vpop.f32.mrb[17].mxu0  ;;  %7068 = vst [vmem:[#allocation32_spill] sm:$0xff] %v6323_v36 }
  0xfd   :  { %v6314_v29 = vadd.f32 %v715_v62, %v6294_v44  ;;  %v6326_v62 = vrot.slane %v183_v43, %v224_v23 }
  0xfe   :  { %7065 = vst [vmem:[#allocation29_spill] sm:$0xff] %v6311_v0 }
  0xff   :  { %7066 = vst [vmem:[#allocation30_spill] sm:$0xff] %v6314_v29  ;;  %v6316_v3 = vpop.f32.mrb[18].mxu0  ;;  %7069 = vst [vmem:[#allocation33_spill] sm:$0xff] %v6326_v62 }
 0x100   :  { %v725_v26 = vpop.f32.mrb[19].mxu0 }
 0x101   :  { %v6319_v54 = vadd.f32 %v725_v26, %v6294_v44 }
 0x103   :  { %7067 = vst [vmem:[#allocation31_spill] sm:$0xff] %v6319_v54 }
 0x113   :  { %v802_v45 = vpop.f32.mrb[0].mxu0  ;;  %v873_v53 = vpop.f32.mrb[28].mxu1 }
 0x114   :  { %v5347_v37 = vadd.f32 %v802_v45, %v6323_v36  ;;  %v804_v0 = vpop.f32.mrb[1].mxu0  ;;  %v3907_v41 = vpop.f32.mrb[29].mxu1  ;;  %v438_v36 = vadd.f32 %v437_v9, %v229_v57 }
 0x115   :  { %v5348_v38 = vadd.f32 %v804_v0, %v6326_v62  ;;  %v891_v41 = vadd.f32 %v6332_v30, %v873_v53  ;;  %v6335_v0 = vrot.slane %v3467_v46, %v220_v56 }
 0x116   :  { %v3503_v29 = vmul.f32 -1.442695, %v5347_v37 }
 0x117   :  { %v3504_v26 = vmul.f32 -1.442695, %v5348_v38 }
 0x118   :  { %5414 = vpow2.f32 %v3503_v29 }
 0x119   :  { %5416 = vpow2.f32 %v3504_v26  ;;  %v6337_v26 = vrot.slane %v3467_v46, %v224_v23 }
 0x122   :  { %v5415_v54 = vpop.eup %5414 }
 0x123   :  { %v881_v32 = vadd.f32 1.0, %v5415_v54  ;;  %v5417_v24 = vpop.eup %5416 }
 0x124   :  { %v888_v45 = vadd.f32 1.0, %v5417_v24 }
 0x125   :  { %5418 = vrcp.f32 %v881_v32 }
 0x126   :  { %5420 = vrcp.f32 %v888_v45 }
 0x12f   :  { %v5419_v43 = vpop.eup %5418 }
 0x130   :  { %v892_v37 = vmul.f32 %v5419_v43, %v891_v41  ;;  %v5421_v53 = vpop.eup %5420 }
 0x131   :  { %v895_v9 = vsub.f32 1.0, %v5421_v53 }
 0x132   :  { %v893_v38 = vadd.f32 %v892_v37, %v438_v36  ;;  %v897_v36 = vmul.f32 %v5421_v53, %v6014_v1 }
 0x133   :  { %v965_v29 = vpop.f32.mrb[26].mxu1  ;;  %v1036_v32 = vpop.f32.mrb[20].mxu0 }
 0x134   :  { %5422 = vtanh.f32 %v893_v38  ;;  %v5381_v54 = vadd.f32 %v965_v29, %v6335_v0  ;;  %v967_v62 = vpop.f32.mrb[27].mxu1  ;;  %v3942_v28 = vpop.f32.mrb[21].mxu0  ;;  %v731_v29 = vadd.f32 %v6316_v3, %v6294_v44 }
 0x135   :  { %v5382_v24 = vadd.f32 %v967_v62, %v6337_v26  ;;  %v7071_v28 = vmov 0.0   ;;  %v6364_v62 = vld [vmem:[%s7006_s5 + $0x1] ss:$0 sm:$0xff] }
 0x136   :  { %v3505_v21 = vmul.f32 -1.442695, %v5381_v54  ;;  %v1054_v37 = vadd.f32 %v6364_v62, %v1036_v32 }
 0x137   :  { %v3506_v57 = vmul.f32 -1.442695, %v5382_v24 }
 0x138   :  { %5424 = vpow2.f32 %v3505_v21  ;;  %v7070_v21 = vmov 0.0|0.0  }
 0x139   :  { %5426 = vpow2.f32 %v3506_v57 }
 0x13e   :  { %v5423_v45 = vpop.eup %5422 }
 0x13f   :  { %v896_v56 = vmul.f32 %v5423_v45, %v895_v9  ;;  %v7073_v45 = vld [vmem:[#allocation5_spill] sm:$0xff] }
 0x141   :  { %v6342_v46 = vadd.f32 %v897_v36, %v896_v56  ;;  %v7074_v56 = vld [vmem:[#allocation6_spill] sm:$0xff]  ;;  %v7075_v36 = vld [vmem:[#allocation7_spill] sm:$0xff] }
 0x142   :  { %v5425_v23 = vpop.eup %5424 }
 0x143   :  { %v1044_v41 = vadd.f32 1.0, %v5425_v23  ;;  %1062 = vst [vmem:[%s7007_s7] sm:$0xff] %v6342_v46  ;;  %1130 = vmatmul.mubr.f32.vlgmr.msra.gmra.mrb[2].mxu0 %v6342_v46  ;;  %3976 = vmatmul.mubr.f32.vlgmr.msra.gmra.mrb[30].mxu1 %v6342_v46  ;;  %v5427_v1 = vpop.eup %5426  ;;  %v7076_v23 = vld [vmem:[#allocation8_spill] sm:$0xff] }
 0x144   :  { %4620 = vmatpush1.bf16.msra.mxu1 %v6016_v2  ;;  %4651 = vmatpush3.bf16.msra.mxu0 %v6021_v5  ;;  %v1051_v43 = vadd.f32 1.0, %v5427_v1  ;;  %v7078_v1 = vld [vmem:[#allocation10_spill] sm:$0xff] }
 0x145   :  { %5428 = vrcp.f32 %v1044_v41  ;;  %4622 = vmatprep.subr.bf16.mxu1 %v6026_v6  ;;  %4652 = vmatprep.subr.bf16.mxu0 %v7070_v21  ;;  %v7077_v41 = vld [vmem:[#allocation9_spill] sm:$0xff] }
 0x146   :  { %1292 = vmatprep.mubr.f32.mxu1 %v7071_v28  ;;  %4010 = vmatprep.mubr.msk.f32.mxu0 %vm5578_vm1, %v7071_v28  ;;  %5430 = vrcp.f32 %v1051_v43  ;;  %v7079_v43 = vld [vmem:[#allocation11_spill] sm:$0xff] }
 0x148   :  { %4624 = vmatpush1.bf16.msra.mxu1 %v6047_v15  ;;  %4654 = vmatpush3.bf16.msra.mxu0 %v6053_v17 }
 0x149   :  { %4626 = vmatprep.subr.bf16.mxu1 %v6056_v20  ;;  %4655 = vmatprep.subr.bf16.mxu0 %v7070_v21 }
 0x14c   :  { %4628 = vmatpush1.bf16.msra.mxu1 %v6078_v31  ;;  %4657 = vmatpush3.bf16.msra.mxu0 %v6084_v34 }
 0x14d   :  { %4630 = vmatprep.subr.bf16.mxu1 %v6087_v35  ;;  %4658 = vmatprep.subr.bf16.mxu0 %v7070_v21 }
 0x14f   :  { %v5429_v38 = vpop.eup %5428 }
 0x150   :  { %v1055_v54 = vmul.f32 %v5429_v38, %v1054_v37  ;;  %4632 = vmatpush1.bf16.msra.mxu1 %v6106_v47  ;;  %4660 = vmatpush3.bf16.msra.mxu0 %v6112_v51  ;;  %v5431_v3 = vpop.eup %5430  ;;  %v7080_v37 = vld [vmem:[#allocation12_spill] sm:$0xff]  ;;  %v7081_v38 = vld [vmem:[#allocation13_spill] sm:$0xff] }
 0x151   :  { %4634 = vmatprep.subr.bf16.mxu1 %v6115_v55  ;;  %4661 = vmatprep.subr.bf16.mxu0 %v7070_v21  ;;  %v1058_v44 = vsub.f32 1.0, %v5431_v3  ;;  %v1060_v57 = vmul.f32 %v5431_v3, %v6223_v16  ;;  %v7072_v16 = vld [vmem:[#allocation4_spill] sm:$0xff] }
 0x152   :  { %v1056_v24 = vadd.f32 %v1055_v54, %v731_v29 }
 0x154   :  { %5432 = vtanh.f32 %v1056_v24  ;;  %4636 = vmatpush1.bf16.msra.mxu1 %v6134_v4  ;;  %4663 = vmatpush3.bf16.msra.mxu0 %v6140_v10  ;;  %v7082_v24 = vld [vmem:[#allocation32_spill] sm:$0xff] }
 0x155   :  { %4638 = vmatprep.subr.bf16.mxu1 %v6143_v11  ;;  %4664 = vmatprep.subr.bf16.mxu0 %v7070_v21 }
 0x158   :  { %4640 = vmatpush1.bf16.msra.mxu1 %v6162_v25  ;;  %4666 = vmatpush3.bf16.msra.mxu0 %v6168_v27 }
 0x159   :  { %4642 = vmatprep.subr.bf16.mxu1 %v6171_v33  ;;  %4667 = vmatprep.subr.bf16.mxu0 %v7070_v21 }
 0x15c   :  { %4644 = vmatpush1.bf16.msra.mxu1 %v6190_v50  ;;  %4669 = vmatpush3.bf16.msra.mxu0 %v6196_v58 }
 0x15d   :  { %4646 = vmatprep.subr.bf16.mxu1 %v6199_v61  ;;  %4670 = vmatprep.subr.bf16.mxu0 %v7070_v21 }
 0x15e   :  { %v5433_v32 = vpop.eup %5432 }
 0x15f   :  { %v1059_v53 = vmul.f32 %v5433_v32, %v1058_v44 }
 0x160   :  { %4648 = vmatpush1.bf16.msra.mxu1 %v6212_v13  ;;  %4672 = vmatpush3.bf16.msra.mxu0 %v6215_v14 }
 0x161   :  { %v6392_v9 = vadd.f32 %v1060_v57, %v1059_v53  ;;  %4674 = vmatprep.subr.bf16.mxu0 %v5676_v22  ;;  %4705 = vmatprep.subr.bf16.mxu1 %v7070_v21  ;;  %v7083_v57 = vld [vmem:[#allocation33_spill] sm:$0xff] }
 0x163   :  { %3507 = vst [vmem:[%s7008_s8 + $0x38] sm:$0xff] %v6392_v9  ;;  %1293 = vmatmul.mubr.f32.vlgmr.msra.gmra.mrb[24].mxu1 %v6392_v9  ;;  %4011 = vmatmul.mubr.f32.vlgmr.msra.gmra.mrb[22].mxu0 %v6392_v9 }
 0x164   :  { %4676 = vmatpush1.bf16.msra.mxu0 %v5744_v39  ;;  %4707 = vmatpush3.bf16.msra.mxu1 %v5746_v40 }
 0x165   :  { %4678 = vmatprep.subr.bf16.mxu0 %v5751_v42  ;;  %4708 = vmatprep.subr.bf16.mxu1 %v7070_v21 }
 0x166   :  { %1459 = vmatprep.mubr.f32.mxu0 %v7071_v28  ;;  %4045 = vmatprep.mubr.msk.f32.mxu1 %vm5578_vm1, %v7071_v28 }
 0x168   :  { %4680 = vmatpush1.bf16.msra.mxu0 %v5772_v48  ;;  %4710 = vmatpush3.bf16.msra.mxu1 %v5774_v49 }
 0x169   :  { %4682 = vmatprep.subr.bf16.mxu0 %v5784_v52  ;;  %4711 = vmatprep.subr.bf16.mxu1 %v7070_v21 }
 0x16c   :  { %4684 = vmatpush1.bf16.msra.mxu0 %v5810_v59  ;;  %4713 = vmatpush3.bf16.msra.mxu1 %v5812_v60 }
 0x16d   :  { %4686 = vmatprep.subr.bf16.mxu0 %v5822_v63  ;;  %4714 = vmatprep.subr.bf16.mxu1 %v7070_v21 }
 0x170   :  { %4688 = vmatpush1.bf16.msra.mxu0 %v5848_v7  ;;  %4716 = vmatpush3.bf16.msra.mxu1 %v5850_v8 }
 0x171   :  { %4690 = vmatprep.subr.bf16.mxu0 %v5865_v12  ;;  %4717 = vmatprep.subr.bf16.mxu1 %v7070_v21 }
 0x174   :  { %4692 = vmatpush1.bf16.msra.mxu0 %v5889_v18  ;;  %4719 = vmatpush3.bf16.msra.mxu1 %v5891_v19 }
 0x175   :  { %4694 = vmatprep.subr.bf16.mxu0 %v7072_v16  ;;  %4720 = vmatprep.subr.bf16.mxu1 %v7070_v21  ;;  %v7084_v16 = vld [vmem:[#allocation18_spill] sm:$0xff] }
 0x178   :  { %4696 = vmatpush1.bf16.msra.mxu0 %v7073_v45  ;;  %4722 = vmatpush3.bf16.msra.mxu1 %v7074_v56 }
 0x179   :  { %4698 = vmatprep.subr.bf16.mxu0 %v7075_v36  ;;  %4723 = vmatprep.subr.bf16.mxu1 %v7070_v21 }
 0x17c   :  { %4700 = vmatpush1.bf16.msra.mxu0 %v7076_v23  ;;  %4725 = vmatpush3.bf16.msra.mxu1 %v7077_v41 }
 0x17d   :  { %4702 = vmatprep.subr.bf16.mxu0 %v7078_v1  ;;  %4726 = vmatprep.subr.bf16.mxu1 %v7070_v21 }
 0x180   :  { %4704 = vmatpush1.bf16.msra.mxu0 %v7079_v43  ;;  %4728 = vmatpush3.bf16.msra.mxu1 %v7080_v37 }
 0x181   :  { %4730 = vmatprep.subr.bf16.mxu1 %v7081_v38  ;;  %4761 = vmatprep.subr.bf16.mxu0 %v7070_v21 }
 0x216   :  { %v1131_v29 = vpop.f32.mrb[2].mxu0  ;;  %v1202_v54 = vpop.f32.mrb[30].mxu1 }
 0x217   :  { %v5349_v3 = vadd.f32 %v1131_v29, %v7082_v24  ;;  %v1133_v44 = vpop.f32.mrb[3].mxu0  ;;  %v3977_v32 = vpop.f32.mrb[31].mxu1  ;;  %v1220_v38 = vadd.f32 %v6332_v30, %v1202_v54 }
 0x218   :  { %v5350_v41 = vadd.f32 %v1133_v44, %v7083_v57 }
 0x219   :  { %v3508_v53 = vmul.f32 -1.442695, %v5349_v3 }
 0x21a   :  { %v3509_v1 = vmul.f32 -1.442695, %v5350_v41 }
 0x21b   :  { %5434 = vpow2.f32 %v3508_v53 }
 0x21c   :  { %5436 = vpow2.f32 %v3509_v1 }
 0x225   :  { %v5435_v23 = vpop.eup %5434 }
 0x226   :  { %v1210_v43 = vadd.f32 1.0, %v5435_v23  ;;  %v5437_v37 = vpop.eup %5436 }
 0x227   :  { %v1217_v36 = vadd.f32 1.0, %v5437_v37 }
 0x228   :  { %5438 = vrcp.f32 %v1210_v43 }
 0x229   :  { %5440 = vrcp.f32 %v1217_v36 }
 0x232   :  { %v5439_v56 = vpop.eup %5438 }
 0x233   :  { %v1221_v45 = vmul.f32 %v5439_v56, %v1220_v38  ;;  %v5441_v43 = vpop.eup %5440 }
 0x234   :  { %v1224_v53 = vsub.f32 1.0, %v5441_v43  ;;  %v1226_v36 = vmul.f32 %v5441_v43, %v6342_v46 }
 0x235   :  { %v1222_v29 = vadd.f32 %v1221_v45, %v7084_v16 }
 0x236   :  { %v1294_v24 = vpop.f32.mrb[24].mxu1  ;;  %v1365_v32 = vpop.f32.mrb[22].mxu0 }
 0x237   :  { %5442 = vtanh.f32 %v1222_v29  ;;  %v5379_v3 = vadd.f32 %v1294_v24, %v6335_v0  ;;  %v1296_v44 = vpop.f32.mrb[25].mxu1  ;;  %v4012_v41 = vpop.f32.mrb[23].mxu0  ;;  %v1383_v29 = vadd.f32 %v6364_v62, %v1365_v32 }
 0x238   :  { %v5380_v23 = vadd.f32 %v1296_v44, %v6337_v26  ;;  %v7085_v41 = vld [vmem:[#allocation31_spill] sm:$0xff] }
 0x239   :  { %v3510_v1 = vmul.f32 -1.442695, %v5379_v3 }
 0x23a   :  { %v3511_v37 = vmul.f32 -1.442695, %v5380_v23 }
 0x23b   :  { %5444 = vpow2.f32 %v3510_v1 }
 0x23c   :  { %5446 = vpow2.f32 %v3511_v37 }
 0x241   :  { %v5443_v54 = vpop.eup %5442 }
 0x242   :  { %v1225_v56 = vmul.f32 %v5443_v54, %v1224_v53 }
 0x244   :  { %v6444_v16 = vadd.f32 %v1226_v36, %v1225_v56  ;;  %v7087_v56 = vld [vmem:[#allocation5_spill] sm:$0xff]  ;;  %v7088_v36 = vld [vmem:[#allocation6_spill] sm:$0xff] }
 0x245   :  { %v5445_v45 = vpop.eup %5444 }
 0x246   :  { %v1373_v38 = vadd.f32 1.0, %v5445_v45  ;;  %3512 = vst [vmem:[%s7007_s7 + $0x8] sm:$0xff] %v6444_v16  ;;  %1460 = vmatmul.mubr.f32.vlgmr.msra.gmra.mrb[4].mxu0 %v6444_v16  ;;  %4046 = vmatmul.mubr.f32.vlgmr.msra.gmra.mrb[32].mxu1 %v6444_v16  ;;  %v5447_v46 = vpop.eup %5446  ;;  %v7089_v45 = vld [vmem:[#allocation7_spill] sm:$0xff] }
 0x247   :  { %4732 = vmatpush1.bf16.msra.mxu1 %v6016_v2  ;;  %4763 = vmatpush3.bf16.msra.mxu0 %v6021_v5  ;;  %v1380_v24 = vadd.f32 1.0, %v5447_v46  ;;  %v7091_v46 = vld [vmem:[#allocation9_spill] sm:$0xff] }
 0x248   :  { %5448 = vrcp.f32 %v1373_v38  ;;  %4734 = vmatprep.subr.bf16.mxu1 %v6026_v6  ;;  %4764 = vmatprep.subr.bf16.mxu0 %v7070_v21  ;;  %v7090_v38 = vld [vmem:[#allocation8_spill] sm:$0xff] }
 0x249   :  { %1622 = vmatprep.mubr.f32.mxu1 %v7071_v28  ;;  %4080 = vmatprep.mubr.msk.f32.mxu0 %vm5578_vm1, %v7071_v28  ;;  %5450 = vrcp.f32 %v1380_v24  ;;  %v7092_v24 = vld [vmem:[#allocation10_spill] sm:$0xff] }
 0x24b   :  { %4736 = vmatpush1.bf16.msra.mxu1 %v6047_v15  ;;  %4766 = vmatpush3.bf16.msra.mxu0 %v6053_v17 }
 0x24c   :  { %4738 = vmatprep.subr.bf16.mxu1 %v6056_v20  ;;  %4767 = vmatprep.subr.bf16.mxu0 %v7070_v21 }
 0x24f   :  { %4740 = vmatpush1.bf16.msra.mxu1 %v6078_v31  ;;  %4769 = vmatpush3.bf16.msra.mxu0 %v6084_v34 }
 0x250   :  { %4742 = vmatprep.subr.bf16.mxu1 %v6087_v35  ;;  %4770 = vmatprep.subr.bf16.mxu0 %v7070_v21 }
 0x252   :  { %v5449_v3 = vpop.eup %5448 }
 0x253   :  { %v1384_v44 = vmul.f32 %v5449_v3, %v1383_v29  ;;  %4744 = vmatpush1.bf16.msra.mxu1 %v6106_v47  ;;  %4772 = vmatpush3.bf16.msra.mxu0 %v6112_v51  ;;  %v5451_v32 = vpop.eup %5450  ;;  %v7093_v29 = vld [vmem:[#allocation11_spill] sm:$0xff]  ;;  %v7094_v3 = vld [vmem:[#allocation12_spill] sm:$0xff] }
 0x254   :  { %4746 = vmatprep.subr.bf16.mxu1 %v6115_v55  ;;  %4773 = vmatprep.subr.bf16.mxu0 %v7070_v21  ;;  %v1387_v23 = vsub.f32 1.0, %v5451_v32  ;;  %v1389_v53 = vmul.f32 %v5451_v32, %v6392_v9  ;;  %v7086_v9 = vld [vmem:[#allocation4_spill] sm:$0xff] }
 0x255   :  { %v1385_v1 = vadd.f32 %v1384_v44, %v7085_v41  ;;  %v7095_v44 = vld [vmem:[#allocation13_spill] sm:$0xff]  ;;  %v7096_v32 = vld [vmem:[#allocation32_spill] sm:$0xff] }
 0x257   :  { %5452 = vtanh.f32 %v1385_v1  ;;  %4748 = vmatpush1.bf16.msra.mxu1 %v6134_v4  ;;  %4775 = vmatpush3.bf16.msra.mxu0 %v6140_v10 }
 0x258   :  { %4750 = vmatprep.subr.bf16.mxu1 %v6143_v11  ;;  %4776 = vmatprep.subr.bf16.mxu0 %v7070_v21 }
 0x25b   :  { %4752 = vmatpush1.bf16.msra.mxu1 %v6162_v25  ;;  %4778 = vmatpush3.bf16.msra.mxu0 %v6168_v27 }
 0x25c   :  { %4754 = vmatprep.subr.bf16.mxu1 %v6171_v33  ;;  %4779 = vmatprep.subr.bf16.mxu0 %v7070_v21 }
 0x25f   :  { %4756 = vmatpush1.bf16.msra.mxu1 %v6190_v50  ;;  %4781 = vmatpush3.bf16.msra.mxu0 %v6196_v58 }
 0x260   :  { %4758 = vmatprep.subr.bf16.mxu1 %v6199_v61  ;;  %4782 = vmatprep.subr.bf16.mxu0 %v7070_v21 }
 0x261   :  { %v5453_v43 = vpop.eup %5452 }
 0x262   :  { %v1388_v37 = vmul.f32 %v5453_v43, %v1387_v23 }
 0x263   :  { %4760 = vmatpush1.bf16.msra.mxu1 %v6212_v13  ;;  %4784 = vmatpush3.bf16.msra.mxu0 %v6215_v14 }
 0x264   :  { %v6488_v54 = vadd.f32 %v1389_v53, %v1388_v37  ;;  %4786 = vmatprep.subr.bf16.mxu0 %v5676_v22  ;;  %4817 = vmatprep.subr.bf16.mxu1 %v7070_v21 }
 0x266   :  { %3513 = vst [vmem:[%s7008_s8 + $0x30] sm:$0xff] %v6488_v54  ;;  %1623 = vmatmul.mubr.f32.vlgmr.msra.gmra.mrb[22].mxu1 %v6488_v54  ;;  %4081 = vmatmul.mubr.f32.vlgmr.msra.gmra.mrb[24].mxu0 %v6488_v54 }
 0x267   :  { %4788 = vmatpush1.bf16.msra.mxu0 %v5744_v39  ;;  %4819 = vmatpush3.bf16.msra.mxu1 %v5746_v40 }
 0x268   :  { %4790 = vmatprep.subr.bf16.mxu0 %v5751_v42  ;;  %4820 = vmatprep.subr.bf16.mxu1 %v7070_v21 }
 0x269   :  { %1789 = vmatprep.mubr.f32.mxu0 %v7071_v28  ;;  %4115 = vmatprep.mubr.msk.f32.mxu1 %vm5578_vm1, %v7071_v28 }
 0x26b   :  { %4792 = vmatpush1.bf16.msra.mxu0 %v5772_v48  ;;  %4822 = vmatpush3.bf16.msra.mxu1 %v5774_v49 }
 0x26c   :  { %4794 = vmatprep.subr.bf16.mxu0 %v5784_v52  ;;  %4823 = vmatprep.subr.bf16.mxu1 %v7070_v21 }
 0x26f   :  { %4796 = vmatpush1.bf16.msra.mxu0 %v5810_v59  ;;  %4825 = vmatpush3.bf16.msra.mxu1 %v5812_v60 }
 0x270   :  { %4798 = vmatprep.subr.bf16.mxu0 %v5822_v63  ;;  %4826 = vmatprep.subr.bf16.mxu1 %v7070_v21 }
 0x273   :  { %4800 = vmatpush1.bf16.msra.mxu0 %v5848_v7  ;;  %4828 = vmatpush3.bf16.msra.mxu1 %v5850_v8 }
 0x274   :  { %4802 = vmatprep.subr.bf16.mxu0 %v5865_v12  ;;  %4829 = vmatprep.subr.bf16.mxu1 %v7070_v21 }
 0x277   :  { %4804 = vmatpush1.bf16.msra.mxu0 %v5889_v18  ;;  %4831 = vmatpush3.bf16.msra.mxu1 %v5891_v19 }
 0x278   :  { %4806 = vmatprep.subr.bf16.mxu0 %v7086_v9  ;;  %4832 = vmatprep.subr.bf16.mxu1 %v7070_v21  ;;  %v7097_v9 = vld [vmem:[#allocation20_spill] sm:$0xff] }
 0x27b   :  { %4808 = vmatpush1.bf16.msra.mxu0 %v7087_v56  ;;  %4834 = vmatpush3.bf16.msra.mxu1 %v7088_v36 }
 0x27c   :  { %4810 = vmatprep.subr.bf16.mxu0 %v7089_v45  ;;  %4835 = vmatprep.subr.bf16.mxu1 %v7070_v21 }
 0x27f   :  { %4812 = vmatpush1.bf16.msra.mxu0 %v7090_v38  ;;  %4837 = vmatpush3.bf16.msra.mxu1 %v7091_v46 }
 0x280   :  { %4814 = vmatprep.subr.bf16.mxu0 %v7092_v24  ;;  %4838 = vmatprep.subr.bf16.mxu1 %v7070_v21 }
 0x283   :  { %4816 = vmatpush1.bf16.msra.mxu0 %v7093_v29  ;;  %4840 = vmatpush3.bf16.msra.mxu1 %v7094_v3 }
 0x284   :  { %4842 = vmatprep.subr.bf16.mxu1 %v7095_v44  ;;  %4873 = vmatprep.subr.bf16.mxu0 %v7070_v21 }
 0x319   :  { %v1461_v41 = vpop.f32.mrb[4].mxu0  ;;  %v1532_v1 = vpop.f32.mrb[32].mxu1 }
 0x31a   :  { %v5351_v23 = vadd.f32 %v1461_v41, %v7096_v32  ;;  %v1463_v43 = vpop.f32.mrb[5].mxu0  ;;  %v4047_v37 = vpop.f32.mrb[33].mxu1  ;;  %v1550_v44 = vadd.f32 %v6332_v30, %v1532_v1 }
 0x31b   :  { %v5352_v46 = vadd.f32 %v1463_v43, %v7083_v57 }
 0x31c   :  { %v3514_v53 = vmul.f32 -1.442695, %v5351_v23 }
 0x31d   :  { %v3515_v24 = vmul.f32 -1.442695, %v5352_v46 }
 0x31e   :  { %5454 = vpow2.f32 %v3514_v53 }
 0x31f   :  { %5456 = vpow2.f32 %v3515_v24 }
 0x328   :  { %v5455_v38 = vpop.eup %5454 }
 0x329   :  { %v1540_v29 = vadd.f32 1.0, %v5455_v38  ;;  %v5457_v3 = vpop.eup %5456 }
 0x32a   :  { %v1547_v45 = vadd.f32 1.0, %v5457_v3 }
 0x32b   :  { %5458 = vrcp.f32 %v1540_v29 }
 0x32c   :  { %5460 = vrcp.f32 %v1547_v45 }
 0x335   :  { %v5459_v36 = vpop.eup %5458 }
 0x336   :  { %v1551_v56 = vmul.f32 %v5459_v36, %v1550_v44  ;;  %v5461_v29 = vpop.eup %5460 }
 0x337   :  { %v1554_v53 = vsub.f32 1.0, %v5461_v29  ;;  %v1556_v45 = vmul.f32 %v5461_v29, %v6444_v16 }
 0x338   :  { %v1552_v41 = vadd.f32 %v1551_v56, %v7097_v9 }
 0x339   :  { %v1624_v32 = vpop.f32.mrb[22].mxu1  ;;  %v1695_v37 = vpop.f32.mrb[24].mxu0 }
 0x33a   :  { %5462 = vtanh.f32 %v1552_v41  ;;  %v5377_v23 = vadd.f32 %v1624_v32, %v6335_v0  ;;  %v1626_v43 = vpop.f32.mrb[23].mxu1  ;;  %v4082_v46 = vpop.f32.mrb[25].mxu0  ;;  %v1713_v41 = vadd.f32 %v6364_v62, %v1695_v37 }
 0x33b   :  { %v5378_v38 = vadd.f32 %v1626_v43, %v6337_v26  ;;  %v7098_v46 = vld [vmem:[#allocation29_spill] sm:$0xff] }
 0x33c   :  { %v3516_v24 = vmul.f32 -1.442695, %v5377_v23 }
 0x33d   :  { %v3517_v3 = vmul.f32 -1.442695, %v5378_v38 }
 0x33e   :  { %5464 = vpow2.f32 %v3516_v24 }
 0x33f   :  { %5466 = vpow2.f32 %v3517_v3 }
 0x344   :  { %v5463_v1 = vpop.eup %5462 }
 0x345   :  { %v1555_v36 = vmul.f32 %v5463_v1, %v1554_v53 }
 0x347   :  { %v6540_v9 = vadd.f32 %v1556_v45, %v1555_v36  ;;  %v7100_v36 = vld [vmem:[#allocation5_spill] sm:$0xff]  ;;  %v7101_v45 = vld [vmem:[#allocation6_spill] sm:$0xff] }
 0x348   :  { %v5465_v56 = vpop.eup %5464 }
 0x349   :  { %v1703_v44 = vadd.f32 1.0, %v5465_v56  ;;  %3518 = vst [vmem:[%s7007_s7 + $0x10] sm:$0xff] %v6540_v9  ;;  %1790 = vmatmul.mubr.f32.vlgmr.msra.gmra.mrb[6].mxu0 %v6540_v9  ;;  %4116 = vmatmul.mubr.f32.vlgmr.msra.gmra.mrb[34].mxu1 %v6540_v9  ;;  %v5467_v16 = vpop.eup %5466  ;;  %v7102_v56 = vld [vmem:[#allocation7_spill] sm:$0xff] }
 0x34a   :  { %4844 = vmatpush1.bf16.msra.mxu1 %v6016_v2  ;;  %4875 = vmatpush3.bf16.msra.mxu0 %v6021_v5  ;;  %v1710_v32 = vadd.f32 1.0, %v5467_v16  ;;  %v7104_v16 = vld [vmem:[#allocation9_spill] sm:$0xff] }
 0x34b   :  { %5468 = vrcp.f32 %v1703_v44  ;;  %4846 = vmatprep.subr.bf16.mxu1 %v6026_v6  ;;  %4876 = vmatprep.subr.bf16.mxu0 %v7070_v21  ;;  %v7103_v44 = vld [vmem:[#allocation8_spill] sm:$0xff] }
 0x34c   :  { %1952 = vmatprep.mubr.f32.mxu1 %v7071_v28  ;;  %4150 = vmatprep.mubr.msk.f32.mxu0 %vm5578_vm1, %v7071_v28  ;;  %5470 = vrcp.f32 %v1710_v32  ;;  %v7105_v32 = vld [vmem:[#allocation10_spill] sm:$0xff] }
 0x34e   :  { %4848 = vmatpush1.bf16.msra.mxu1 %v6047_v15  ;;  %4878 = vmatpush3.bf16.msra.mxu0 %v6053_v17 }
 0x34f   :  { %4850 = vmatprep.subr.bf16.mxu1 %v6056_v20  ;;  %4879 = vmatprep.subr.bf16.mxu0 %v7070_v21 }
 0x352   :  { %4852 = vmatpush1.bf16.msra.mxu1 %v6078_v31  ;;  %4881 = vmatpush3.bf16.msra.mxu0 %v6084_v34 }
 0x353   :  { %4854 = vmatprep.subr.bf16.mxu1 %v6087_v35  ;;  %4882 = vmatprep.subr.bf16.mxu0 %v7070_v21 }
 0x355   :  { %v5469_v23 = vpop.eup %5468 }
 0x356   :  { %v1714_v43 = vmul.f32 %v5469_v23, %v1713_v41  ;;  %4856 = vmatpush1.bf16.msra.mxu1 %v6106_v47  ;;  %4884 = vmatpush3.bf16.msra.mxu0 %v6112_v51  ;;  %v5471_v37 = vpop.eup %5470  ;;  %v7106_v41 = vld [vmem:[#allocation11_spill] sm:$0xff]  ;;  %v7107_v23 = vld [vmem:[#allocation12_spill] sm:$0xff] }
 0x357   :  { %4858 = vmatprep.subr.bf16.mxu1 %v6115_v55  ;;  %4885 = vmatprep.subr.bf16.mxu0 %v7070_v21  ;;  %v1717_v38 = vsub.f32 1.0, %v5471_v37  ;;  %v1719_v53 = vmul.f32 %v5471_v37, %v6488_v54  ;;  %v7099_v54 = vld [vmem:[#allocation4_spill] sm:$0xff] }
 0x358   :  { %v1715_v24 = vadd.f32 %v1714_v43, %v7098_v46  ;;  %v7108_v43 = vld [vmem:[#allocation13_spill] sm:$0xff]  ;;  %v7109_v37 = vld [vmem:[#allocation32_spill] sm:$0xff] }
 0x35a   :  { %5472 = vtanh.f32 %v1715_v24  ;;  %4860 = vmatpush1.bf16.msra.mxu1 %v6134_v4  ;;  %4887 = vmatpush3.bf16.msra.mxu0 %v6140_v10 }
 0x35b   :  { %4862 = vmatprep.subr.bf16.mxu1 %v6143_v11  ;;  %4888 = vmatprep.subr.bf16.mxu0 %v7070_v21 }
 0x35e   :  { %4864 = vmatpush1.bf16.msra.mxu1 %v6162_v25  ;;  %4890 = vmatpush3.bf16.msra.mxu0 %v6168_v27 }
 0x35f   :  { %4866 = vmatprep.subr.bf16.mxu1 %v6171_v33  ;;  %4891 = vmatprep.subr.bf16.mxu0 %v7070_v21 }
 0x362   :  { %4868 = vmatpush1.bf16.msra.mxu1 %v6190_v50  ;;  %4893 = vmatpush3.bf16.msra.mxu0 %v6196_v58 }
 0x363   :  { %4870 = vmatprep.subr.bf16.mxu1 %v6199_v61  ;;  %4894 = vmatprep.subr.bf16.mxu0 %v7070_v21 }
 0x364   :  { %v5473_v29 = vpop.eup %5472 }
 0x365   :  { %v1718_v3 = vmul.f32 %v5473_v29, %v1717_v38 }
 0x366   :  { %4872 = vmatpush1.bf16.msra.mxu1 %v6212_v13  ;;  %4896 = vmatpush3.bf16.msra.mxu0 %v6215_v14 }
 0x367   :  { %v6584_v1 = vadd.f32 %v1719_v53, %v1718_v3  ;;  %4898 = vmatprep.subr.bf16.mxu0 %v5676_v22  ;;  %4929 = vmatprep.subr.bf16.mxu1 %v7070_v21 }
 0x369   :  { %3519 = vst [vmem:[%s7008_s8 + $0x28] sm:$0xff] %v6584_v1  ;;  %1953 = vmatmul.mubr.f32.vlgmr.msra.gmra.mrb[20].mxu1 %v6584_v1  ;;  %4151 = vmatmul.mubr.f32.vlgmr.msra.gmra.mrb[26].mxu0 %v6584_v1 }
 0x36a   :  { %4900 = vmatpush1.bf16.msra.mxu0 %v5744_v39  ;;  %4931 = vmatpush3.bf16.msra.mxu1 %v5746_v40 }
 0x36b   :  { %4902 = vmatprep.subr.bf16.mxu0 %v5751_v42  ;;  %4932 = vmatprep.subr.bf16.mxu1 %v7070_v21 }
 0x36c   :  { %2119 = vmatprep.mubr.f32.mxu0 %v7071_v28  ;;  %4185 = vmatprep.mubr.msk.f32.mxu1 %vm5578_vm1, %v7071_v28 }
 0x36e   :  { %4904 = vmatpush1.bf16.msra.mxu0 %v5772_v48  ;;  %4934 = vmatpush3.bf16.msra.mxu1 %v5774_v49 }
 0x36f   :  { %4906 = vmatprep.subr.bf16.mxu0 %v5784_v52  ;;  %4935 = vmatprep.subr.bf16.mxu1 %v7070_v21 }
 0x372   :  { %4908 = vmatpush1.bf16.msra.mxu0 %v5810_v59  ;;  %4937 = vmatpush3.bf16.msra.mxu1 %v5812_v60 }
 0x373   :  { %4910 = vmatprep.subr.bf16.mxu0 %v5822_v63  ;;  %4938 = vmatprep.subr.bf16.mxu1 %v7070_v21 }
 0x376   :  { %4912 = vmatpush1.bf16.msra.mxu0 %v5848_v7  ;;  %4940 = vmatpush3.bf16.msra.mxu1 %v5850_v8 }
 0x377   :  { %4914 = vmatprep.subr.bf16.mxu0 %v5865_v12  ;;  %4941 = vmatprep.subr.bf16.mxu1 %v7070_v21 }
 0x37a   :  { %4916 = vmatpush1.bf16.msra.mxu0 %v5889_v18  ;;  %4943 = vmatpush3.bf16.msra.mxu1 %v5891_v19 }
 0x37b   :  { %4918 = vmatprep.subr.bf16.mxu0 %v7099_v54  ;;  %4944 = vmatprep.subr.bf16.mxu1 %v7070_v21  ;;  %v7110_v54 = vld [vmem:[#allocation19_spill] sm:$0xff] }
 0x37e   :  { %4920 = vmatpush1.bf16.msra.mxu0 %v7100_v36  ;;  %4946 = vmatpush3.bf16.msra.mxu1 %v7101_v45 }
 0x37f   :  { %4922 = vmatprep.subr.bf16.mxu0 %v7102_v56  ;;  %4947 = vmatprep.subr.bf16.mxu1 %v7070_v21 }
 0x382   :  { %4924 = vmatpush1.bf16.msra.mxu0 %v7103_v44  ;;  %4949 = vmatpush3.bf16.msra.mxu1 %v7104_v16 }
 0x383   :  { %4926 = vmatprep.subr.bf16.mxu0 %v7105_v32  ;;  %4950 = vmatprep.subr.bf16.mxu1 %v7070_v21 }
 0x386   :  { %4928 = vmatpush1.bf16.msra.mxu0 %v7106_v41  ;;  %4952 = vmatpush3.bf16.msra.mxu1 %v7107_v23 }
 0x387   :  { %4954 = vmatprep.subr.bf16.mxu1 %v7108_v43  ;;  %4985 = vmatprep.subr.bf16.mxu0 %v7070_v21 }
 0x41c   :  { %v1791_v46 = vpop.f32.mrb[6].mxu0  ;;  %v1862_v24 = vpop.f32.mrb[34].mxu1 }
 0x41d   :  { %v5353_v38 = vadd.f32 %v1791_v46, %v7109_v37  ;;  %v1793_v29 = vpop.f32.mrb[7].mxu0  ;;  %v4117_v3 = vpop.f32.mrb[35].mxu1  ;;  %v1880_v43 = vadd.f32 %v6332_v30, %v1862_v24 }
 0x41e   :  { %v5354_v16 = vadd.f32 %v1793_v29, %v7083_v57 }
 0x41f   :  { %v3520_v53 = vmul.f32 -1.442695, %v5353_v38 }
 0x420   :  { %v3521_v32 = vmul.f32 -1.442695, %v5354_v16 }
 0x421   :  { %5474 = vpow2.f32 %v3520_v53 }
 0x422   :  { %5476 = vpow2.f32 %v3521_v32 }
 0x42b   :  { %v5475_v44 = vpop.eup %5474 }
 0x42c   :  { %v1870_v41 = vadd.f32 1.0, %v5475_v44  ;;  %v5477_v23 = vpop.eup %5476 }
 0x42d   :  { %v1877_v56 = vadd.f32 1.0, %v5477_v23 }
 0x42e   :  { %5478 = vrcp.f32 %v1870_v41 }
 0x42f   :  { %5480 = vrcp.f32 %v1877_v56 }
 0x438   :  { %v5479_v45 = vpop.eup %5478 }
 0x439   :  { %v1881_v36 = vmul.f32 %v5479_v45, %v1880_v43  ;;  %v5481_v41 = vpop.eup %5480 }
 0x43a   :  { %v1884_v53 = vsub.f32 1.0, %v5481_v41  ;;  %v1886_v56 = vmul.f32 %v5481_v41, %v6540_v9 }
 0x43b   :  { %v1882_v46 = vadd.f32 %v1881_v36, %v7110_v54 }
 0x43c   :  { %v1954_v37 = vpop.f32.mrb[20].mxu1  ;;  %v2025_v3 = vpop.f32.mrb[26].mxu0 }
 0x43d   :  { %5482 = vtanh.f32 %v1882_v46  ;;  %v5375_v38 = vadd.f32 %v1954_v37, %v6335_v0  ;;  %v1956_v29 = vpop.f32.mrb[21].mxu1  ;;  %v4152_v16 = vpop.f32.mrb[27].mxu0  ;;  %v2043_v37 = vadd.f32 %v6364_v62, %v2025_v3 }
 0x43e   :  { %v5376_v44 = vadd.f32 %v1956_v29, %v6337_v26  ;;  %v7111_v29 = vld [vmem:[#allocation30_spill] sm:$0xff] }
 0x43f   :  { %v3522_v32 = vmul.f32 -1.442695, %v5375_v38 }
 0x440   :  { %v3523_v23 = vmul.f32 -1.442695, %v5376_v44 }
 0x441   :  { %5484 = vpow2.f32 %v3522_v32 }
 0x442   :  { %5486 = vpow2.f32 %v3523_v23 }
 0x447   :  { %v5483_v30 = vpop.eup %5482 }
 0x448   :  { %v1885_v45 = vmul.f32 %v5483_v30, %v1884_v53  ;;  %v7113_v53 = vld [vmem:[#allocation5_spill] sm:$0xff]  ;;  %v7114_v30 = vld [vmem:[#allocation6_spill] sm:$0xff] }
 0x44a   :  { %v6636_v54 = vadd.f32 %v1886_v56, %v1885_v45  ;;  %v7115_v45 = vld [vmem:[#allocation7_spill] sm:$0xff]  ;;  %v7116_v56 = vld [vmem:[#allocation8_spill] sm:$0xff] }
 0x44b   :  { %v5485_v36 = vpop.eup %5484 }
 0x44c   :  { %v2033_v43 = vadd.f32 1.0, %v5485_v36  ;;  %3524 = vst [vmem:[%s7007_s7 + $0x18] sm:$0xff] %v6636_v54  ;;  %2120 = vmatmul.mubr.f32.vlgmr.msra.gmra.mrb[8].mxu0 %v6636_v54  ;;  %4186 = vmatmul.mubr.f32.vlgmr.msra.gmra.mrb[36].mxu1 %v6636_v54  ;;  %v5487_v9 = vpop.eup %5486  ;;  %v7117_v36 = vld [vmem:[#allocation9_spill] sm:$0xff] }
 0x44d   :  { %4956 = vmatpush1.bf16.msra.mxu1 %v6016_v2  ;;  %4987 = vmatpush3.bf16.msra.mxu0 %v6021_v5  ;;  %v2040_v24 = vadd.f32 1.0, %v5487_v9  ;;  %v7119_v9 = vld [vmem:[#allocation11_spill] sm:$0xff] }
 0x44e   :  { %5488 = vrcp.f32 %v2033_v43  ;;  %4958 = vmatprep.subr.bf16.mxu1 %v6026_v6  ;;  %4988 = vmatprep.subr.bf16.mxu0 %v7070_v21  ;;  %v7118_v43 = vld [vmem:[#allocation10_spill] sm:$0xff] }
 0x44f   :  { %2282 = vmatprep.mubr.f32.mxu1 %v7071_v28  ;;  %4220 = vmatprep.mubr.msk.f32.mxu0 %vm5578_vm1, %v7071_v28  ;;  %5490 = vrcp.f32 %v2040_v24  ;;  %v7120_v24 = vld [vmem:[#allocation12_spill] sm:$0xff] }
 0x451   :  { %4960 = vmatpush1.bf16.msra.mxu1 %v6047_v15  ;;  %4990 = vmatpush3.bf16.msra.mxu0 %v6053_v17 }
 0x452   :  { %4962 = vmatprep.subr.bf16.mxu1 %v6056_v20  ;;  %4991 = vmatprep.subr.bf16.mxu0 %v7070_v21 }
 0x455   :  { %4964 = vmatpush1.bf16.msra.mxu1 %v6078_v31  ;;  %4993 = vmatpush3.bf16.msra.mxu0 %v6084_v34 }
 0x456   :  { %4966 = vmatprep.subr.bf16.mxu1 %v6087_v35  ;;  %4994 = vmatprep.subr.bf16.mxu0 %v7070_v21 }
 0x458   :  { %v5489_v46 = vpop.eup %5488 }
 0x459   :  { %v2044_v38 = vmul.f32 %v5489_v46, %v2043_v37  ;;  %4968 = vmatpush1.bf16.msra.mxu1 %v6106_v47  ;;  %4996 = vmatpush3.bf16.msra.mxu0 %v6112_v51  ;;  %v5491_v62 = vpop.eup %5490  ;;  %v7121_v37 = vld [vmem:[#allocation13_spill] sm:$0xff] }
 0x45a   :  { %4970 = vmatprep.subr.bf16.mxu1 %v6115_v55  ;;  %4997 = vmatprep.subr.bf16.mxu0 %v7070_v21  ;;  %v2047_v3 = vsub.f32 1.0, %v5491_v62  ;;  %v2049_v41 = vmul.f32 %v5491_v62, %v6584_v1  ;;  %v7112_v1 = vld [vmem:[#allocation4_spill] sm:$0xff] }
 0x45b   :  { %v2045_v16 = vadd.f32 %v2044_v38, %v7111_v29  ;;  %v7122_v29 = vld [vmem:[#allocation32_spill] sm:$0xff] }
 0x45d   :  { %5492 = vtanh.f32 %v2045_v16  ;;  %4972 = vmatpush1.bf16.msra.mxu1 %v6134_v4  ;;  %4999 = vmatpush3.bf16.msra.mxu0 %v6140_v10 }
 0x45e   :  { %4974 = vmatprep.subr.bf16.mxu1 %v6143_v11  ;;  %5000 = vmatprep.subr.bf16.mxu0 %v7070_v21 }
 0x461   :  { %4976 = vmatpush1.bf16.msra.mxu1 %v6162_v25  ;;  %5002 = vmatpush3.bf16.msra.mxu0 %v6168_v27 }
 0x462   :  { %4978 = vmatprep.subr.bf16.mxu1 %v6171_v33  ;;  %5003 = vmatprep.subr.bf16.mxu0 %v7070_v21 }
 0x465   :  { %4980 = vmatpush1.bf16.msra.mxu1 %v6190_v50  ;;  %5005 = vmatpush3.bf16.msra.mxu0 %v6196_v58 }
 0x466   :  { %4982 = vmatprep.subr.bf16.mxu1 %v6199_v61  ;;  %5006 = vmatprep.subr.bf16.mxu0 %v7070_v21 }
 0x467   :  { %v5493_v32 = vpop.eup %5492 }
 0x468   :  { %v2048_v44 = vmul.f32 %v5493_v32, %v2047_v3 }
 0x469   :  { %4984 = vmatpush1.bf16.msra.mxu1 %v6212_v13  ;;  %5008 = vmatpush3.bf16.msra.mxu0 %v6215_v14 }
 0x46a   :  { %v6680_v23 = vadd.f32 %v2049_v41, %v2048_v44  ;;  %5010 = vmatprep.subr.bf16.mxu0 %v5676_v22  ;;  %5041 = vmatprep.subr.bf16.mxu1 %v7070_v21 }
 0x46c   :  { %3525 = vst [vmem:[%s7008_s8 + $0x20] sm:$0xff] %v6680_v23  ;;  %2283 = vmatmul.mubr.f32.vlgmr.msra.gmra.mrb[18].mxu1 %v6680_v23  ;;  %4221 = vmatmul.mubr.f32.vlgmr.msra.gmra.mrb[28].mxu0 %v6680_v23 }
 0x46d   :  { %5012 = vmatpush1.bf16.msra.mxu0 %v5744_v39  ;;  %5043 = vmatpush3.bf16.msra.mxu1 %v5746_v40 }
 0x46e   :  { %5014 = vmatprep.subr.bf16.mxu0 %v5751_v42  ;;  %5044 = vmatprep.subr.bf16.mxu1 %v7070_v21 }
 0x46f   :  { %2449 = vmatprep.mubr.f32.mxu0 %v7071_v28  ;;  %4255 = vmatprep.mubr.msk.f32.mxu1 %vm5578_vm1, %v7071_v28 }
 0x471   :  { %5016 = vmatpush1.bf16.msra.mxu0 %v5772_v48  ;;  %5046 = vmatpush3.bf16.msra.mxu1 %v5774_v49 }
 0x472   :  { %5018 = vmatprep.subr.bf16.mxu0 %v5784_v52  ;;  %5047 = vmatprep.subr.bf16.mxu1 %v7070_v21 }
 0x475   :  { %5020 = vmatpush1.bf16.msra.mxu0 %v5810_v59  ;;  %5049 = vmatpush3.bf16.msra.mxu1 %v5812_v60 }
 0x476   :  { %5022 = vmatprep.subr.bf16.mxu0 %v5822_v63  ;;  %5050 = vmatprep.subr.bf16.mxu1 %v7070_v21 }
 0x479   :  { %5024 = vmatpush1.bf16.msra.mxu0 %v5848_v7  ;;  %5052 = vmatpush3.bf16.msra.mxu1 %v5850_v8 }
 0x47a   :  { %5026 = vmatprep.subr.bf16.mxu0 %v5865_v12  ;;  %5053 = vmatprep.subr.bf16.mxu1 %v7070_v21 }
 0x47d   :  { %5028 = vmatpush1.bf16.msra.mxu0 %v5889_v18  ;;  %5055 = vmatpush3.bf16.msra.mxu1 %v5891_v19 }
 0x47e   :  { %5030 = vmatprep.subr.bf16.mxu0 %v7112_v1  ;;  %5056 = vmatprep.subr.bf16.mxu1 %v7070_v21 }
 0x481   :  { %5032 = vmatpush1.bf16.msra.mxu0 %v7113_v53  ;;  %5058 = vmatpush3.bf16.msra.mxu1 %v7114_v30 }
 0x482   :  { %5034 = vmatprep.subr.bf16.mxu0 %v7115_v45  ;;  %5059 = vmatprep.subr.bf16.mxu1 %v7070_v21 }
 0x485   :  { %5036 = vmatpush1.bf16.msra.mxu0 %v7116_v56  ;;  %5061 = vmatpush3.bf16.msra.mxu1 %v7117_v36 }
 0x486   :  { %5038 = vmatprep.subr.bf16.mxu0 %v7118_v43  ;;  %5062 = vmatprep.subr.bf16.mxu1 %v7070_v21 }
 0x489   :  { %5040 = vmatpush1.bf16.msra.mxu0 %v7119_v9  ;;  %5064 = vmatpush3.bf16.msra.mxu1 %v7120_v24 }
 0x48a   :  { %5066 = vmatprep.subr.bf16.mxu1 %v7121_v37  ;;  %5097 = vmatprep.subr.bf16.mxu0 %v7070_v21  ;;  %v6730_v37 = vld [vmem:[%s7006_s5] ss:$0 sm:$0xff] }
 0x51f   :  { %v2121_v46 = vpop.f32.mrb[8].mxu0  ;;  %v2192_v38 = vpop.f32.mrb[36].mxu1 }
 0x520   :  { %v5355_v16 = vadd.f32 %v2121_v46, %v7122_v29  ;;  %v2123_v62 = vpop.f32.mrb[9].mxu0  ;;  %v4187_v3 = vpop.f32.mrb[37].mxu1  ;;  %v2210_v46 = vadd.f32 %v6730_v37, %v2192_v38 }
 0x521   :  { %v5356_v44 = vadd.f32 %v2123_v62, %v7083_v57 }
 0x522   :  { %v3526_v32 = vmul.f32 -1.442695, %v5355_v16  ;;  %v7123_v16 = vld [vmem:[#allocation22_spill] sm:$0xff] }
 0x523   :  { %v3527_v41 = vmul.f32 -1.442695, %v5356_v44 }
 0x524   :  { %5494 = vpow2.f32 %v3526_v32 }
 0x525   :  { %5496 = vpow2.f32 %v3527_v41 }
 0x52e   :  { %v5495_v43 = vpop.eup %5494 }
 0x52f   :  { %v2200_v9 = vadd.f32 1.0, %v5495_v43  ;;  %v5497_v24 = vpop.eup %5496 }
 0x530   :  { %v2207_v36 = vadd.f32 1.0, %v5497_v24 }
 0x531   :  { %5498 = vrcp.f32 %v2200_v9 }
 0x532   :  { %5500 = vrcp.f32 %v2207_v36 }
 0x53b   :  { %v5499_v29 = vpop.eup %5498 }
 0x53c   :  { %v2211_v3 = vmul.f32 %v5499_v29, %v2210_v46  ;;  %v5501_v56 = vpop.eup %5500 }
 0x53d   :  { %v2214_v30 = vsub.f32 1.0, %v5501_v56  ;;  %v2216_v36 = vmul.f32 %v5501_v56, %v6636_v54 }
 0x53e   :  { %v2212_v62 = vadd.f32 %v2211_v3, %v7123_v16 }
 0x53f   :  { %v2284_v32 = vpop.f32.mrb[18].mxu1  ;;  %v2355_v44 = vpop.f32.mrb[28].mxu0 }
 0x540   :  { %5502 = vtanh.f32 %v2212_v62  ;;  %v5373_v43 = vadd.f32 %v2284_v32, %v6335_v0  ;;  %v2286_v9 = vpop.f32.mrb[19].mxu1  ;;  %v4222_v41 = vpop.f32.mrb[29].mxu0  ;;  %v7124_v32 = vld [vmem:[#allocation27_spill] sm:$0xff] }
 0x541   :  { %v5374_v57 = vadd.f32 %v2286_v9, %v6337_v26 }
 0x542   :  { %v3528_v24 = vmul.f32 -1.442695, %v5373_v43 }
 0x543   :  { %v3529_v45 = vmul.f32 -1.442695, %v5374_v57 }
 0x544   :  { %5504 = vpow2.f32 %v3528_v24 }
 0x545   :  { %5506 = vpow2.f32 %v3529_v45 }
 0x54a   :  { %v5503_v38 = vpop.eup %5502 }
 0x54b   :  { %v2215_v29 = vmul.f32 %v5503_v38, %v2214_v30  ;;  %v6763_v30 = vld [vmem:[%s7006_s5 + $0x1] ss:$0 sm:$0xff] }
 0x54c   :  { %v2373_v45 = vadd.f32 %v6763_v30, %v2355_v44 }
 0x54d   :  { %v6737_v46 = vadd.f32 %v2216_v36, %v2215_v29  ;;  %v7126_v36 = vld [vmem:[#allocation7_spill] sm:$0xff] }
 0x54e   :  { %v5505_v3 = vpop.eup %5504 }
 0x54f   :  { %v2363_v16 = vadd.f32 1.0, %v5505_v3  ;;  %3530 = vst [vmem:[%s7007_s7 + $0x20] sm:$0xff] %v6737_v46  ;;  %2450 = vmatmul.mubr.f32.vlgmr.msra.gmra.mrb[10].mxu0 %v6737_v46  ;;  %4256 = vmatmul.mubr.f32.vlgmr.msra.gmra.mrb[38].mxu1 %v6737_v46  ;;  %v5507_v57 = vpop.eup %5506  ;;  %v7127_v3 = vld [vmem:[#allocation8_spill] sm:$0xff] }
 0x550   :  { %5068 = vmatpush1.bf16.msra.mxu1 %v6016_v2  ;;  %5099 = vmatpush3.bf16.msra.mxu0 %v6021_v5  ;;  %v2370_v54 = vadd.f32 1.0, %v5507_v57  ;;  %v7129_v57 = vld [vmem:[#allocation10_spill] sm:$0xff] }
 0x551   :  { %5508 = vrcp.f32 %v2363_v16  ;;  %5070 = vmatprep.subr.bf16.mxu1 %v6026_v6  ;;  %5100 = vmatprep.subr.bf16.mxu0 %v7070_v21  ;;  %v7128_v16 = vld [vmem:[#allocation9_spill] sm:$0xff] }
 0x552   :  { %2612 = vmatprep.mubr.f32.mxu1 %v7071_v28  ;;  %4290 = vmatprep.mubr.msk.f32.mxu0 %vm5578_vm1, %v7071_v28  ;;  %5510 = vrcp.f32 %v2370_v54  ;;  %v7130_v54 = vld [vmem:[#allocation11_spill] sm:$0xff] }
 0x554   :  { %5072 = vmatpush1.bf16.msra.mxu1 %v6047_v15  ;;  %5102 = vmatpush3.bf16.msra.mxu0 %v6053_v17 }
 0x555   :  { %5074 = vmatprep.subr.bf16.mxu1 %v6056_v20  ;;  %5103 = vmatprep.subr.bf16.mxu0 %v7070_v21 }
 0x558   :  { %5076 = vmatpush1.bf16.msra.mxu1 %v6078_v31  ;;  %5105 = vmatpush3.bf16.msra.mxu0 %v6084_v34 }
 0x559   :  { %5078 = vmatprep.subr.bf16.mxu1 %v6087_v35  ;;  %5106 = vmatprep.subr.bf16.mxu0 %v7070_v21 }
 0x55b   :  { %v5509_v56 = vpop.eup %5508 }
 0x55c   :  { %v2374_v62 = vmul.f32 %v5509_v56, %v2373_v45  ;;  %5080 = vmatpush1.bf16.msra.mxu1 %v6106_v47  ;;  %5108 = vmatpush3.bf16.msra.mxu0 %v6112_v51  ;;  %v5511_v44 = vpop.eup %5510  ;;  %v7131_v45 = vld [vmem:[#allocation12_spill] sm:$0xff]  ;;  %v7132_v56 = vld [vmem:[#allocation13_spill] sm:$0xff] }
 0x55d   :  { %5082 = vmatprep.subr.bf16.mxu1 %v6115_v55  ;;  %5109 = vmatprep.subr.bf16.mxu0 %v7070_v21  ;;  %v2377_v9 = vsub.f32 1.0, %v5511_v44  ;;  %v2379_v38 = vmul.f32 %v5511_v44, %v6680_v23  ;;  %v7125_v23 = vld [vmem:[#allocation6_spill] sm:$0xff] }
 0x55e   :  { %v2375_v43 = vadd.f32 %v2374_v62, %v7124_v32 }
 0x560   :  { %5512 = vtanh.f32 %v2375_v43  ;;  %5084 = vmatpush1.bf16.msra.mxu1 %v6134_v4  ;;  %5111 = vmatpush3.bf16.msra.mxu0 %v6140_v10  ;;  %v7133_v43 = vld [vmem:[#allocation32_spill] sm:$0xff] }
 0x561   :  { %5086 = vmatprep.subr.bf16.mxu1 %v6143_v11  ;;  %5112 = vmatprep.subr.bf16.mxu0 %v7070_v21 }
 0x564   :  { %5088 = vmatpush1.bf16.msra.mxu1 %v6162_v25  ;;  %5114 = vmatpush3.bf16.msra.mxu0 %v6168_v27 }
 0x565   :  { %5090 = vmatprep.subr.bf16.mxu1 %v6171_v33  ;;  %5115 = vmatprep.subr.bf16.mxu0 %v7070_v21 }
 0x568   :  { %5092 = vmatpush1.bf16.msra.mxu1 %v6190_v50  ;;  %5117 = vmatpush3.bf16.msra.mxu0 %v6196_v58 }
 0x569   :  { %5094 = vmatprep.subr.bf16.mxu1 %v6199_v61  ;;  %5118 = vmatprep.subr.bf16.mxu0 %v7070_v21 }
 0x56a   :  { %v5513_v41 = vpop.eup %5512 }
 0x56b   :  { %v2378_v24 = vmul.f32 %v5513_v41, %v2377_v9 }
 0x56c   :  { %5096 = vmatpush1.bf16.msra.mxu1 %v6212_v13  ;;  %5120 = vmatpush3.bf16.msra.mxu0 %v6215_v14 }
 0x56d   :  { %v6786_v29 = vadd.f32 %v2379_v38, %v2378_v24  ;;  %5122 = vmatprep.subr.bf16.mxu0 %v5676_v22  ;;  %5153 = vmatprep.subr.bf16.mxu1 %v7070_v21  ;;  %v7134_v38 = vld [vmem:[#allocation33_spill] sm:$0xff] }
 0x56f   :  { %3531 = vst [vmem:[%s7008_s8 + $0x18] sm:$0xff] %v6786_v29  ;;  %2613 = vmatmul.mubr.f32.vlgmr.msra.gmra.mrb[16].mxu1 %v6786_v29  ;;  %4291 = vmatmul.mubr.f32.vlgmr.msra.gmra.mrb[30].mxu0 %v6786_v29 }
 0x570   :  { %5124 = vmatpush1.bf16.msra.mxu0 %v5744_v39  ;;  %5155 = vmatpush3.bf16.msra.mxu1 %v5746_v40 }
 0x571   :  { %5126 = vmatprep.subr.bf16.mxu0 %v5751_v42  ;;  %5156 = vmatprep.subr.bf16.mxu1 %v7070_v21 }
 0x572   :  { %2779 = vmatprep.mubr.f32.mxu0 %v7071_v28  ;;  %4325 = vmatprep.mubr.msk.f32.mxu1 %vm5578_vm1, %v7071_v28 }
 0x574   :  { %5128 = vmatpush1.bf16.msra.mxu0 %v5772_v48  ;;  %5158 = vmatpush3.bf16.msra.mxu1 %v5774_v49 }
 0x575   :  { %5130 = vmatprep.subr.bf16.mxu0 %v5784_v52  ;;  %5159 = vmatprep.subr.bf16.mxu1 %v7070_v21 }
 0x578   :  { %5132 = vmatpush1.bf16.msra.mxu0 %v5810_v59  ;;  %5161 = vmatpush3.bf16.msra.mxu1 %v5812_v60 }
 0x579   :  { %5134 = vmatprep.subr.bf16.mxu0 %v5822_v63  ;;  %5162 = vmatprep.subr.bf16.mxu1 %v7070_v21 }
 0x57c   :  { %5136 = vmatpush1.bf16.msra.mxu0 %v5848_v7  ;;  %5164 = vmatpush3.bf16.msra.mxu1 %v5850_v8 }
 0x57d   :  { %5138 = vmatprep.subr.bf16.mxu0 %v5865_v12  ;;  %5165 = vmatprep.subr.bf16.mxu1 %v7070_v21 }
 0x580   :  { %5140 = vmatpush1.bf16.msra.mxu0 %v5889_v18  ;;  %5167 = vmatpush3.bf16.msra.mxu1 %v5891_v19 }
 0x581   :  { %5142 = vmatprep.subr.bf16.mxu0 %v7112_v1  ;;  %5168 = vmatprep.subr.bf16.mxu1 %v7070_v21  ;;  %v7135_v1 = vld [vmem:[#allocation21_spill] sm:$0xff] }
 0x584   :  { %5144 = vmatpush1.bf16.msra.mxu0 %v7113_v53  ;;  %5170 = vmatpush3.bf16.msra.mxu1 %v7125_v23 }
 0x585   :  { %5146 = vmatprep.subr.bf16.mxu0 %v7126_v36  ;;  %5171 = vmatprep.subr.bf16.mxu1 %v7070_v21 }
 0x588   :  { %5148 = vmatpush1.bf16.msra.mxu0 %v7127_v3  ;;  %5173 = vmatpush3.bf16.msra.mxu1 %v7128_v16 }
 0x589   :  { %5150 = vmatprep.subr.bf16.mxu0 %v7129_v57  ;;  %5174 = vmatprep.subr.bf16.mxu1 %v7070_v21 }
 0x58c   :  { %5152 = vmatpush1.bf16.msra.mxu0 %v7130_v54  ;;  %5176 = vmatpush3.bf16.msra.mxu1 %v7131_v45 }
 0x58d   :  { %5178 = vmatprep.subr.bf16.mxu1 %v7132_v56  ;;  %5209 = vmatprep.subr.bf16.mxu0 %v7070_v21 }
 0x622   :  { %v2451_v62 = vpop.f32.mrb[10].mxu0  ;;  %v2522_v32 = vpop.f32.mrb[38].mxu1 }
 0x623   :  { %v5357_v44 = vadd.f32 %v2451_v62, %v7133_v43  ;;  %v2453_v9 = vpop.f32.mrb[11].mxu0  ;;  %v4257_v41 = vpop.f32.mrb[39].mxu1  ;;  %v2540_v56 = vadd.f32 %v6730_v37, %v2522_v32 }
 0x624   :  { %v5358_v16 = vadd.f32 %v2453_v9, %v7134_v38 }
 0x625   :  { %v3532_v24 = vmul.f32 -1.442695, %v5357_v44 }
 0x626   :  { %v3533_v57 = vmul.f32 -1.442695, %v5358_v16 }
 0x627   :  { %5514 = vpow2.f32 %v3532_v24 }
 0x628   :  { %5516 = vpow2.f32 %v3533_v57 }
 0x631   :  { %v5515_v3 = vpop.eup %5514 }
 0x632   :  { %v2530_v54 = vadd.f32 1.0, %v5515_v3  ;;  %v5517_v45 = vpop.eup %5516 }
 0x633   :  { %v2537_v36 = vadd.f32 1.0, %v5517_v45 }
 0x634   :  { %5518 = vrcp.f32 %v2530_v54 }
 0x635   :  { %5520 = vrcp.f32 %v2537_v36 }
 0x63e   :  { %v5519_v23 = vpop.eup %5518 }
 0x63f   :  { %v2541_v53 = vmul.f32 %v5519_v23, %v2540_v56  ;;  %v5521_v54 = vpop.eup %5520 }
 0x640   :  { %v2544_v24 = vsub.f32 1.0, %v5521_v54  ;;  %v2546_v36 = vmul.f32 %v5521_v54, %v6737_v46 }
 0x641   :  { %v2542_v62 = vadd.f32 %v2541_v53, %v7135_v1 }
 0x642   :  { %v2614_v43 = vpop.f32.mrb[16].mxu1  ;;  %v2685_v41 = vpop.f32.mrb[30].mxu0 }
 0x643   :  { %5522 = vtanh.f32 %v2542_v62  ;;  %v5371_v44 = vadd.f32 %v2614_v43, %v6335_v0  ;;  %v2616_v9 = vpop.f32.mrb[17].mxu1  ;;  %v4292_v16 = vpop.f32.mrb[31].mxu0  ;;  %v2703_v62 = vadd.f32 %v6763_v30, %v2685_v41 }
 0x644   :  { %v5372_v3 = vadd.f32 %v2616_v9, %v6337_v26  ;;  %v7136_v16 = vld [vmem:[#allocation28_spill] sm:$0xff] }
 0x645   :  { %v3534_v57 = vmul.f32 -1.442695, %v5371_v44 }
 0x646   :  { %v3535_v45 = vmul.f32 -1.442695, %v5372_v3 }
 0x647   :  { %5524 = vpow2.f32 %v3534_v57 }
 0x648   :  { %5526 = vpow2.f32 %v3535_v45 }
 0x64d   :  { %v5523_v32 = vpop.eup %5522 }
 0x64e   :  { %v2545_v23 = vmul.f32 %v5523_v32, %v2544_v24 }
 0x650   :  { %v6838_v1 = vadd.f32 %v2546_v36, %v2545_v23 }
 0x651   :  { %v5525_v53 = vpop.eup %5524 }
 0x652   :  { %v2693_v56 = vadd.f32 1.0, %v5525_v53  ;;  %3536 = vst [vmem:[%s7007_s7 + $0x28] sm:$0xff] %v6838_v1  ;;  %2780 = vmatmul.mubr.f32.vlgmr.msra.gmra.mrb[32].mxu0 %v6838_v1  ;;  %4326 = vmatmul.mubr.f32.vlgmr.msra.gmra.mrb[40].mxu1 %v6838_v1  ;;  %v5527_v46 = vpop.eup %5526 }
 0x653   :  { %5180 = vmatpush1.bf16.msra.mxu1 %v6016_v2  ;;  %5211 = vmatpush3.bf16.msra.mxu0 %v6021_v5  ;;  %v2700_v43 = vadd.f32 1.0, %v5527_v46 }
 0x654   :  { %5528 = vrcp.f32 %v2693_v56  ;;  %5182 = vmatprep.subr.bf16.mxu1 %v6026_v6  ;;  %5212 = vmatprep.subr.bf16.mxu0 %v7070_v21 }
 0x655   :  { %2942 = vmatprep.mubr.f32.mxu1 %v7071_v28  ;;  %4360 = vmatprep.mubr.msk.f32.mxu0 %vm5578_vm1, %v7071_v28  ;;  %5530 = vrcp.f32 %v2700_v43 }
 0x657   :  { %5184 = vmatpush1.bf16.msra.mxu1 %v6047_v15  ;;  %5214 = vmatpush3.bf16.msra.mxu0 %v6053_v17 }
 0x658   :  { %5186 = vmatprep.subr.bf16.mxu1 %v6056_v20  ;;  %5215 = vmatprep.subr.bf16.mxu0 %v7070_v21 }
 0x65b   :  { %5188 = vmatpush1.bf16.msra.mxu1 %v6078_v31  ;;  %5217 = vmatpush3.bf16.msra.mxu0 %v6084_v34 }
 0x65c   :  { %5190 = vmatprep.subr.bf16.mxu1 %v6087_v35  ;;  %5218 = vmatprep.subr.bf16.mxu0 %v7070_v21 }
 0x65e   :  { %v5529_v44 = vpop.eup %5528 }
 0x65f   :  { %v2704_v9 = vmul.f32 %v5529_v44, %v2703_v62  ;;  %5192 = vmatpush1.bf16.msra.mxu1 %v6106_v47  ;;  %5220 = vmatpush3.bf16.msra.mxu0 %v6112_v51  ;;  %v5531_v41 = vpop.eup %5530 }
 0x660   :  { %5194 = vmatprep.subr.bf16.mxu1 %v6115_v55  ;;  %5221 = vmatprep.subr.bf16.mxu0 %v7070_v21  ;;  %v2707_v3 = vsub.f32 1.0, %v5531_v41  ;;  %v2709_v24 = vmul.f32 %v5531_v41, %v6786_v29 }
 0x661   :  { %v2705_v57 = vadd.f32 %v2704_v9, %v7136_v16 }
 0x663   :  { %5532 = vtanh.f32 %v2705_v57  ;;  %5196 = vmatpush1.bf16.msra.mxu1 %v6134_v4  ;;  %5223 = vmatpush3.bf16.msra.mxu0 %v6140_v10 }
 0x664   :  { %5198 = vmatprep.subr.bf16.mxu1 %v6143_v11  ;;  %5224 = vmatprep.subr.bf16.mxu0 %v7070_v21 }
 0x667   :  { %5200 = vmatpush1.bf16.msra.mxu1 %v6162_v25  ;;  %5226 = vmatpush3.bf16.msra.mxu0 %v6168_v27 }
 0x668   :  { %5202 = vmatprep.subr.bf16.mxu1 %v6171_v33  ;;  %5227 = vmatprep.subr.bf16.mxu0 %v7070_v21 }
 0x66b   :  { %5204 = vmatpush1.bf16.msra.mxu1 %v6190_v50  ;;  %5229 = vmatpush3.bf16.msra.mxu0 %v6196_v58 }
 0x66c   :  { %5206 = vmatprep.subr.bf16.mxu1 %v6199_v61  ;;  %5230 = vmatprep.subr.bf16.mxu0 %v7070_v21 }
 0x66d   :  { %v5533_v54 = vpop.eup %5532 }
 0x66e   :  { %v2708_v45 = vmul.f32 %v5533_v54, %v2707_v3 }
 0x66f   :  { %5208 = vmatpush1.bf16.msra.mxu1 %v6212_v13  ;;  %5232 = vmatpush3.bf16.msra.mxu0 %v6215_v14 }
 0x670   :  { %v6882_v32 = vadd.f32 %v2709_v24, %v2708_v45  ;;  %5234 = vmatprep.subr.bf16.mxu0 %v5676_v22  ;;  %5265 = vmatprep.subr.bf16.mxu1 %v7070_v21  ;;  %v7137_v22 = vld [vmem:[#allocation4_spill] sm:$0xff] }
 0x671   :  { %v7150_v45 = vld [vmem:[#allocation24_spill] sm:$0xff] }
 0x672   :  { %3537 = vst [vmem:[%s7008_s8 + $0x10] sm:$0xff] %v6882_v32  ;;  %2943 = vmatmul.mubr.f32.vlgmr.msra.gmra.mrb[14].mxu1 %v6882_v32  ;;  %4361 = vmatmul.mubr.f32.vlgmr.msra.gmra.mrb[34].mxu0 %v6882_v32 }
 0x673   :  { %5236 = vmatpush1.bf16.msra.mxu0 %v5744_v39  ;;  %5267 = vmatpush3.bf16.msra.mxu1 %v5746_v40  ;;  %v7138_v39 = vld [vmem:[#allocation5_spill] sm:$0xff]  ;;  %v7139_v40 = vld [vmem:[#allocation6_spill] sm:$0xff] }
 0x674   :  { %5238 = vmatprep.subr.bf16.mxu0 %v5751_v42  ;;  %5268 = vmatprep.subr.bf16.mxu1 %v7070_v21  ;;  %v7140_v42 = vld [vmem:[#allocation7_spill] sm:$0xff] }
 0x675   :  { %3109 = vmatprep.mubr.f32.mxu0 %v7071_v28  ;;  %4395 = vmatprep.mubr.msk.f32.mxu1 %vm5578_vm1, %v7071_v28 }
 0x677   :  { %5240 = vmatpush1.bf16.msra.mxu0 %v5772_v48  ;;  %5270 = vmatpush3.bf16.msra.mxu1 %v5774_v49  ;;  %v7141_v48 = vld [vmem:[#allocation8_spill] sm:$0xff]  ;;  %v7142_v49 = vld [vmem:[#allocation9_spill] sm:$0xff] }
 0x678   :  { %5242 = vmatprep.subr.bf16.mxu0 %v5784_v52  ;;  %5271 = vmatprep.subr.bf16.mxu1 %v7070_v21  ;;  %v7143_v52 = vld [vmem:[#allocation10_spill] sm:$0xff] }
 0x67b   :  { %5244 = vmatpush1.bf16.msra.mxu0 %v5810_v59  ;;  %5273 = vmatpush3.bf16.msra.mxu1 %v5812_v60  ;;  %v7144_v59 = vld [vmem:[#allocation11_spill] sm:$0xff]  ;;  %v7145_v60 = vld [vmem:[#allocation12_spill] sm:$0xff] }
 0x67c   :  { %5246 = vmatprep.subr.bf16.mxu0 %v5822_v63  ;;  %5274 = vmatprep.subr.bf16.mxu1 %v7070_v21  ;;  %v7146_v63 = vld [vmem:[#allocation13_spill] sm:$0xff] }
 0x67f   :  { %5248 = vmatpush1.bf16.msra.mxu0 %v5848_v7  ;;  %5276 = vmatpush3.bf16.msra.mxu1 %v5850_v8  ;;  %v7147_v7 = vld [vmem:[#allocation32_spill] sm:$0xff]  ;;  %v7148_v8 = vld [vmem:[#allocation14_spill] sm:$0xff] }
 0x680   :  { %5250 = vmatprep.subr.bf16.mxu0 %v5865_v12  ;;  %5277 = vmatprep.subr.bf16.mxu1 %v7070_v21  ;;  %v361_v12 = vadd.f32 %v7148_v8, %v7147_v7 }
 0x683   :  { %5252 = vmatpush1.bf16.msra.mxu0 %v5889_v18  ;;  %5279 = vmatpush3.bf16.msra.mxu1 %v5891_v19  ;;  %v7149_v18 = vld [vmem:[#allocation15_spill] sm:$0xff] }
 0x684   :  { %5254 = vmatprep.subr.bf16.mxu0 %v7137_v22  ;;  %5280 = vmatprep.subr.bf16.mxu1 %v7070_v21  ;;  %v363_v19 = vadd.f32 %v7149_v18, %v7134_v38 }
 0x687   :  { %5256 = vmatpush1.bf16.msra.mxu0 %v7138_v39  ;;  %5282 = vmatpush3.bf16.msra.mxu1 %v7139_v40 }
 0x688   :  { %5258 = vmatprep.subr.bf16.mxu0 %v7140_v42  ;;  %5283 = vmatprep.subr.bf16.mxu1 %v7070_v21 }
 0x68b   :  { %5260 = vmatpush1.bf16.msra.mxu0 %v7141_v48  ;;  %5285 = vmatpush3.bf16.msra.mxu1 %v7142_v49 }
 0x68c   :  { %5262 = vmatprep.subr.bf16.mxu0 %v7143_v52  ;;  %5286 = vmatprep.subr.bf16.mxu1 %v7070_v21 }
 0x68f   :  { %5264 = vmatpush1.bf16.msra.mxu0 %v7144_v59  ;;  %5288 = vmatpush3.bf16.msra.mxu1 %v7145_v60 }
 0x690   :  { %5290 = vmatprep.subr.bf16.mxu1 %v7146_v63  ;;  %5321 = vmatprep.subr.bf16.mxu0 %v7070_v21 }
 0x725   :  { %v2781_v29 = vpop.f32.mrb[32].mxu0  ;;  %v2852_v23 = vpop.f32.mrb[40].mxu1 }
 0x726   :  { %v2856_v36 = vadd.f32 %v2781_v29, %v361_v12  ;;  %v2783_v53 = vpop.f32.mrb[33].mxu0  ;;  %v4327_v56 = vpop.f32.mrb[41].mxu1  ;;  %v2870_v41 = vadd.f32 %v6730_v37, %v2852_v23 }
 0x727   :  { %v2863_v46 = vadd.f32 %v2783_v53, %v363_v19 }
 0x728   :  { %v3538_v43 = vmul.f32 -1.442695, %v2856_v36 }
 0x729   :  { %v3539_v62 = vmul.f32 -1.442695, %v2863_v46 }
 0x72a   :  { %5534 = vpow2.f32 %v3538_v43 }
 0x72b   :  { %5536 = vpow2.f32 %v3539_v62 }
 0x734   :  { %v5535_v44 = vpop.eup %5534 }
 0x735   :  { %v2860_v9 = vadd.f32 1.0, %v5535_v44  ;;  %v5537_v16 = vpop.eup %5536 }
 0x736   :  { %v2867_v57 = vadd.f32 1.0, %v5537_v16 }
 0x737   :  { %5538 = vrcp.f32 %v2860_v9 }
 0x738   :  { %5540 = vrcp.f32 %v2867_v57 }
 0x741   :  { %v5539_v3 = vpop.eup %5538 }
 0x742   :  { %v2871_v54 = vmul.f32 %v5539_v3, %v2870_v41  ;;  %v5541_v59 = vpop.eup %5540 }
 0x743   :  { %v2874_v63 = vsub.f32 1.0, %v5541_v59  ;;  %v2876_v18 = vmul.f32 %v5541_v59, %v6838_v1 }
 0x744   :  { %v2872_v24 = vadd.f32 %v2871_v54, %v7150_v45 }
 0x745   :  { %v2944_v22 = vpop.f32.mrb[14].mxu1  ;;  %v3015_v39 = vpop.f32.mrb[34].mxu0 }
 0x746   :  { %5542 = vtanh.f32 %v2872_v24  ;;  %v5369_v40 = vadd.f32 %v2944_v22, %v6335_v0  ;;  %v2946_v42 = vpop.f32.mrb[15].mxu1  ;;  %v4362_v48 = vpop.f32.mrb[35].mxu0 }
 0x747   :  { %v5370_v52 = vadd.f32 %v2946_v42, %v6337_v26 }
 0x748   :  { %v3540_v49 = vmul.f32 -1.442695, %v5369_v40 }
 0x749   :  { %v3541_v60 = vmul.f32 -1.442695, %v5370_v52 }
 0x74a   :  { %5544 = vpow2.f32 %v3540_v49 }
 0x74b   :  { %5546 = vpow2.f32 %v3541_v60  ;;  %v7155_v60 = vld [vmem:[#allocation26_spill] sm:$0xff] }
 0x750   :  { %v5543_v8 = vpop.eup %5542 }
 0x751   :  { %v2875_v12 = vmul.f32 %v5543_v8, %v2874_v63 }
 0x753   :  { %v6936_v19 = vadd.f32 %v2876_v18, %v2875_v12 }
 0x754   :  { %v5545_v29 = vpop.eup %5544 }
 0x755   :  { %v3023_v23 = vadd.f32 1.0, %v5545_v29  ;;  %3542 = vst [vmem:[%s7007_s7 + $0x30] sm:$0xff] %v6936_v19  ;;  %3110 = vmatmul.mubr.f32.vlgmr.msra.gmra.mrb[36].mxu0 %v6936_v19  ;;  %4396 = vmatmul.mubr.f32.vlgmr.msra.gmra.mrb[42].mxu1 %v6936_v19  ;;  %v5547_v1 = vpop.eup %5546 }
 0x756   :  { %5292 = vmatpush1.bf16.msra.mxu1 %v6016_v2  ;;  %5323 = vmatpush3.bf16.msra.mxu0 %v6021_v5  ;;  %v3030_v2 = vadd.f32 1.0, %v5547_v1  ;;  %v3033_v5 = vadd.f32 %v6763_v30, %v3015_v39 }
 0x757   :  { %5548 = vrcp.f32 %v3023_v23  ;;  %5294 = vmatprep.subr.bf16.mxu1 %v6026_v6  ;;  %5324 = vmatprep.subr.bf16.mxu0 %v7070_v21 }
 0x758   :  { %3272 = vmatprep.mubr.f32.mxu1 %v7071_v28  ;;  %4430 = vmatprep.mubr.msk.f32.mxu0 %vm5578_vm1, %v7071_v28  ;;  %5550 = vrcp.f32 %v3030_v2 }
 0x75a   :  { %5296 = vmatpush1.bf16.msra.mxu1 %v6047_v15  ;;  %5326 = vmatpush3.bf16.msra.mxu0 %v6053_v17  ;;  %v7151_v17 = vld [vmem:[#allocation25_spill] sm:$0xff] }
 0x75b   :  { %5298 = vmatprep.subr.bf16.mxu1 %v6056_v20  ;;  %5327 = vmatprep.subr.bf16.mxu0 %v7070_v21 }
 0x75e   :  { %5300 = vmatpush1.bf16.msra.mxu1 %v6078_v31  ;;  %5329 = vmatpush3.bf16.msra.mxu0 %v6084_v34 }
 0x75f   :  { %5302 = vmatprep.subr.bf16.mxu1 %v6087_v35  ;;  %5330 = vmatprep.subr.bf16.mxu0 %v7070_v21 }
 0x761   :  { %v5549_v6 = vpop.eup %5548 }
 0x762   :  { %v3034_v15 = vmul.f32 %v5549_v6, %v3033_v5  ;;  %5304 = vmatpush1.bf16.msra.mxu1 %v6106_v47  ;;  %5332 = vmatpush3.bf16.msra.mxu0 %v6112_v51  ;;  %v5551_v31 = vpop.eup %5550 }
 0x763   :  { %5306 = vmatprep.subr.bf16.mxu1 %v6115_v55  ;;  %5333 = vmatprep.subr.bf16.mxu0 %v7070_v21  ;;  %v3037_v34 = vsub.f32 1.0, %v5551_v31  ;;  %v3039_v51 = vmul.f32 %v5551_v31, %v6882_v32 }
 0x764   :  { %v3035_v20 = vadd.f32 %v3034_v15, %v7151_v17 }
 0x766   :  { %5552 = vtanh.f32 %v3035_v20  ;;  %5308 = vmatpush1.bf16.msra.mxu1 %v6134_v4  ;;  %5335 = vmatpush3.bf16.msra.mxu0 %v6140_v10  ;;  %v7152_v4 = vld [vmem:[#allocation16_spill] sm:$0xff] }
 0x767   :  { %5310 = vmatprep.subr.bf16.mxu1 %v6143_v11  ;;  %5336 = vmatprep.subr.bf16.mxu0 %v7070_v21  ;;  %v367_v10 = vadd.f32 %v7152_v4, %v7147_v7  ;;  %v7153_v11 = vld [vmem:[#allocation17_spill] sm:$0xff] }
 0x76a   :  { %5312 = vmatpush1.bf16.msra.mxu1 %v6162_v25  ;;  %5338 = vmatpush3.bf16.msra.mxu0 %v6168_v27  ;;  %v369_v25 = vadd.f32 %v7153_v11, %v7134_v38  ;;  %v7154_v38 = vld [vmem:[#allocation23_spill] sm:$0xff] }
 0x76b   :  { %5314 = vmatprep.subr.bf16.mxu1 %v6171_v33  ;;  %5339 = vmatprep.subr.bf16.mxu0 %v7070_v21 }
 0x76e   :  { %5316 = vmatpush1.bf16.msra.mxu1 %v6190_v50  ;;  %5341 = vmatpush3.bf16.msra.mxu0 %v6196_v58 }
 0x76f   :  { %5318 = vmatprep.subr.bf16.mxu1 %v6199_v61  ;;  %5342 = vmatprep.subr.bf16.mxu0 %v7070_v21 }
 0x770   :  { %v5553_v35 = vpop.eup %5552 }
 0x771   :  { %v3038_v47 = vmul.f32 %v5553_v35, %v3037_v34 }
 0x772   :  { %5320 = vmatpush1.bf16.msra.mxu1 %v6212_v13  ;;  %5344 = vmatpush3.bf16.msra.mxu0 %v6215_v14 }
 0x773   :  { %v3040_v55 = vadd.f32 %v3039_v51, %v3038_v47 }
 0x775   :  { %3543 = vst [vmem:[%s7008_s8 + $0x8] sm:$0xff] %v3040_v55  ;;  %3273 = vmatmul.mubr.f32.vlgmr.msra.gmra.mrb[12].mxu1 %v3040_v55  ;;  %4431 = vmatmul.mubr.f32.vlgmr.msra.gmra.mrb[38].mxu0 %v3040_v55 }
 0x828   :  { %v3111_v27 = vpop.f32.mrb[36].mxu0  ;;  %v3182_v33 = vpop.f32.mrb[42].mxu1 }
 0x829   :  { %v3186_v50 = vadd.f32 %v3111_v27, %v367_v10  ;;  %v3113_v58 = vpop.f32.mrb[37].mxu0  ;;  %v4397_v61 = vpop.f32.mrb[43].mxu1  ;;  %v3200_v7 = vadd.f32 %v6730_v37, %v3182_v33 }
 0x82a   :  { %v3193_v13 = vadd.f32 %v3113_v58, %v369_v25 }
 0x82b   :  { %v3544_v14 = vmul.f32 -1.442695, %v3186_v50 }
 0x82c   :  { %v3545_v21 = vmul.f32 -1.442695, %v3193_v13 }
 0x82d   :  { %5554 = vpow2.f32 %v3544_v14 }
 0x82e   :  { %5556 = vpow2.f32 %v3545_v21 }
 0x837   :  { %v5555_v28 = vpop.eup %5554 }
 0x838   :  { %v3190_v32 = vadd.f32 1.0, %v5555_v28  ;;  %v5557_v36 = vpop.eup %5556 }
 0x839   :  { %v3197_v53 = vadd.f32 1.0, %v5557_v36 }
 0x83a   :  { %5558 = vrcp.f32 %v3190_v32 }
 0x83b   :  { %5560 = vrcp.f32 %v3197_v53 }
 0x844   :  { %v5559_v56 = vpop.eup %5558 }
 0x845   :  { %v3201_v46 = vmul.f32 %v5559_v56, %v3200_v7  ;;  %v5561_v54 = vpop.eup %5560 }
 0x846   :  { %v3204_v24 = vsub.f32 1.0, %v5561_v54  ;;  %v3206_v39 = vmul.f32 %v5561_v54, %v6936_v19 }
 0x847   :  { %v3202_v43 = vadd.f32 %v3201_v46, %v7154_v38 }
 0x848   :  { %v3274_v62 = vpop.f32.mrb[12].mxu1  ;;  %v3345_v44 = vpop.f32.mrb[38].mxu0 }
 0x849   :  { %5562 = vtanh.f32 %v3202_v43  ;;  %v5367_v9 = vadd.f32 %v3274_v62, %v6335_v0  ;;  %v3276_v16 = vpop.f32.mrb[13].mxu1  ;;  %v4432_v57 = vpop.f32.mrb[39].mxu0 }
 0x84a   :  { %v5368_v3 = vadd.f32 %v3276_v16, %v6337_v26  ;;  %v3363_v26 = vadd.f32 %v6763_v30, %v3345_v44 }
 0x84b   :  { %v3546_v41 = vmul.f32 -1.442695, %v5367_v9 }
 0x84c   :  { %v3547_v45 = vmul.f32 -1.442695, %v5368_v3 }
 0x84d   :  { %5564 = vpow2.f32 %v3546_v41 }
 0x84e   :  { %5566 = vpow2.f32 %v3547_v45 }
 0x853   :  { %v5563_v37 = vpop.eup %5562 }
 0x854   :  { %v3205_v22 = vmul.f32 %v5563_v37, %v3204_v24 }
 0x856   :  { %v3207_v40 = vadd.f32 %v3206_v39, %v3205_v22 }
 0x857   :  { %v5565_v42 = vpop.eup %5564 }
 0x858   :  { %3548 = vst [vmem:[%s7007_s7 + $0x38] sm:$0xff] %v3207_v40  ;;  %v3353_v0 = vadd.f32 1.0, %v5565_v42  ;;  %v5567_v48 = vpop.eup %5566 }
 0x859   :  { %v3360_v49 = vadd.f32 1.0, %v5567_v48 }
 0x85a   :  { %5568 = vrcp.f32 %v3353_v0 }
 0x85b   :  { %5570 = vrcp.f32 %v3360_v49 }
 0x864   :  { %v5569_v52 = vpop.eup %5568 }
 0x865   :  { %v3364_v59 = vmul.f32 %v5569_v52, %v3363_v26  ;;  %v5571_v8 = vpop.eup %5570 }
 0x866   :  { %v3367_v12 = vsub.f32 1.0, %v5571_v8  ;;  %v3369_v29 = vmul.f32 %v5571_v8, %v3040_v55 }
 0x867   :  { %v3365_v63 = vadd.f32 %v3364_v59, %v7155_v60 }
 0x869   :  { %5572 = vtanh.f32 %v3365_v63 }
 0x873   :  { %v5573_v18 = vpop.eup %5572 }
 0x874   :  { %v3368_v19 = vmul.f32 %v5573_v18, %v3367_v12 }
 0x876   :  { %v3370_v23 = vadd.f32 %v3369_v29, %v3368_v19 }
 0x878   :  { %3373 = vst [vmem:[%s7008_s8] sm:$0xff] %v3370_v23 }

</bundles_post_ra>
